<compile_context>
chip_gen: v7x
topology: tpu7x:2x2x1
jax: 0.10.0
libtpu: 0.0.40
codegen_flags: <defaults>
</compile_context>

<pallas_src>
import jax
import jax.numpy as jnp
from jax.experimental import pallas as pl
from jax.experimental.pallas import tpu as pltpu

# ----- small synthetic dimensions (lane-dense stand-ins for T5-base sizes) -----
B = 2          # batch
LS = 8         # source sequence length (max_source_length)
LT = 8         # target sequence length (== LS; TODO(synk): real decoder handles LT != LS)
LC = 8         # classifier context sequence length
LM = LC + LT   # merged (context + response) length
NEX = 4        # exemplars per sample
LX = 8         # exemplar sequence length
D = 128        # hidden / embedding dim (surrogate for 768) -- one full lane width
V = 256        # vocab size (surrogate for 32128) -- multiple of 128 lanes
NSPK = 8       # speaker-embedding rows (3 used, padding_idx=0, padded to 8 sublanes)
NLAB = 2       # empathy classifier labels
NHEADS = 4     # 3 empathy classifiers + 1 sentiment regressor
OUTP = 128     # lane-dense packed head-output width (NLAB / 1 live lanes)


# ---------------------------------------------------------------------------
# Single fused kernel: embeddings -> encoder -> exemplar pool -> transform ->
# lm head -> softmax -> 3 classifiers + regressor.  One grid step == one batch
# element ("parallel" so v7x megacore takes one element per TensorCore).
# ---------------------------------------------------------------------------
def _erg_fused_kernel(
        ids_ref, spk_ref, ctx_ref, ctx_m_ref, resp_m_ref,       # per-batch ids / masks
        ex_h_ref, pool_ref,                                      # exemplar hidden + masked pool
        tok_emb_ref, spk_emb_ref, w_enc_ref, b_enc_ref,          # base embeddings + surrogate encoder
        w_tr_ref, b_tr_ref, w_lm_ref, b_lm_ref,                  # transform + surrogate decoder/lm_head
        head_emb_ref, head_wenc_ref, head_benc_ref,              # stacked head weights (resident)
        head_whead_ref, head_bhead_ref,
        logits_ref, head_out_ref):                               # outputs
    f32 = jnp.float32

    # 1) inputs_embeds = embed_tokens(input_ids) + speaker_embedding(speaker_mask)
    #    Gathers as one-hot MXU matmuls (ids are int32 VMEM columns).
    tok_oh = (jax.lax.broadcasted_iota(jnp.int32, (LS, V), 1) == ids_ref[...]).astype(f32)
    spk_oh = (jax.lax.broadcasted_iota(jnp.int32, (LS, NSPK), 1) == spk_ref[...]).astype(f32)
    emb = (jnp.dot(tok_oh, tok_emb_ref[...], preferred_element_type=f32)
           + jnp.dot(spk_oh, spk_emb_ref[...], preferred_element_type=f32))            # (LS, D)

    # 2) TODO(synk): pretrained T5 encoder stack replaced by per-token tanh-linear surrogate
    #    (attention_mask is shape plumbing only for a per-token surrogate).
    enc_h = jnp.tanh(jnp.dot(emb, w_enc_ref[...], preferred_element_type=f32)
                     + b_enc_ref[...])                                                  # (LS, D)

    # 3) exemplar masked mean-pool over seq, then mean over exemplars.
    #    pool already has the exemplar attention mask folded in (precomputed, grid-invariant).
    mp = pool_ref[0]                                                                    # (NEX, NEX*LX)
    sums = jnp.dot(mp, ex_h_ref[...], preferred_element_type=f32)                      # (NEX, D)
    cnt = jnp.sum(mp, axis=1, keepdims=True)                                           # (NEX, 1)
    # NOTE: max(cnt, 1) maps an all-masked exemplar to a zero vector (reference would NaN).
    per_ex = sums / jnp.maximum(cnt, 1.0)
    ex_rep = jnp.sum(per_ex, axis=0, keepdims=True) * (1.0 / NEX)                       # (1, D)

    # 4) transform_to_t5_decoder(concat([enc_h, ex_rep broadcast], -1)) as ONE K=2D matmul
    act = jnp.concatenate([enc_h, jnp.broadcast_to(ex_rep, (LS, D))], axis=-1)          # (LS, 2D)
    dec = jnp.dot(act, w_tr_ref[...], preferred_element_type=f32) + b_tr_ref[...]       # (LS, D)

    # 5) TODO(synk): pretrained T5 decoder + lm_head replaced by a linear vocab projection
    logits = (jnp.dot(dec[:LT, :], w_lm_ref[...], preferred_element_type=f32)
              + b_lm_ref[...])                                                          # (LT, V)
    logits_ref[...] = logits

    # 6) convert_to_probabilities (strategy=0: plain softmax, exact divide) -- computed once,
    #    kept in registers and shared by every downstream head (no HBM round trip).
    mx = jnp.max(logits, axis=-1, keepdims=True)
    e = jnp.exp(logits - mx)
    probs = e / jnp.sum(e, axis=-1, keepdims=True)                                      # (LT, V)

    # 7) 3 empathy classifiers + sentiment regressor with all head weights resident.
    ctx_oh = (jax.lax.broadcasted_iota(jnp.int32, (LC, V), 1) == ctx_ref[...]).astype(f32)
    ctx_m = ctx_m_ref[...]                                                              # (LC, 1)
    resp_m = resp_m_ref[...]                                                            # (LT, 1)
    head_rows = jax.lax.broadcasted_iota(jnp.int32, (NHEADS, OUTP), 0)
    acc = jnp.zeros((NHEADS, OUTP), f32)
    for h in range(NHEADS):                                     # static 4-way unroll
        emb_h = head_emb_ref[h]                                                         # (V, D)
        # response soft-embeddings: einsum('blv,vd->bld') as (LT,V)@(V,D)
        resp = jnp.dot(probs, emb_h, preferred_element_type=f32) * resp_m               # (LT, D)
        # context embeddings: one-hot gather on the MXU
        ctxe = jnp.dot(ctx_oh, emb_h, preferred_element_type=f32) * ctx_m               # (LC, D)
        merged = jnp.concatenate([ctxe, resp], axis=0)                                   # (LM, D)
        # TODO(synk): pretrained T5EncoderModel replaced by per-token tanh-linear surrogate;
        # the merged attention mask is applied multiplicatively above.
        enc = jnp.tanh(jnp.dot(merged, head_wenc_ref[h], preferred_element_type=f32)
                       + head_benc_ref[h])                                               # (LM, D)
        # classifiers read sequence_output[:, 0, :] of [context; response]; the regressor's
        # own sequence is the response only, so its position 0 == merged row LC.
        row = LC if h == NHEADS - 1 else 0
        sel = enc[row:row + 1, :]                                                        # (1, D)
        y = (jnp.dot(sel, head_whead_ref[h], preferred_element_type=f32)
             + head_bhead_ref[h])                                                        # (1, OUTP)
        if h == NHEADS - 1:
            y = jnp.tanh(y)                                      # regressor: tanh(scorer(.))
        acc = jnp.where(head_rows == h, jnp.broadcast_to(y, (NHEADS, OUTP)), acc)
    head_out_ref[0] = acc                                        # packed lane-dense slab


# ---------------------------------------------------------------------------
# ERGMainModel.forward (strategy=0 -> plain softmax in convert_to_probabilities)
# ---------------------------------------------------------------------------
def erg_main_forward(params, input_ids, speaker_mask, attention_mask,
                     context_ids, context_mask, response_mask,
                     exemplar_hidden, exemplar_mask):
    # TODO(synk): HF tokenizers replaced by pre-tokenized integer id inputs;
    # attention_mask is shape plumbing only (the surrogate encoders are per-token).
    del attention_mask

    ids = input_ids.reshape(B * LS, 1).astype(jnp.int32)
    spk = speaker_mask.reshape(B * LS, 1).astype(jnp.int32)
    ctx = context_ids.reshape(B * LC, 1).astype(jnp.int32)
    ctx_m = context_mask.reshape(B * LC, 1).astype(jnp.float32)
    resp_m = response_mask.reshape(B * LT, 1).astype(jnp.float32)
    ex_h = exemplar_hidden.reshape(B * NEX * LX, D).astype(jnp.float32)

    # Grid-invariant exemplar pooling matrix with the exemplar attention mask folded in
    # (hoisted out of the kernel: no per-step iota/compare rebuild, no (NEX*LX, D)
    #  broadcast materialization inside the kernel).
    rows = jnp.arange(NEX, dtype=jnp.int32)[:, None]
    cols = jnp.arange(NEX * LX, dtype=jnp.int32)[None, :]
    pool = ((cols >= rows * LX) & (cols < (rows + 1) * LX)).astype(jnp.float32)   # (NEX, NEX*LX)
    masked_pool = pool[None, :, :] * exemplar_mask.reshape(B, 1, NEX * LX).astype(jnp.float32)

    wspec2 = lambda shape: pl.BlockSpec(shape, lambda b: (0, 0))      # grid-invariant 2-D weight
    wspec3 = lambda shape: pl.BlockSpec(shape, lambda b: (0, 0, 0))   # grid-invariant stacked weight

    in_specs = [
        pl.BlockSpec((LS, 1), lambda b: (b, 0)),                 # input ids (int32 column)
        pl.BlockSpec((LS, 1), lambda b: (b, 0)),                 # speaker ids
        pl.BlockSpec((LC, 1), lambda b: (b, 0)),                 # context ids
        pl.BlockSpec((LC, 1), lambda b: (b, 0)),                 # context mask
        pl.BlockSpec((LT, 1), lambda b: (b, 0)),                 # response mask
        pl.BlockSpec((NEX * LX, D), lambda b: (b, 0)),           # exemplar hidden states
        pl.BlockSpec((1, NEX, NEX * LX), lambda b: (b, 0, 0)),   # masked exemplar pool matrix
        wspec2((V, D)),                                          # base embed_tokens
        wspec2((NSPK, D)),                                       # speaker_embedding
        wspec2((D, D)), wspec2((1, D)),                          # surrogate base encoder
        wspec2((2 * D, D)), wspec2((1, D)),                      # transform_to_t5_decoder (fused K=2D)
        wspec2((D, V)), wspec2((1, V)),                          # surrogate decoder + lm head
        wspec3((NHEADS, V, D)),                                  # head embed tables
        wspec3((NHEADS, D, D)), wspec3((NHEADS, 1, D)),          # head surrogate encoders
        wspec3((NHEADS, D, OUTP)), wspec3((NHEADS, 1, OUTP)),    # head classifier/scorer (padded)
    ]
    out_specs = (
        pl.BlockSpec((LT, V), lambda b: (b, 0)),                 # logits
        pl.BlockSpec((1, NHEADS, OUTP), lambda b: (b, 0, 0)),    # packed head outputs
    )

    logits_flat, head_out = pl.pallas_call(
        _erg_fused_kernel,
        out_shape=(jax.ShapeDtypeStruct((B * LT, V), jnp.float32),
                   jax.ShapeDtypeStruct((B, NHEADS, OUTP), jnp.float32)),
        grid=(B,),
        in_specs=in_specs,
        out_specs=out_specs,
        compiler_params=pltpu.CompilerParams(dimension_semantics=("parallel",)),
    )(ids, spk, ctx, ctx_m, resp_m, ex_h, masked_pool,
      params["tok_emb"], params["spk_emb"], params["w_enc"], params["b_enc"],
      params["w_tr"], params["b_tr"], params["w_lm"], params["b_lm"],
      params["head_emb"], params["head_wenc"], params["head_benc"],
      params["head_whead"], params["head_bhead"])

    logits = logits_flat.reshape(B, LT, V)
    empathy1 = head_out[:, 0, :NLAB]
    empathy2 = head_out[:, 1, :NLAB]
    empathy3 = head_out[:, 2, :NLAB]
    sentiment = head_out[:, 3, 0]                                # (B,)
    return {"logits": logits}, empathy1, empathy2, empathy3, sentiment


# ---------------------------------------------------------------------------
# Parameters (deterministic, synthetic -- no checkpoint loading)
# ---------------------------------------------------------------------------
def init_params(key):
    ks = jax.random.split(key, 11)
    u = lambda k, shape, s=0.2: jax.random.uniform(k, shape, jnp.float32, -s, s)
    p = {}
    p["tok_emb"] = u(ks[0], (V, D))                      # base_model.encoder.embed_tokens
    spk = u(ks[1], (NSPK, D))
    p["spk_emb"] = spk.at[0].set(0.0)                    # speaker_embedding, padding_idx=0
    p["w_enc"], p["b_enc"] = u(ks[2], (D, D)), u(ks[3], (1, D))   # surrogate base encoder
    p["w_tr"] = u(ks[4], (2 * D, D))                     # transform_to_t5_decoder (concat Linear)
    p["b_tr"] = u(ks[5], (1, D))
    p["w_lm"], p["b_lm"] = u(ks[6], (D, V)), jnp.zeros((1, V), jnp.float32)  # surrogate lm head

    # 4 stacked heads: 3 empathy classifiers (NLAB live lanes) + sentiment regressor (1 live lane)
    embs, wencs, bencs, wheads, bheads = [], [], [], [], []
    for i in range(NHEADS):
        ke = jax.random.split(ks[7 + i], 3)
        embs.append(u(ke[0], (V, D)))                    # head encoder.embed_tokens
        wencs.append(u(ke[1], (D, D)))                   # surrogate head T5 encoder
        bencs.append(jnp.zeros((1, D), jnp.float32))
        nout = 1 if i == NHEADS - 1 else NLAB
        wheads.append(jnp.zeros((D, OUTP), jnp.float32).at[:, :nout].set(u(ke[2], (D, nout))))
        bheads.append(jnp.zeros((1, OUTP), jnp.float32))
    p["head_emb"] = jnp.stack(embs, 0)                   # (NHEADS, V, D)
    p["head_wenc"] = jnp.stack(wencs, 0)                 # (NHEADS, D, D)
    p["head_benc"] = jnp.stack(bencs, 0)                 # (NHEADS, 1, D)
    p["head_whead"] = jnp.stack(wheads, 0)               # (NHEADS, D, OUTP)
    p["head_bhead"] = jnp.stack(bheads, 0)               # (NHEADS, 1, OUTP)
    return p


if __name__ == "__main__":
    key = jax.random.PRNGKey(0)
    kp, kid, kspk, kctx, kex = jax.random.split(key, 5)
    params = init_params(kp)

    input_ids = jax.random.randint(kid, (B, LS), 0, V, dtype=jnp.int32)
    speaker_mask = jax.random.randint(kspk, (B, LS), 1, 3, dtype=jnp.int32)  # speakers 1/2 (0 = pad)
    attention_mask = jnp.ones((B, LS), jnp.float32)
    context_ids = jax.random.randint(kctx, (B, LC), 0, V, dtype=jnp.int32)
    context_mask = jnp.ones((B, LC), jnp.float32)
    response_mask = jnp.ones((B, LT), jnp.float32)
    # TODO(synk): exemplar paraphrase-encoder outputs are provided directly
    exemplar_hidden = jax.random.uniform(kex, (B, NEX, LX, D), jnp.float32, -1.0, 1.0)
    exemplar_mask = jnp.ones((B, NEX, LX), jnp.float32)

    fwd = jax.jit(erg_main_forward)
    out = fwd(params, input_ids, speaker_mask, attention_mask,
              context_ids, context_mask, response_mask,
              exemplar_hidden, exemplar_mask)
    jax.block_until_ready(out)
    print("KERNEL_OK")
</pallas_src>

<mosaic_0001>
module attributes {stable_mosaic.version = 11 : i64} {
  func.func @_erg_fused_kernel(%arg0: i32, %arg1: memref<8x1xi32, #tpu.memory_space<vmem>>, %arg2: memref<8x1xi32, #tpu.memory_space<vmem>>, %arg3: memref<8x1xi32, #tpu.memory_space<vmem>>, %arg4: memref<8x1xf32, #tpu.memory_space<vmem>>, %arg5: memref<8x1xf32, #tpu.memory_space<vmem>>, %arg6: memref<32x128xf32, #tpu.memory_space<vmem>>, %arg7: memref<1x4x32xf32, #tpu.memory_space<vmem>>, %arg8: memref<256x128xf32, #tpu.memory_space<vmem>>, %arg9: memref<8x128xf32, #tpu.memory_space<vmem>>, %arg10: memref<128x128xf32, #tpu.memory_space<vmem>>, %arg11: memref<1x128xf32, #tpu.memory_space<vmem>>, %arg12: memref<256x128xf32, #tpu.memory_space<vmem>>, %arg13: memref<1x128xf32, #tpu.memory_space<vmem>>, %arg14: memref<128x256xf32, #tpu.memory_space<vmem>>, %arg15: memref<1x256xf32, #tpu.memory_space<vmem>>, %arg16: memref<4x256x128xf32, #tpu.memory_space<vmem>>, %arg17: memref<4x128x128xf32, #tpu.memory_space<vmem>>, %arg18: memref<4x1x128xf32, #tpu.memory_space<vmem>>, %arg19: memref<4x128x128xf32, #tpu.memory_space<vmem>>, %arg20: memref<4x1x128xf32, #tpu.memory_space<vmem>>, %arg21: memref<8x256xf32, #tpu.memory_space<vmem>>, %arg22: memref<1x4x128xf32, #tpu.memory_space<vmem>>) attributes {dimension_semantics = [#tpu.dimension_semantics<parallel>], iteration_bounds = array<i64: 2>, scalar_prefetch = 0 : i64, scratch_operands = 0 : i64, tpu.core_type = #tpu.core_type<tc>, window_params = [{transform_indices = @transform_0, window_bounds = array<i64: 8, 1>}, {transform_indices = @transform_1, window_bounds = array<i64: 8, 1>}, {transform_indices = @transform_2, window_bounds = array<i64: 8, 1>}, {transform_indices = @transform_3, window_bounds = array<i64: 8, 1>}, {transform_indices = @transform_4, window_bounds = array<i64: 8, 1>}, {transform_indices = @transform_5, window_bounds = array<i64: 32, 128>}, {transform_indices = @transform_6, window_bounds = array<i64: 1, 4, 32>}, {pipeline_mode = #tpu.pipeline_mode<synchronous>, transform_indices = @transform_7, window_bounds = array<i64: 256, 128>}, {pipeline_mode = #tpu.pipeline_mode<synchronous>, transform_indices = @transform_8, window_bounds = array<i64: 8, 128>}, {pipeline_mode = #tpu.pipeline_mode<synchronous>, transform_indices = @transform_9, window_bounds = array<i64: 128, 128>}, {pipeline_mode = #tpu.pipeline_mode<synchronous>, transform_indices = @transform_10, window_bounds = array<i64: 1, 128>}, {pipeline_mode = #tpu.pipeline_mode<synchronous>, transform_indices = @transform_11, window_bounds = array<i64: 256, 128>}, {pipeline_mode = #tpu.pipeline_mode<synchronous>, transform_indices = @transform_12, window_bounds = array<i64: 1, 128>}, {pipeline_mode = #tpu.pipeline_mode<synchronous>, transform_indices = @transform_13, window_bounds = array<i64: 128, 256>}, {pipeline_mode = #tpu.pipeline_mode<synchronous>, transform_indices = @transform_14, window_bounds = array<i64: 1, 256>}, {pipeline_mode = #tpu.pipeline_mode<synchronous>, transform_indices = @transform_15, window_bounds = array<i64: 4, 256, 128>}, {pipeline_mode = #tpu.pipeline_mode<synchronous>, transform_indices = @transform_16, window_bounds = array<i64: 4, 128, 128>}, {pipeline_mode = #tpu.pipeline_mode<synchronous>, transform_indices = @transform_17, window_bounds = array<i64: 4, 1, 128>}, {pipeline_mode = #tpu.pipeline_mode<synchronous>, transform_indices = @transform_18, window_bounds = array<i64: 4, 128, 128>}, {pipeline_mode = #tpu.pipeline_mode<synchronous>, transform_indices = @transform_19, window_bounds = array<i64: 4, 1, 128>}, {transform_indices = @transform_20, window_bounds = array<i64: 8, 256>}, {transform_indices = @transform_21, window_bounds = array<i64: 1, 4, 128>}]} {
    %0 = tpu.iota {dimensions = array<i32: 1>} : vector<8x256xi32>
    %c0 = arith.constant 0 : index
    %c0_0 = arith.constant 0 : index
    %1 = vector.load %arg1[%c0, %c0_0] : memref<8x1xi32, #tpu.memory_space<vmem>>, vector<8x1xi32>
    %2 = vector.broadcast %1 : vector<8x1xi32> to vector<8x256xi32>
    %3 = arith.cmpi eq, %0, %2 : vector<8x256xi32>
    %4 = arith.extui %3 : vector<8x256xi1> to vector<8x256xi32>
    %5 = arith.sitofp %4 : vector<8x256xi32> to vector<8x256xf32>
    %6 = tpu.iota {dimensions = array<i32: 1>} : vector<8x8xi32>
    %c0_1 = arith.constant 0 : index
    %c0_2 = arith.constant 0 : index
    %7 = vector.load %arg2[%c0_1, %c0_2] : memref<8x1xi32, #tpu.memory_space<vmem>>, vector<8x1xi32>
    %8 = vector.broadcast %7 : vector<8x1xi32> to vector<8x8xi32>
    %9 = arith.cmpi eq, %6, %8 : vector<8x8xi32>
    %10 = arith.extui %9 : vector<8x8xi1> to vector<8x8xi32>
    %11 = arith.sitofp %10 : vector<8x8xi32> to vector<8x8xf32>
    %c0_3 = arith.constant 0 : index
    %c0_4 = arith.constant 0 : index
    %12 = vector.load %arg8[%c0_3, %c0_4] : memref<256x128xf32, #tpu.memory_space<vmem>>, vector<256x128xf32>
    %cst = arith.constant dense<0.000000e+00> : vector<8x128xf32>
    %13 = tpu.matmul %5, %12, %cst {dimension_numbers = #tpu.dot_dimension_numbers<[1], [0], [0], [1], [0, 0, 1, 1], [], []>} : vector<8x256xf32>, vector<256x128xf32>, vector<8x128xf32> -> vector<8x128xf32>
    %c0_5 = arith.constant 0 : index
    %c0_6 = arith.constant 0 : index
    %14 = vector.load %arg9[%c0_5, %c0_6] : memref<8x128xf32, #tpu.memory_space<vmem>>, vector<8x128xf32>
    %cst_7 = arith.constant dense<0.000000e+00> : vector<8x128xf32>
    %15 = tpu.matmul %11, %14, %cst_7 {dimension_numbers = #tpu.dot_dimension_numbers<[1], [0], [0], [1], [0, 0, 1, 1], [], []>} : vector<8x8xf32>, vector<8x128xf32>, vector<8x128xf32> -> vector<8x128xf32>
    %16 = arith.addf %13, %15 : vector<8x128xf32>
    %c0_8 = arith.constant 0 : index
    %c0_9 = arith.constant 0 : index
    %17 = vector.load %arg10[%c0_8, %c0_9] : memref<128x128xf32, #tpu.memory_space<vmem>>, vector<128x128xf32>
    %cst_10 = arith.constant dense<0.000000e+00> : vector<8x128xf32>
    %18 = tpu.matmul %16, %17, %cst_10 {dimension_numbers = #tpu.dot_dimension_numbers<[1], [0], [0], [1], [0, 0, 1, 1], [], []>} : vector<8x128xf32>, vector<128x128xf32>, vector<8x128xf32> -> vector<8x128xf32>
    %c0_11 = arith.constant 0 : index
    %c0_12 = arith.constant 0 : index
    %19 = vector.load %arg11[%c0_11, %c0_12] : memref<1x128xf32, #tpu.memory_space<vmem>>, vector<1x128xf32>
    %20 = vector.broadcast %19 : vector<1x128xf32> to vector<8x128xf32>
    %21 = arith.addf %18, %20 : vector<8x128xf32>
    %22 = math.tanh %21 : vector<8x128xf32>
    %c0_13 = arith.constant 0 : index
    %c0_14 = arith.constant 0 : index
    %c0_15 = arith.constant 0 : index
    %23 = vector.load %arg7[%c0_13, %c0_14, %c0_15] : memref<1x4x32xf32, #tpu.memory_space<vmem>>, vector<1x4x32xf32>
    %24 = vector.shape_cast %23 : vector<1x4x32xf32> to vector<4x32xf32>
    %c0_16 = arith.constant 0 : index
    %c0_17 = arith.constant 0 : index
    %25 = vector.load %arg6[%c0_16, %c0_17] : memref<32x128xf32, #tpu.memory_space<vmem>>, vector<32x128xf32>
    %cst_18 = arith.constant dense<0.000000e+00> : vector<4x128xf32>
    %26 = tpu.matmul %24, %25, %cst_18 {dimension_numbers = #tpu.dot_dimension_numbers<[1], [0], [0], [1], [0, 0, 1, 1], [], []>} : vector<4x32xf32>, vector<32x128xf32>, vector<4x128xf32> -> vector<4x128xf32>
    %cst_19 = arith.constant dense<0.000000e+00> : vector<4xf32>
    %27 = vector.multi_reduction <add>, %24, %cst_19 [1] : vector<4x32xf32> to vector<4xf32>
    %28 = vector.shape_cast %27 : vector<4xf32> to vector<4x1xf32>
    %cst_20 = arith.constant 1.000000e+00 : f32
    %29 = vector.broadcast %cst_20 : f32 to vector<4x1xf32>
    %30 = arith.maximumf %28, %29 : vector<4x1xf32>
    %31 = vector.broadcast %30 : vector<4x1xf32> to vector<4x128xf32>
    %32 = arith.divf %26, %31 : vector<4x128xf32>
    %cst_21 = arith.constant dense<0.000000e+00> : vector<128xf32>
    %33 = vector.multi_reduction <add>, %32, %cst_21 [0] : vector<4x128xf32> to vector<128xf32>
    %34 = vector.shape_cast %33 : vector<128xf32> to vector<1x128xf32>
    %cst_22 = arith.constant 2.500000e-01 : f32
    %35 = vector.broadcast %cst_22 : f32 to vector<1x128xf32>
    %36 = arith.mulf %34, %35 : vector<1x128xf32>
    %37 = vector.shape_cast %36 : vector<1x128xf32> to vector<1x128xf32>
    %38 = vector.broadcast %37 : vector<1x128xf32> to vector<8x128xf32>
    %39 = tpu.concatenate %22, %38 in 1 : vector<8x128xf32>, vector<8x128xf32> -> vector<8x256xf32>
    %c0_23 = arith.constant 0 : index
    %c0_24 = arith.constant 0 : index
    %40 = vector.load %arg12[%c0_23, %c0_24] : memref<256x128xf32, #tpu.memory_space<vmem>>, vector<256x128xf32>
    %cst_25 = arith.constant dense<0.000000e+00> : vector<8x128xf32>
    %41 = tpu.matmul %39, %40, %cst_25 {dimension_numbers = #tpu.dot_dimension_numbers<[1], [0], [0], [1], [0, 0, 1, 1], [], []>} : vector<8x256xf32>, vector<256x128xf32>, vector<8x128xf32> -> vector<8x128xf32>
    %c0_26 = arith.constant 0 : index
    %c0_27 = arith.constant 0 : index
    %42 = vector.load %arg13[%c0_26, %c0_27] : memref<1x128xf32, #tpu.memory_space<vmem>>, vector<1x128xf32>
    %43 = vector.broadcast %42 : vector<1x128xf32> to vector<8x128xf32>
    %44 = arith.addf %41, %43 : vector<8x128xf32>
    %c0_28 = arith.constant 0 : index
    %c0_29 = arith.constant 0 : index
    %45 = vector.load %arg14[%c0_28, %c0_29] : memref<128x256xf32, #tpu.memory_space<vmem>>, vector<128x256xf32>
    %cst_30 = arith.constant dense<0.000000e+00> : vector<8x256xf32>
    %46 = tpu.matmul %44, %45, %cst_30 {dimension_numbers = #tpu.dot_dimension_numbers<[1], [0], [0], [1], [0, 0, 1, 1], [], []>} : vector<8x128xf32>, vector<128x256xf32>, vector<8x256xf32> -> vector<8x256xf32>
    %c0_31 = arith.constant 0 : index
    %c0_32 = arith.constant 0 : index
    %47 = vector.load %arg15[%c0_31, %c0_32] : memref<1x256xf32, #tpu.memory_space<vmem>>, vector<1x256xf32>
    %48 = vector.broadcast %47 : vector<1x256xf32> to vector<8x256xf32>
    %49 = arith.addf %46, %48 : vector<8x256xf32>
    %c0_33 = arith.constant 0 : index
    %c0_34 = arith.constant 0 : index
    %50 = vector.load %arg21[%c0_33, %c0_34] : memref<8x256xf32, #tpu.memory_space<vmem>>, vector<8x256xf32>
    tpu.vector_store %arg21[%c0_33, %c0_34], %49 {strides = array<i32>} : memref<8x256xf32, #tpu.memory_space<vmem>>, vector<8x256xf32>,
    %cst_35 = arith.constant dense<0xFF800000> : vector<8xf32>
    %51 = vector.multi_reduction <maximumf>, %49, %cst_35 [1] : vector<8x256xf32> to vector<8xf32>
    %52 = vector.shape_cast %51 : vector<8xf32> to vector<8x1xf32>
    %53 = vector.broadcast %52 : vector<8x1xf32> to vector<8x256xf32>
    %54 = arith.subf %49, %53 : vector<8x256xf32>
    %55 = math.exp %54 : vector<8x256xf32>
    %cst_36 = arith.constant dense<0.000000e+00> : vector<8xf32>
    %56 = vector.multi_reduction <add>, %55, %cst_36 [1] : vector<8x256xf32> to vector<8xf32>
    %57 = vector.shape_cast %56 : vector<8xf32> to vector<8x1xf32>
    %58 = vector.broadcast %57 : vector<8x1xf32> to vector<8x256xf32>
    %59 = arith.divf %55, %58 : vector<8x256xf32>
    %60 = tpu.iota {dimensions = array<i32: 1>} : vector<8x256xi32>
    %c0_37 = arith.constant 0 : index
    %c0_38 = arith.constant 0 : index
    %61 = vector.load %arg3[%c0_37, %c0_38] : memref<8x1xi32, #tpu.memory_space<vmem>>, vector<8x1xi32>
    %62 = vector.broadcast %61 : vector<8x1xi32> to vector<8x256xi32>
    %63 = arith.cmpi eq, %60, %62 : vector<8x256xi32>
    %64 = arith.extui %63 : vector<8x256xi1> to vector<8x256xi32>
    %65 = arith.sitofp %64 : vector<8x256xi32> to vector<8x256xf32>
    %c0_39 = arith.constant 0 : index
    %c0_40 = arith.constant 0 : index
    %66 = vector.load %arg4[%c0_39, %c0_40] : memref<8x1xf32, #tpu.memory_space<vmem>>, vector<8x1xf32>
    %c0_41 = arith.constant 0 : index
    %c0_42 = arith.constant 0 : index
    %67 = vector.load %arg5[%c0_41, %c0_42] : memref<8x1xf32, #tpu.memory_space<vmem>>, vector<8x1xf32>
    %68 = tpu.iota {dimensions = array<i32: 0>} : vector<4x128xi32>
    %cst_43 = arith.constant 0.000000e+00 : f32
    %69 = vector.broadcast %cst_43 : f32 to vector<4x128xf32>
    %c0_44 = arith.constant 0 : index
    %c0_45 = arith.constant 0 : index
    %c0_46 = arith.constant 0 : index
    %70 = vector.load %arg16[%c0_44, %c0_45, %c0_46] : memref<4x256x128xf32, #tpu.memory_space<vmem>>, vector<1x256x128xf32>
    %71 = vector.shape_cast %70 : vector<1x256x128xf32> to vector<256x128xf32>
    %cst_47 = arith.constant dense<0.000000e+00> : vector<8x128xf32>
    %72 = tpu.matmul %59, %71, %cst_47 {dimension_numbers = #tpu.dot_dimension_numbers<[1], [0], [0], [1], [0, 0, 1, 1], [], []>} : vector<8x256xf32>, vector<256x128xf32>, vector<8x128xf32> -> vector<8x128xf32>
    %73 = vector.broadcast %67 : vector<8x1xf32> to vector<8x128xf32>
    %74 = arith.mulf %72, %73 : vector<8x128xf32>
    %cst_48 = arith.constant dense<0.000000e+00> : vector<8x128xf32>
    %75 = tpu.matmul %65, %71, %cst_48 {dimension_numbers = #tpu.dot_dimension_numbers<[1], [0], [0], [1], [0, 0, 1, 1], [], []>} : vector<8x256xf32>, vector<256x128xf32>, vector<8x128xf32> -> vector<8x128xf32>
    %76 = vector.broadcast %66 : vector<8x1xf32> to vector<8x128xf32>
    %77 = arith.mulf %75, %76 : vector<8x128xf32>
    %78 = tpu.concatenate %77, %74 in 0 : vector<8x128xf32>, vector<8x128xf32> -> vector<16x128xf32>
    %c0_49 = arith.constant 0 : index
    %c0_50 = arith.constant 0 : index
    %c0_51 = arith.constant 0 : index
    %79 = vector.load %arg17[%c0_49, %c0_50, %c0_51] : memref<4x128x128xf32, #tpu.memory_space<vmem>>, vector<1x128x128xf32>
    %80 = vector.shape_cast %79 : vector<1x128x128xf32> to vector<128x128xf32>
    %cst_52 = arith.constant dense<0.000000e+00> : vector<16x128xf32>
    %81 = tpu.matmul %78, %80, %cst_52 {dimension_numbers = #tpu.dot_dimension_numbers<[1], [0], [0], [1], [0, 0, 1, 1], [], []>} : vector<16x128xf32>, vector<128x128xf32>, vector<16x128xf32> -> vector<16x128xf32>
    %c0_53 = arith.constant 0 : index
    %c0_54 = arith.constant 0 : index
    %c0_55 = arith.constant 0 : index
    %82 = vector.load %arg18[%c0_53, %c0_54, %c0_55] : memref<4x1x128xf32, #tpu.memory_space<vmem>>, vector<1x1x128xf32>
    %83 = vector.shape_cast %82 : vector<1x1x128xf32> to vector<1x128xf32>
    %84 = vector.broadcast %83 : vector<1x128xf32> to vector<16x128xf32>
    %85 = arith.addf %81, %84 : vector<16x128xf32>
    %86 = math.tanh %85 : vector<16x128xf32>
    %87 = vector.extract_strided_slice %86 {offsets = [0, 0], sizes = [1, 128], strides = [1, 1]} : vector<16x128xf32> to vector<1x128xf32>
    %c0_56 = arith.constant 0 : index
    %c0_57 = arith.constant 0 : index
    %c0_58 = arith.constant 0 : index
    %88 = vector.load %arg19[%c0_56, %c0_57, %c0_58] : memref<4x128x128xf32, #tpu.memory_space<vmem>>, vector<1x128x128xf32>
    %89 = vector.shape_cast %88 : vector<1x128x128xf32> to vector<128x128xf32>
    %cst_59 = arith.constant dense<0.000000e+00> : vector<1x128xf32>
    %90 = tpu.matmul %87, %89, %cst_59 {dimension_numbers = #tpu.dot_dimension_numbers<[1], [0], [0], [1], [0, 0, 1, 1], [], []>} : vector<1x128xf32>, vector<128x128xf32>, vector<1x128xf32> -> vector<1x128xf32>
    %c0_60 = arith.constant 0 : index
    %c0_61 = arith.constant 0 : index
    %c0_62 = arith.constant 0 : index
    %91 = vector.load %arg20[%c0_60, %c0_61, %c0_62] : memref<4x1x128xf32, #tpu.memory_space<vmem>>, vector<1x1x128xf32>
    %92 = vector.shape_cast %91 : vector<1x1x128xf32> to vector<1x128xf32>
    %93 = arith.addf %90, %92 : vector<1x128xf32>
    %c0_i32 = arith.constant 0 : i32
    %94 = vector.broadcast %c0_i32 : i32 to vector<4x128xi32>
    %95 = arith.cmpi eq, %68, %94 : vector<4x128xi32>
    %96 = vector.shape_cast %93 : vector<1x128xf32> to vector<1x128xf32>
    %97 = vector.broadcast %96 : vector<1x128xf32> to vector<4x128xf32>
    %98 = arith.select %95, %97, %69 : vector<4x128xi1>, vector<4x128xf32>
    %c1 = arith.constant 1 : index
    %c0_63 = arith.constant 0 : index
    %c0_64 = arith.constant 0 : index
    %99 = vector.load %arg16[%c1, %c0_63, %c0_64] : memref<4x256x128xf32, #tpu.memory_space<vmem>>, vector<1x256x128xf32>
    %100 = vector.shape_cast %99 : vector<1x256x128xf32> to vector<256x128xf32>
    %cst_65 = arith.constant dense<0.000000e+00> : vector<8x128xf32>
    %101 = tpu.matmul %59, %100, %cst_65 {dimension_numbers = #tpu.dot_dimension_numbers<[1], [0], [0], [1], [0, 0, 1, 1], [], []>} : vector<8x256xf32>, vector<256x128xf32>, vector<8x128xf32> -> vector<8x128xf32>
    %102 = vector.broadcast %67 : vector<8x1xf32> to vector<8x128xf32>
    %103 = arith.mulf %101, %102 : vector<8x128xf32>
    %cst_66 = arith.constant dense<0.000000e+00> : vector<8x128xf32>
    %104 = tpu.matmul %65, %100, %cst_66 {dimension_numbers = #tpu.dot_dimension_numbers<[1], [0], [0], [1], [0, 0, 1, 1], [], []>} : vector<8x256xf32>, vector<256x128xf32>, vector<8x128xf32> -> vector<8x128xf32>
    %105 = vector.broadcast %66 : vector<8x1xf32> to vector<8x128xf32>
    %106 = arith.mulf %104, %105 : vector<8x128xf32>
    %107 = tpu.concatenate %106, %103 in 0 : vector<8x128xf32>, vector<8x128xf32> -> vector<16x128xf32>
    %c1_67 = arith.constant 1 : index
    %c0_68 = arith.constant 0 : index
    %c0_69 = arith.constant 0 : index
    %108 = vector.load %arg17[%c1_67, %c0_68, %c0_69] : memref<4x128x128xf32, #tpu.memory_space<vmem>>, vector<1x128x128xf32>
    %109 = vector.shape_cast %108 : vector<1x128x128xf32> to vector<128x128xf32>
    %cst_70 = arith.constant dense<0.000000e+00> : vector<16x128xf32>
    %110 = tpu.matmul %107, %109, %cst_70 {dimension_numbers = #tpu.dot_dimension_numbers<[1], [0], [0], [1], [0, 0, 1, 1], [], []>} : vector<16x128xf32>, vector<128x128xf32>, vector<16x128xf32> -> vector<16x128xf32>
    %c1_71 = arith.constant 1 : index
    %c0_72 = arith.constant 0 : index
    %c0_73 = arith.constant 0 : index
    %111 = vector.load %arg18[%c1_71, %c0_72, %c0_73] : memref<4x1x128xf32, #tpu.memory_space<vmem>>, vector<1x1x128xf32>
    %112 = vector.shape_cast %111 : vector<1x1x128xf32> to vector<1x128xf32>
    %113 = vector.broadcast %112 : vector<1x128xf32> to vector<16x128xf32>
    %114 = arith.addf %110, %113 : vector<16x128xf32>
    %115 = math.tanh %114 : vector<16x128xf32>
    %116 = vector.extract_strided_slice %115 {offsets = [0, 0], sizes = [1, 128], strides = [1, 1]} : vector<16x128xf32> to vector<1x128xf32>
    %c1_74 = arith.constant 1 : index
    %c0_75 = arith.constant 0 : index
    %c0_76 = arith.constant 0 : index
    %117 = vector.load %arg19[%c1_74, %c0_75, %c0_76] : memref<4x128x128xf32, #tpu.memory_space<vmem>>, vector<1x128x128xf32>
    %118 = vector.shape_cast %117 : vector<1x128x128xf32> to vector<128x128xf32>
    %cst_77 = arith.constant dense<0.000000e+00> : vector<1x128xf32>
    %119 = tpu.matmul %116, %118, %cst_77 {dimension_numbers = #tpu.dot_dimension_numbers<[1], [0], [0], [1], [0, 0, 1, 1], [], []>} : vector<1x128xf32>, vector<128x128xf32>, vector<1x128xf32> -> vector<1x128xf32>
    %c1_78 = arith.constant 1 : index
    %c0_79 = arith.constant 0 : index
    %c0_80 = arith.constant 0 : index
    %120 = vector.load %arg20[%c1_78, %c0_79, %c0_80] : memref<4x1x128xf32, #tpu.memory_space<vmem>>, vector<1x1x128xf32>
    %121 = vector.shape_cast %120 : vector<1x1x128xf32> to vector<1x128xf32>
    %122 = arith.addf %119, %121 : vector<1x128xf32>
    %c1_i32 = arith.constant 1 : i32
    %123 = vector.broadcast %c1_i32 : i32 to vector<4x128xi32>
    %124 = arith.cmpi eq, %68, %123 : vector<4x128xi32>
    %125 = vector.shape_cast %122 : vector<1x128xf32> to vector<1x128xf32>
    %126 = vector.broadcast %125 : vector<1x128xf32> to vector<4x128xf32>
    %127 = arith.select %124, %126, %98 : vector<4x128xi1>, vector<4x128xf32>
    %c2 = arith.constant 2 : index
    %c0_81 = arith.constant 0 : index
    %c0_82 = arith.constant 0 : index
    %128 = vector.load %arg16[%c2, %c0_81, %c0_82] : memref<4x256x128xf32, #tpu.memory_space<vmem>>, vector<1x256x128xf32>
    %129 = vector.shape_cast %128 : vector<1x256x128xf32> to vector<256x128xf32>
    %cst_83 = arith.constant dense<0.000000e+00> : vector<8x128xf32>
    %130 = tpu.matmul %59, %129, %cst_83 {dimension_numbers = #tpu.dot_dimension_numbers<[1], [0], [0], [1], [0, 0, 1, 1], [], []>} : vector<8x256xf32>, vector<256x128xf32>, vector<8x128xf32> -> vector<8x128xf32>
    %131 = vector.broadcast %67 : vector<8x1xf32> to vector<8x128xf32>
    %132 = arith.mulf %130, %131 : vector<8x128xf32>
    %cst_84 = arith.constant dense<0.000000e+00> : vector<8x128xf32>
    %133 = tpu.matmul %65, %129, %cst_84 {dimension_numbers = #tpu.dot_dimension_numbers<[1], [0], [0], [1], [0, 0, 1, 1], [], []>} : vector<8x256xf32>, vector<256x128xf32>, vector<8x128xf32> -> vector<8x128xf32>
    %134 = vector.broadcast %66 : vector<8x1xf32> to vector<8x128xf32>
    %135 = arith.mulf %133, %134 : vector<8x128xf32>
    %136 = tpu.concatenate %135, %132 in 0 : vector<8x128xf32>, vector<8x128xf32> -> vector<16x128xf32>
    %c2_85 = arith.constant 2 : index
    %c0_86 = arith.constant 0 : index
    %c0_87 = arith.constant 0 : index
    %137 = vector.load %arg17[%c2_85, %c0_86, %c0_87] : memref<4x128x128xf32, #tpu.memory_space<vmem>>, vector<1x128x128xf32>
    %138 = vector.shape_cast %137 : vector<1x128x128xf32> to vector<128x128xf32>
    %cst_88 = arith.constant dense<0.000000e+00> : vector<16x128xf32>
    %139 = tpu.matmul %136, %138, %cst_88 {dimension_numbers = #tpu.dot_dimension_numbers<[1], [0], [0], [1], [0, 0, 1, 1], [], []>} : vector<16x128xf32>, vector<128x128xf32>, vector<16x128xf32> -> vector<16x128xf32>
    %c2_89 = arith.constant 2 : index
    %c0_90 = arith.constant 0 : index
    %c0_91 = arith.constant 0 : index
    %140 = vector.load %arg18[%c2_89, %c0_90, %c0_91] : memref<4x1x128xf32, #tpu.memory_space<vmem>>, vector<1x1x128xf32>
    %141 = vector.shape_cast %140 : vector<1x1x128xf32> to vector<1x128xf32>
    %142 = vector.broadcast %141 : vector<1x128xf32> to vector<16x128xf32>
    %143 = arith.addf %139, %142 : vector<16x128xf32>
    %144 = math.tanh %143 : vector<16x128xf32>
    %145 = vector.extract_strided_slice %144 {offsets = [0, 0], sizes = [1, 128], strides = [1, 1]} : vector<16x128xf32> to vector<1x128xf32>
    %c2_92 = arith.constant 2 : index
    %c0_93 = arith.constant 0 : index
    %c0_94 = arith.constant 0 : index
    %146 = vector.load %arg19[%c2_92, %c0_93, %c0_94] : memref<4x128x128xf32, #tpu.memory_space<vmem>>, vector<1x128x128xf32>
    %147 = vector.shape_cast %146 : vector<1x128x128xf32> to vector<128x128xf32>
    %cst_95 = arith.constant dense<0.000000e+00> : vector<1x128xf32>
    %148 = tpu.matmul %145, %147, %cst_95 {dimension_numbers = #tpu.dot_dimension_numbers<[1], [0], [0], [1], [0, 0, 1, 1], [], []>} : vector<1x128xf32>, vector<128x128xf32>, vector<1x128xf32> -> vector<1x128xf32>
    %c2_96 = arith.constant 2 : index
    %c0_97 = arith.constant 0 : index
    %c0_98 = arith.constant 0 : index
    %149 = vector.load %arg20[%c2_96, %c0_97, %c0_98] : memref<4x1x128xf32, #tpu.memory_space<vmem>>, vector<1x1x128xf32>
    %150 = vector.shape_cast %149 : vector<1x1x128xf32> to vector<1x128xf32>
    %151 = arith.addf %148, %150 : vector<1x128xf32>
    %c2_i32 = arith.constant 2 : i32
    %152 = vector.broadcast %c2_i32 : i32 to vector<4x128xi32>
    %153 = arith.cmpi eq, %68, %152 : vector<4x128xi32>
    %154 = vector.shape_cast %151 : vector<1x128xf32> to vector<1x128xf32>
    %155 = vector.broadcast %154 : vector<1x128xf32> to vector<4x128xf32>
    %156 = arith.select %153, %155, %127 : vector<4x128xi1>, vector<4x128xf32>
    %c3 = arith.constant 3 : index
    %c0_99 = arith.constant 0 : index
    %c0_100 = arith.constant 0 : index
    %157 = vector.load %arg16[%c3, %c0_99, %c0_100] : memref<4x256x128xf32, #tpu.memory_space<vmem>>, vector<1x256x128xf32>
    %158 = vector.shape_cast %157 : vector<1x256x128xf32> to vector<256x128xf32>
    %cst_101 = arith.constant dense<0.000000e+00> : vector<8x128xf32>
    %159 = tpu.matmul %59, %158, %cst_101 {dimension_numbers = #tpu.dot_dimension_numbers<[1], [0], [0], [1], [0, 0, 1, 1], [], []>} : vector<8x256xf32>, vector<256x128xf32>, vector<8x128xf32> -> vector<8x128xf32>
    %160 = vector.broadcast %67 : vector<8x1xf32> to vector<8x128xf32>
    %161 = arith.mulf %159, %160 : vector<8x128xf32>
    %cst_102 = arith.constant dense<0.000000e+00> : vector<8x128xf32>
    %162 = tpu.matmul %65, %158, %cst_102 {dimension_numbers = #tpu.dot_dimension_numbers<[1], [0], [0], [1], [0, 0, 1, 1], [], []>} : vector<8x256xf32>, vector<256x128xf32>, vector<8x128xf32> -> vector<8x128xf32>
    %163 = vector.broadcast %66 : vector<8x1xf32> to vector<8x128xf32>
    %164 = arith.mulf %162, %163 : vector<8x128xf32>
    %165 = tpu.concatenate %164, %161 in 0 : vector<8x128xf32>, vector<8x128xf32> -> vector<16x128xf32>
    %c3_103 = arith.constant 3 : index
    %c0_104 = arith.constant 0 : index
    %c0_105 = arith.constant 0 : index
    %166 = vector.load %arg17[%c3_103, %c0_104, %c0_105] : memref<4x128x128xf32, #tpu.memory_space<vmem>>, vector<1x128x128xf32>
    %167 = vector.shape_cast %166 : vector<1x128x128xf32> to vector<128x128xf32>
    %cst_106 = arith.constant dense<0.000000e+00> : vector<16x128xf32>
    %168 = tpu.matmul %165, %167, %cst_106 {dimension_numbers = #tpu.dot_dimension_numbers<[1], [0], [0], [1], [0, 0, 1, 1], [], []>} : vector<16x128xf32>, vector<128x128xf32>, vector<16x128xf32> -> vector<16x128xf32>
    %c3_107 = arith.constant 3 : index
    %c0_108 = arith.constant 0 : index
    %c0_109 = arith.constant 0 : index
    %169 = vector.load %arg18[%c3_107, %c0_108, %c0_109] : memref<4x1x128xf32, #tpu.memory_space<vmem>>, vector<1x1x128xf32>
    %170 = vector.shape_cast %169 : vector<1x1x128xf32> to vector<1x128xf32>
    %171 = vector.broadcast %170 : vector<1x128xf32> to vector<16x128xf32>
    %172 = arith.addf %168, %171 : vector<16x128xf32>
    %173 = math.tanh %172 : vector<16x128xf32>
    %174 = vector.extract_strided_slice %173 {offsets = [8, 0], sizes = [1, 128], strides = [1, 1]} : vector<16x128xf32> to vector<1x128xf32>
    %c3_110 = arith.constant 3 : index
    %c0_111 = arith.constant 0 : index
    %c0_112 = arith.constant 0 : index
    %175 = vector.load %arg19[%c3_110, %c0_111, %c0_112] : memref<4x128x128xf32, #tpu.memory_space<vmem>>, vector<1x128x128xf32>
    %176 = vector.shape_cast %175 : vector<1x128x128xf32> to vector<128x128xf32>
    %cst_113 = arith.constant dense<0.000000e+00> : vector<1x128xf32>
    %177 = tpu.matmul %174, %176, %cst_113 {dimension_numbers = #tpu.dot_dimension_numbers<[1], [0], [0], [1], [0, 0, 1, 1], [], []>} : vector<1x128xf32>, vector<128x128xf32>, vector<1x128xf32> -> vector<1x128xf32>
    %c3_114 = arith.constant 3 : index
    %c0_115 = arith.constant 0 : index
    %c0_116 = arith.constant 0 : index
    %178 = vector.load %arg20[%c3_114, %c0_115, %c0_116] : memref<4x1x128xf32, #tpu.memory_space<vmem>>, vector<1x1x128xf32>
    %179 = vector.shape_cast %178 : vector<1x1x128xf32> to vector<1x128xf32>
    %180 = arith.addf %177, %179 : vector<1x128xf32>
    %181 = math.tanh %180 : vector<1x128xf32>
    %c3_i32 = arith.constant 3 : i32
    %182 = vector.broadcast %c3_i32 : i32 to vector<4x128xi32>
    %183 = arith.cmpi eq, %68, %182 : vector<4x128xi32>
    %184 = vector.shape_cast %181 : vector<1x128xf32> to vector<1x128xf32>
    %185 = vector.broadcast %184 : vector<1x128xf32> to vector<4x128xf32>
    %186 = arith.select %183, %185, %156 : vector<4x128xi1>, vector<4x128xf32>
    %c0_117 = arith.constant 0 : index
    %c0_118 = arith.constant 0 : index
    %c0_119 = arith.constant 0 : index
    %187 = vector.load %arg22[%c0_117, %c0_118, %c0_119] : memref<1x4x128xf32, #tpu.memory_space<vmem>>, vector<1x4x128xf32>
    %188 = vector.shape_cast %187 : vector<1x4x128xf32> to vector<4x128xf32>
    %189 = vector.shape_cast %186 : vector<4x128xf32> to vector<1x4x128xf32>
    tpu.vector_store %arg22[%c0_117, %c0_118, %c0_119], %189 {strides = array<i32>} : memref<1x4x128xf32, #tpu.memory_space<vmem>>, vector<1x4x128xf32>,
    return
  }
  func.func @transform_0(%arg0: i32) -> (i32, i32) {
    %c0_i32 = arith.constant 0 : i32
    %c0_i32_0 = arith.constant 0 : i32
    return %arg0, %c0_i32 : i32, i32
  }
  func.func @transform_1(%arg0: i32) -> (i32, i32) {
    %c0_i32 = arith.constant 0 : i32
    %c0_i32_0 = arith.constant 0 : i32
    return %arg0, %c0_i32 : i32, i32
  }
  func.func @transform_2(%arg0: i32) -> (i32, i32) {
    %c0_i32 = arith.constant 0 : i32
    %c0_i32_0 = arith.constant 0 : i32
    return %arg0, %c0_i32 : i32, i32
  }
  func.func @transform_3(%arg0: i32) -> (i32, i32) {
    %c0_i32 = arith.constant 0 : i32
    %c0_i32_0 = arith.constant 0 : i32
    return %arg0, %c0_i32 : i32, i32
  }
  func.func @transform_4(%arg0: i32) -> (i32, i32) {
    %c0_i32 = arith.constant 0 : i32
    %c0_i32_0 = arith.constant 0 : i32
    return %arg0, %c0_i32 : i32, i32
  }
  func.func @transform_5(%arg0: i32) -> (i32, i32) {
    %c0_i32 = arith.constant 0 : i32
    %c0_i32_0 = arith.constant 0 : i32
    return %arg0, %c0_i32 : i32, i32
  }
  func.func @transform_6(%arg0: i32) -> (i32, i32, i32) {
    %c0_i32 = arith.constant 0 : i32
    %c0_i32_0 = arith.constant 0 : i32
    %c0_i32_1 = arith.constant 0 : i32
    return %arg0, %c0_i32, %c0_i32_0 : i32, i32, i32
  }
  func.func @transform_7(%arg0: i32) -> (i32, i32) {
    %c0_i32 = arith.constant 0 : i32
    %c0_i32_0 = arith.constant 0 : i32
    %c0_i32_1 = arith.constant 0 : i32
    return %c0_i32, %c0_i32_0 : i32, i32
  }
  func.func @transform_8(%arg0: i32) -> (i32, i32) {
    %c0_i32 = arith.constant 0 : i32
    %c0_i32_0 = arith.constant 0 : i32
    %c0_i32_1 = arith.constant 0 : i32
    return %c0_i32, %c0_i32_0 : i32, i32
  }
  func.func @transform_9(%arg0: i32) -> (i32, i32) {
    %c0_i32 = arith.constant 0 : i32
    %c0_i32_0 = arith.constant 0 : i32
    %c0_i32_1 = arith.constant 0 : i32
    return %c0_i32, %c0_i32_0 : i32, i32
  }
  func.func @transform_10(%arg0: i32) -> (i32, i32) {
    %c0_i32 = arith.constant 0 : i32
    %c0_i32_0 = arith.constant 0 : i32
    %c0_i32_1 = arith.constant 0 : i32
    return %c0_i32, %c0_i32_0 : i32, i32
  }
  func.func @transform_11(%arg0: i32) -> (i32, i32) {
    %c0_i32 = arith.constant 0 : i32
    %c0_i32_0 = arith.constant 0 : i32
    %c0_i32_1 = arith.constant 0 : i32
    return %c0_i32, %c0_i32_0 : i32, i32
  }
  func.func @transform_12(%arg0: i32) -> (i32, i32) {
    %c0_i32 = arith.constant 0 : i32
    %c0_i32_0 = arith.constant 0 : i32
    %c0_i32_1 = arith.constant 0 : i32
    return %c0_i32, %c0_i32_0 : i32, i32
  }
  func.func @transform_13(%arg0: i32) -> (i32, i32) {
    %c0_i32 = arith.constant 0 : i32
    %c0_i32_0 = arith.constant 0 : i32
    %c0_i32_1 = arith.constant 0 : i32
    return %c0_i32, %c0_i32_0 : i32, i32
  }
  func.func @transform_14(%arg0: i32) -> (i32, i32) {
    %c0_i32 = arith.constant 0 : i32
    %c0_i32_0 = arith.constant 0 : i32
    %c0_i32_1 = arith.constant 0 : i32
    return %c0_i32, %c0_i32_0 : i32, i32
  }
  func.func @transform_15(%arg0: i32) -> (i32, i32, i32) {
    %c0_i32 = arith.constant 0 : i32
    %c0_i32_0 = arith.constant 0 : i32
    %c0_i32_1 = arith.constant 0 : i32
    %c0_i32_2 = arith.constant 0 : i32
    return %c0_i32, %c0_i32_0, %c0_i32_1 : i32, i32, i32
  }
  func.func @transform_16(%arg0: i32) -> (i32, i32, i32) {
    %c0_i32 = arith.constant 0 : i32
    %c0_i32_0 = arith.constant 0 : i32
    %c0_i32_1 = arith.constant 0 : i32
    %c0_i32_2 = arith.constant 0 : i32
    return %c0_i32, %c0_i32_0, %c0_i32_1 : i32, i32, i32
  }
  func.func @transform_17(%arg0: i32) -> (i32, i32, i32) {
    %c0_i32 = arith.constant 0 : i32
    %c0_i32_0 = arith.constant 0 : i32
    %c0_i32_1 = arith.constant 0 : i32
    %c0_i32_2 = arith.constant 0 : i32
    return %c0_i32, %c0_i32_0, %c0_i32_1 : i32, i32, i32
  }
  func.func @transform_18(%arg0: i32) -> (i32, i32, i32) {
    %c0_i32 = arith.constant 0 : i32
    %c0_i32_0 = arith.constant 0 : i32
    %c0_i32_1 = arith.constant 0 : i32
    %c0_i32_2 = arith.constant 0 : i32
    return %c0_i32, %c0_i32_0, %c0_i32_1 : i32, i32, i32
  }
  func.func @transform_19(%arg0: i32) -> (i32, i32, i32) {
    %c0_i32 = arith.constant 0 : i32
    %c0_i32_0 = arith.constant 0 : i32
    %c0_i32_1 = arith.constant 0 : i32
    %c0_i32_2 = arith.constant 0 : i32
    return %c0_i32, %c0_i32_0, %c0_i32_1 : i32, i32, i32
  }
  func.func @transform_20(%arg0: i32) -> (i32, i32) {
    %c0_i32 = arith.constant 0 : i32
    %c0_i32_0 = arith.constant 0 : i32
    return %arg0, %c0_i32 : i32, i32
  }
  func.func @transform_21(%arg0: i32) -> (i32, i32, i32) {
    %c0_i32 = arith.constant 0 : i32
    %c0_i32_0 = arith.constant 0 : i32
    %c0_i32_1 = arith.constant 0 : i32
    return %arg0, %c0_i32, %c0_i32_0 : i32, i32, i32
  }
}

</mosaic_0001>

<bundles_post_ra>
// kernel: mul.15
= control target key start
LH: loop header
LB: loop body
LE: loop exit
PB: predicated region body
PF: predicated region fallthrough
CT: control target
= control target key end

     0   :  { %s29_s10 = smov 3  ;;  %s10_s11 = smov 3  ;;  %vm12_vm0 = vcmask 64512   ;;  %vm19_vm1 = vcmask 261312   ;;  %vm26_vm2 = vcmask 195712   ;;  %vm33_vm3 = vcmask 130112   ;;  %s67_s0 = inlined_call_operand.vmem [shape: f32[2,4,8], index: 0, kind: input, shape index: {}]   ;;  %s68_s1 = inlined_call_operand.vmem [shape: f32[2,32], index: 1, kind: output, shape index: {}]  }
   0x1   :  { %v41_v0 = vld [vmem:[%s67_s0 + $0x4] sm:$0xf]  ;;  %v8_v1 = vld [vmem:[%s67_s0] sm:$0xf]  ;;  %s15_s0 = smov 3  ;;  %s22_s12 = smov 3 }
   0x2   :  { %7 = vst [vmem:[#allocation1 + $0x8] sm:$0xf] %v41_v0  ;;  %9 = vst [vmem:[#allocation1] sm:$0xf] %v8_v1  ;;  %s45_s13 = smov 24   ;;  %s46_s14 = smov 8  }
   0x3   :  { %s47_s15 = smov 16  }
   0x9   :  { %v16_v2 = vld [vmem:[#allocation1 + $0x3] ss:$8 sm:%s15_s0]   ;;  %v30_v3 = vld [vmem:[#allocation1 + $0x1] ss:$8 sm:%s29_s10]   ;;  %v11_v4 = vld [vmem:[#allocation1] ss:$8 sm:%s10_s11]  }
   0xa   :  { %17 = vrot.lane.b32.xlu0 %v16_v2, %s45_s13  ;;  %31 = vrot.lane.b32.xlu1 %v30_v3, %s46_s14  ;;  %v23_v5 = vld [vmem:[#allocation1 + $0x2] ss:$8 sm:%s22_s12]   ;;  %13 = vst.msk [vmem:[#allocation0] sm:$0x3] %vm12_vm0, %v11_v4  }
   0xe   :  { %24 = vrot.lane.b32.xlu0 %v23_v5, %s47_s15 }
  0x7c   :  { %v18_v6 = vpop.permute.xlu0 %17   ;;  %v32_v7 = vpop.permute.xlu1 %31  }
  0x7d   :  { %20 = vst.msk [vmem:[#allocation0] sm:$0x3] %vm19_vm1, %v18_v6  }
  0x80   :  { %v25_v8 = vpop.permute.xlu0 %24  }
  0x81   :  { %27 = vst.msk [vmem:[#allocation0] sm:$0x3] %vm26_vm2, %v25_v8  }
  0x82   :  { %34 = vst.msk [vmem:[#allocation0] sm:$0x3] %vm33_vm3, %v32_v7  }
  0x89   :  { %v38_v9 = vld [vmem:[#allocation0] sm:$0x3] }
  0x8a   :  { %40 = vst [vmem:[%s68_s1] sm:$0x3] %v38_v9 }

// kernel: erg_main_forward.1
= control target key start
LH: loop header
LB: loop body
LE: loop exit
PB: predicated region body
PF: predicated region fallthrough
CT: control target
= control target key end

     0   :  { %s6209_s0 = inlined_call_operand.vmem [shape: s32[16,1], index: 0, kind: input, shape index: {}]   ;;  %s6210_s1 = inlined_call_operand.vmem [shape: s32[16,1], index: 1, kind: input, shape index: {}]   ;;  %s6211_s2 = inlined_call_operand.vmem [shape: s32[16,1], index: 2, kind: input, shape index: {}]   ;;  %s6212_s3 = inlined_call_operand.vmem [shape: f32[16,1], index: 3, kind: input, shape index: {}]   ;;  %s6213_s4 = inlined_call_operand.vmem [shape: f32[16,1], index: 4, kind: input, shape index: {}]   ;;  %s6214_s5 = inlined_call_operand.vmem [shape: f32[64,128], index: 5, kind: input, shape index: {}]   ;;  %s6215_s6 = inlined_call_operand.vmem [shape: f32[2,4,32], index: 6, kind: input, shape index: {}]   ;;  %s6216_s7 = inlined_call_operand.hbm [shape: f32[256,128], index: 7, kind: input, shape index: {}]   ;;  %s6217_s8 = inlined_call_operand.hbm [shape: f32[8,128], index: 8, kind: input, shape index: {}]   ;;  %s6218_s9 = inlined_call_operand.vmem [shape: f32[128,128], index: 9, kind: input, shape index: {}]   ;;  %s6219_s10 = inlined_call_operand.vmem [shape: f32[1,128], index: 10, kind: input, shape index: {}]   ;;  %s6220_s11 = inlined_call_operand.hbm [shape: f32[256,128], index: 11, kind: input, shape index: {}]   ;;  %s6221_s12 = inlined_call_operand.hbm [shape: f32[1,128], index: 12, kind: input, shape index: {}]   ;;  %s6222_s13 = inlined_call_operand.hbm [shape: f32[128,256], index: 13, kind: input, shape index: {}]   ;;  %s6223_s14 = inlined_call_operand.vmem [shape: f32[1,256], index: 14, kind: input, shape index: {}]   ;;  %s6224_s15 = inlined_call_operand.hbm [shape: f32[4,256,128], index: 15, kind: input, shape index: {}]   ;;  %s6225_s16 = inlined_call_operand.hbm [shape: f32[4,128,128], index: 16, kind: input, shape index: {}]   ;;  %s6226_s17 = inlined_call_operand.hbm [shape: f32[4,1,128], index: 17, kind: input, shape index: {}]   ;;  %s6227_s18 = inlined_call_operand.hbm [shape: f32[4,128,128], index: 18, kind: input, shape index: {}]   ;;  %s6228_s19 = inlined_call_operand.hbm [shape: f32[4,1,128], index: 19, kind: input, shape index: {}]   ;;  %s6229_s20 = inlined_call_operand.hbm [shape: f32[16,256], index: 20, kind: output, shape index: {0}]   ;;  %s6230_s21 = inlined_call_operand.vmem [shape: f32[2,4,128], index: 21, kind: output, shape index: {1}]  }
   0x1   :  { %6246 = sst [smem:[#allocation35_spill]] %s6209_s0 }
   0x2   :  { %6247 = sst [smem:[#allocation36_spill]] %s6210_s1 }
   0x3   :  { %6248 = sst [smem:[#allocation37_spill]] %s6211_s2 }
   0x4   :  { %6249 = sst [smem:[#allocation38_spill]] %s6212_s3 }
   0x5   :  { %6250 = sst [smem:[#allocation39_spill]] %s6213_s4 }
   0x6   :  { %6251 = sst [smem:[#allocation40_spill]] %s6214_s5 }
   0x7   :  { %6252 = sst [smem:[#allocation41_spill]] %s6217_s8 }
   0x8   :  { %6253 = sst [smem:[#allocation42_spill]] %s6221_s12 }
   0x9   :  { %6254 = sst [smem:[#allocation43_spill]] %s6223_s14 }
   0xa   :  { %6255 = sst [smem:[#allocation44_spill]] %s6229_s20 }
   0xb   :  { %6256 = sst [smem:[#allocation45_spill]] %s6230_s21 }
   0xc   :  { %27 = vsyncpa [#allocation3], 0 }
   0xd   :  { %28 = vsyncpa [#allocation6], 0 }
   0xe   :  { %29 = vsyncpa [#allocation9], 0 }
   0xf   :  { %30 = vsyncpa [#allocation12], 0 }
  0x10   :  { %31 = vsyncpa [#allocation15], 0 }
  0x11   :  { %32 = vsyncpa [#allocation18], 0 }
  0x12   :  { %33 = vsyncpa [#allocation4], 0 }
  0x13   :  { %35 = vsyncpa [#allocation4 + $0x1], 0  ;;  %s5500_s2 = smov 0   ;;  %s5502_s25 = smov 0  }
  0x14   :  { %s5504_s26 = smov 0   ;;  %s5506_s27 = smov 0  }
  0x15 LB: > { %6257 = sst [smem:[#allocation27_spill]] %s5355_s2  ;;  %s5521_s3 = sadd.s32 4294967295, %s5367_s27   ;;  %s5367_s27 = sphi %s5506_s27, %s6302_s27   ;;  %s5363_s26 = sphi %s5504_s26, %s6305_s26   ;;  %s5359_s25 = sphi %s5502_s25, %s6304_s25   ;;  %s5355_s2 = sphi %s5500_s2, %s6303_s2  }
  0x16   : > { %6258 = sst [smem:[#allocation28_spill]] %s5359_s25  ;;  %s3315_s28 = sadd.s32 4294967294, %s5367_s27  }
  0x17   : > { %6259 = sst [smem:[#allocation29_spill]] %s5363_s26  ;;  %s5525_s29 = sadd.s32 1, %s5367_s27  }
  0x18   : > { %6260 = sst [smem:[#allocation30_spill]] %s5367_s27  ;;  %s503_s0 = sadd.s32 1, %s5363_s26 }
  0x19   : > { %6261 = sst [smem:[#allocation31_spill]] %s5525_s29  ;;  %s500_s4 = ssub.s32 %s5367_s27, %s5525_s29 }
  0x1a   : > { %p513_p0 = scmp.ne.s32.totalorder %s5363_s26, %s5359_s25  ;;  %p501_p1 = scmp.eq.s32.totalorder %s500_s4, 0 }
  0x1b   : > { %p514_p2 = scmp.eq.s32.totalorder %s5521_s3, 1  ;;  %p519_p3 = scmp.ne.s32.totalorder %s5359_s25, %s5355_s2 }
  0x1c   : > { %p520_p4 = scmp.eq.s32.totalorder %s3315_s28, 1  ;;  %p3316_p7 = scmp.ge.s32.totalorder %s5367_s27, 1 }
  0x1d   : > { %s5536_s30 = scalar_select %p501_p1, %s5363_s26, %s503_s0  }
  0x1e   : > { %p5538_p5 = por %p514_p2, %p513_p0  ;;  %p5542_p6 = por %p520_p4, %p519_p3 }
  0x1f   : > { %6262 = sst [smem:[#allocation32_spill]] %s5536_s30  ;;  %p553_p8 = scmp.lt.s32.totalorder %s5367_s27, 3 }
  0x20   : > { %s6263_s5 = scalar_select %p5538_p5, 1, 0 }
  0x21   : > { %s6265_s22 = scalar_select %p5542_p6, 1, 0 }
  0x22   : > { %6264 = sst [smem:[#allocation33_spill]] %s6263_s5  ;;  %p6237_p9 = scmp.eq.s32.totalorder %s5521_s3, 0 }
  0x23   : > { %6266 = sst [smem:[#allocation34_spill]] %s6265_s22  ;;  %p5549_p10 = pnand %p3316_p7, %p553_p8 }
  0x24   : > { %s5369_s1 = smov [#allocation5]   ;;  %s5370_s28 = smov [#allocation8]  }
  0x25   : > { %s6267_s23 = scalar_select %p5549_p10, 1, 0 }
  0x26   : > { %s579_s24 = sshll.u32 %s5369_s1, 4  ;;  %p4871_p11 = pneg %p5549_p10  ;;  %s580_s24 = int_to_ptr.vmem [resolvable:$true] %s579_s24 }
  0x27   : > { %s609_s0 = sshll.u32 %s5370_s28, 4  ;;  %s5371_s30 = smov [#allocation11]   ;;  %s5561_s0 = int_to_ptr.vmem [resolvable:$true] %s609_s0 }
  0x28   : > { %p5557_p12 = pnand %p6237_p9, %p4871_p11  ;;  %s5563_s26 = sshll.u32 %s5371_s30, 4  ;;  %s636_s26 = int_to_ptr.vmem [resolvable:$true] %s5563_s26 }
  0x29   : > { %s6269_s8 = sld [smem:[#allocation41_spill]] }
  0x2a   : > { %p5573_p0 = pneg %p5557_p12 }
  0x2f   : > { %s5001_s1 = scalar_lea.hbm %s6269_s8, 128 }
  0x30   : > { %p5002_p13 = scmp.ne.s32.totalorder %s6269_s8, %s5001_s1  ;;  %p5008_p3 = scmp.lt.u32.totalorder %s5001_s1, %s6269_s8 }
  0x32   : > { %p5004_p1 = pnand %p5573_p0, %p5002_p13 }
  0x34   : > { %p5005_p2 = pneg %p5004_p1 }
  0x36   : > { %p5010_p4 = pnand %p5008_p3, %p5005_p2 }
  0x38   : > { %5013 = shalt.err (!%p5010_p4)
}
  0x39   : > { %s5014_s29 = scalar_lea.vmem %s580_s24, 128  ;;  %p5022_p9 = scmp.lt.s32.totalorder %s580_s24, %s580_s24 }
  0x3a   : > { %p5015_p7 = scmp.ne.s32.totalorder %s580_s24, %s5014_s29  ;;  %p5023_p6 = scmp.lt.s32.totalorder %s5014_s29, %s5014_s29 }
  0x3c   : > { %p5017_p8 = pnand %p5015_p7, %p5573_p0  ;;  %p5024_p5 = por %p5023_p6, %p5022_p9 }
  0x3e   : > { %p5018_p11 = pneg %p5017_p8 }
  0x40   : > { %p5025_p10 = pnand %p5024_p5, %p5018_p11 }
  0x42   : > { %5028 = shalt.err (!%p5025_p10)
}
  0x43   : > { %4877 = dma.hbm_to_vmem [thread:$0]  (!%p5557_p12), %s6269_s8, 128, %s580_s24, [#allocation6]  }
  0x44   : > { %s6271_s12 = sld [smem:[#allocation42_spill]] }
  0x4a   : > { %s5029_s1 = scalar_lea.hbm %s6271_s12, 16 }
  0x4b   : > { %p5030_p13 = scmp.ne.s32.totalorder %s6271_s12, %s5029_s1  ;;  %p5036_p5 = scmp.lt.u32.totalorder %s5029_s1, %s6271_s12 }
  0x4d   : > { %p5032_p1 = pnand %p5030_p13, %p5573_p0 }
  0x4f   : > { %p5033_p6 = pneg %p5032_p1 }
  0x51   : > { %p5038_p9 = pnand %p5036_p5, %p5033_p6 }
  0x53   : > { %5041 = shalt.err (!%p5038_p9)
}
  0x54   : > { %s5042_s24 = scalar_lea.vmem %s5561_s0, 16  ;;  %s5049_s20 = scalar_lea.vmem %s5561_s0, 32 }
  0x55   : > { %p5043_p10 = scmp.ne.s32.totalorder %s5561_s0, %s5042_s24  ;;  %p5050_p4 = scmp.lt.s32.totalorder %s5561_s0, %s5561_s0 }
  0x56   : > { %p5051_p7 = scmp.lt.s32.totalorder %s5049_s20, %s5042_s24 }
  0x57   : > { %p5045_p2 = pnand %p5043_p10, %p5573_p0 }
  0x58   : > { %p5052_p8 = por %p5051_p7, %p5050_p4 }
  0x59   : > { %p5046_p3 = pneg %p5045_p2 }
  0x5b   : > { %p5053_p11 = pnand %p5052_p8, %p5046_p3 }
  0x5d   : > { %5056 = shalt.err (!%p5053_p11)
}
  0x5e   : > { %4883 = dma.hbm_to_vmem [thread:$0]  (!%p5557_p12), %s6271_s12, 16, %s5561_s0, [#allocation9]  }
  0x5f   : > { %s5057_s22 = scalar_lea.hbm %s6224_s15, 16384 }
  0x60   : > { %p5058_p13 = scmp.ne.s32.totalorder %s6224_s15, %s5057_s22  ;;  %p5064_p5 = scmp.lt.u32.totalorder %s5057_s22, %s6224_s15 }
  0x62   : > { %p5060_p1 = pnand %p5058_p13, %p5573_p0 }
  0x64   : > { %p5061_p6 = pneg %p5060_p1 }
  0x66   : > { %p5066_p9 = pnand %p5064_p5, %p5061_p6 }
  0x68   : > { %5069 = shalt.err (!%p5066_p9)
}
  0x69   : > { %s5070_s20 = scalar_lea.vmem %s636_s26, 16384  ;;  %p5078_p4 = scmp.lt.s32.totalorder %s636_s26, %s636_s26 }
  0x6a   : > { %p5071_p10 = scmp.ne.s32.totalorder %s636_s26, %s5070_s20  ;;  %p5079_p7 = scmp.lt.s32.totalorder %s5070_s20, %s5070_s20 }
  0x6c   : > { %p5073_p2 = pnand %p5071_p10, %p5573_p0  ;;  %p5080_p8 = por %p5079_p7, %p5078_p4 }
  0x6e   : > { %p5074_p3 = pneg %p5073_p2 }
  0x70   : > { %p5081_p11 = pnand %p5080_p8, %p5074_p3 }
  0x72   : > { %5084 = shalt.err (!%p5081_p11)
}
  0x73   : > { %s5372_s0 = smov 128   ;;  %s5373_s5 = smov 8  }
  0x74   : > { %4889 = dma.hbm_to_vmem [thread:$0]  (!%p5557_p12), %s6224_s15, 16384, %s636_s26, [#allocation12], %s5372_s0, %s5372_s0, %s5373_s5  }
  0x75   : > { %s5374_s21 = smov [#allocation14]   ;;  %s5375_s1 = smov [#allocation2]  }
  0x76   : > { %s661_s22 = sshll.u32 %s5374_s21, 4  ;;  %s565_s30 = sshll.u32 %s5375_s1, 4  ;;  %s662_s22 = int_to_ptr.vmem [resolvable:$true] %s661_s22  ;;  %s566_s30 = int_to_ptr.vmem [resolvable:$true] %s565_s30 }
  0x77   : > { %s5085_s20 = scalar_lea.hbm %s6226_s17, 64 }
  0x78   : > { %p5086_p13 = scmp.ne.s32.totalorder %s6226_s17, %s5085_s20  ;;  %p5092_p5 = scmp.lt.u32.totalorder %s5085_s20, %s6226_s17 }
  0x7a   : > { %p5088_p1 = pnand %p5086_p13, %p5573_p0 }
  0x7c   : > { %p5089_p6 = pneg %p5088_p1 }
  0x7e   : > { %p5094_p9 = pnand %p5092_p5, %p5089_p6 }
  0x80   : > { %5097 = shalt.err (!%p5094_p9)
}
  0x81   : > { %s5098_s26 = scalar_lea.vmem %s662_s22, 64  ;;  %p5106_p4 = scmp.lt.s32.totalorder %s662_s22, %s662_s22 }
  0x82   : > { %p5099_p10 = scmp.ne.s32.totalorder %s662_s22, %s5098_s26  ;;  %p5107_p7 = scmp.lt.s32.totalorder %s5098_s26, %s5098_s26 }
  0x84   : > { %p5101_p2 = pnand %p5099_p10, %p5573_p0  ;;  %p5108_p8 = por %p5107_p7, %p5106_p4 }
  0x86   : > { %p5102_p3 = pneg %p5101_p2 }
  0x88   : > { %p5109_p11 = pnand %p5108_p8, %p5102_p3 }
  0x8a   : > { %5112 = shalt.err (!%p5109_p11)
}
  0x8b   : > { %s5376_s8 = smov 16   ;;  %s6245_s12 = smov 1  }
  0x8c   : > { %4895 = dma.hbm_to_vmem [thread:$0]  (!%p5557_p12), %s6226_s17, 64, %s662_s22, [#allocation15], %s5376_s8, %s5376_s8, %s6245_s12  }
  0x8d   : > { %s5113_s21 = scalar_lea.hbm %s6216_s7, 4096 }
  0x8e   : > { %p5114_p13 = scmp.ne.s32.totalorder %s6216_s7, %s5113_s21  ;;  %p5120_p5 = scmp.lt.u32.totalorder %s5113_s21, %s6216_s7 }
  0x90   : > { %p5116_p1 = pnand %p5114_p13, %p5573_p0 }
  0x92   : > { %p5117_p6 = pneg %p5116_p1 }
  0x94   : > { %p5122_p9 = pnand %p5120_p5, %p5117_p6 }
  0x96   : > { %5125 = shalt.err (!%p5122_p9)
}
  0x97   : > { %s5126_s26 = scalar_lea.vmem %s566_s30, 4096  ;;  %p5134_p4 = scmp.lt.s32.totalorder %s566_s30, %s566_s30 }
  0x98   : > { %p5127_p10 = scmp.ne.s32.totalorder %s566_s30, %s5126_s26  ;;  %p5135_p7 = scmp.lt.s32.totalorder %s5126_s26, %s5126_s26 }
  0x9a   : > { %p5129_p2 = pnand %p5127_p10, %p5573_p0  ;;  %p5136_p8 = por %p5135_p7, %p5134_p4 }
  0x9c   : > { %p5130_p3 = pneg %p5129_p2 }
  0x9e   : > { %p5137_p11 = pnand %p5136_p8, %p5130_p3 }
  0xa0   : > { %5140 = shalt.err (!%p5137_p11)
}
  0xa1   : > { %4874 = dma.hbm_to_vmem [thread:$0]  (!%p5557_p12), %s6216_s7, 4096, %s566_s30, [#allocation3], %s5372_s0, %s5372_s0, %s5373_s5  }
  0xa2   : > { %s5378_s25 = smov [#allocation7]   ;;  %s5379_s27 = smov [#allocation10]  }
  0xa3   : > { %s595_s2 = sshll.u32 %s5378_s25, 4  ;;  %s619_s21 = sshll.u32 %s5379_s27, 4  ;;  %s596_s2 = int_to_ptr.vmem [resolvable:$true] %s595_s2  ;;  %s620_s21 = int_to_ptr.vmem [resolvable:$true] %s619_s21 }
  0xa4   : > { %s5141_s24 = scalar_lea.hbm %s6220_s11, 4096 }
  0xa5   : > { %p5142_p13 = scmp.ne.s32.totalorder %s6220_s11, %s5141_s24  ;;  %p5148_p5 = scmp.lt.u32.totalorder %s5141_s24, %s6220_s11 }
  0xa7   : > { %p5144_p1 = pnand %p5142_p13, %p5573_p0 }
  0xa9   : > { %p5145_p6 = pneg %p5144_p1 }
  0xab   : > { %p5150_p9 = pnand %p5148_p5, %p5145_p6 }
  0xad   : > { %5153 = shalt.err (!%p5150_p9)
}
  0xae   : > { %s5154_s30 = scalar_lea.vmem %s596_s2, 4096  ;;  %p5162_p4 = scmp.lt.s32.totalorder %s596_s2, %s596_s2 }
  0xaf   : > { %p5155_p10 = scmp.ne.s32.totalorder %s596_s2, %s5154_s30  ;;  %p5163_p7 = scmp.lt.s32.totalorder %s5154_s30, %s5154_s30 }
  0xb1   : > { %p5157_p2 = pnand %p5155_p10, %p5573_p0  ;;  %p5164_p8 = por %p5163_p7, %p5162_p4 }
  0xb3   : > { %p5158_p3 = pneg %p5157_p2 }
  0xb5   : > { %p5165_p11 = pnand %p5164_p8, %p5158_p3 }
  0xb7   : > { %5168 = shalt.err (!%p5165_p11)
}
  0xb8   : > { %4880 = dma.hbm_to_vmem [thread:$0]  (!%p5557_p12), %s6220_s11, 4096, %s596_s2, [#allocation6], %s5372_s0, %s5372_s0, %s5373_s5  }
  0xb9   : > { %s5169_s1 = scalar_lea.hbm %s6222_s13, 4096 }
  0xba   : > { %p5170_p13 = scmp.ne.s32.totalorder %s6222_s13, %s5169_s1  ;;  %p5176_p5 = scmp.lt.u32.totalorder %s5169_s1, %s6222_s13 }
  0xbc   : > { %p5172_p1 = pnand %p5170_p13, %p5573_p0 }
  0xbe   : > { %p5173_p6 = pneg %p5172_p1 }
  0xc0   : > { %p5178_p9 = pnand %p5176_p5, %p5173_p6 }
  0xc2   : > { %5181 = shalt.err (!%p5178_p9)
}
  0xc3   : > { %s5182_s22 = scalar_lea.vmem %s620_s21, 4096  ;;  %p5190_p4 = scmp.lt.s32.totalorder %s620_s21, %s620_s21 }
  0xc4   : > { %p5183_p10 = scmp.ne.s32.totalorder %s620_s21, %s5182_s22  ;;  %p5191_p7 = scmp.lt.s32.totalorder %s5182_s22, %s5182_s22 }
  0xc6   : > { %p5185_p2 = pnand %p5183_p10, %p5573_p0  ;;  %p5192_p8 = por %p5191_p7, %p5190_p4 }
  0xc8   : > { %p5186_p3 = pneg %p5185_p2 }
  0xca   : > { %p5193_p11 = pnand %p5192_p8, %p5186_p3 }
  0xcc   : > { %5196 = shalt.err (!%p5193_p11)
}
  0xcd   : > { %s5380_s2 = smov 256   ;;  %s5381_s14 = smov [#allocation13]  }
  0xce   : > { %4886 = dma.hbm_to_vmem [thread:$0]  (!%p5557_p12), %s6222_s13, 4096, %s620_s21, [#allocation9], %s5380_s2, %s5380_s2, %s5376_s8  }
  0xcf   : > { %s648_s25 = sshll.u32 %s5381_s14, 4  ;;  %s5382_s27 = smov [#allocation16]   ;;  %s649_s25 = int_to_ptr.vmem [resolvable:$true] %s648_s25 }
  0xd0   : > { %s674_s1 = sshll.u32 %s5382_s27, 4  ;;  %s5197_s20 = scalar_lea.hbm %s6225_s16, 8192  ;;  %s5717_s1 = int_to_ptr.vmem [resolvable:$true] %s674_s1 }
  0xd1   : > { %p5198_p13 = scmp.ne.s32.totalorder %s6225_s16, %s5197_s20  ;;  %p5204_p5 = scmp.lt.u32.totalorder %s5197_s20, %s6225_s16 }
  0xd3   : > { %p5200_p1 = pnand %p5198_p13, %p5573_p0 }
  0xd5   : > { %p5201_p6 = pneg %p5200_p1 }
  0xd7   : > { %p5206_p9 = pnand %p5204_p5, %p5201_p6 }
  0xd9   : > { %5209 = shalt.err (!%p5206_p9)
}
  0xda   : > { %s5210_s2 = scalar_lea.vmem %s649_s25, 8192  ;;  %p5218_p4 = scmp.lt.s32.totalorder %s649_s25, %s649_s25 }
  0xdb   : > { %p5211_p10 = scmp.ne.s32.totalorder %s649_s25, %s5210_s2  ;;  %p5219_p7 = scmp.lt.s32.totalorder %s5210_s2, %s5210_s2 }
  0xdd   : > { %p5213_p2 = pnand %p5211_p10, %p5573_p0  ;;  %p5220_p8 = por %p5219_p7, %p5218_p4 }
  0xdf   : > { %p5214_p3 = pneg %p5213_p2 }
  0xe1   : > { %p5221_p11 = pnand %p5220_p8, %p5214_p3 }
  0xe3   : > { %5224 = shalt.err (!%p5221_p11)
}
  0xe4   : > { %4892 = dma.hbm_to_vmem [thread:$0]  (!%p5557_p12), %s6225_s16, 8192, %s649_s25, [#allocation12], %s5372_s0, %s5372_s0, %s5373_s5  }
  0xe5   : > { %s5225_s24 = scalar_lea.hbm %s6227_s18, 8192 }
  0xe6   : > { %p5226_p13 = scmp.ne.s32.totalorder %s6227_s18, %s5225_s24  ;;  %p5232_p5 = scmp.lt.u32.totalorder %s5225_s24, %s6227_s18 }
  0xe8   : > { %p5228_p1 = pnand %p5226_p13, %p5573_p0 }
  0xea   : > { %p5229_p6 = pneg %p5228_p1 }
  0xec   : > { %p5234_p9 = pnand %p5232_p5, %p5229_p6 }
  0xee   : > { %5237 = shalt.err (!%p5234_p9)
}
  0xef   : > { %s5238_s25 = scalar_lea.vmem %s5717_s1, 8192  ;;  %p5246_p4 = scmp.lt.s32.totalorder %s5717_s1, %s5717_s1 }
  0xf0   : > { %p5239_p10 = scmp.ne.s32.totalorder %s5717_s1, %s5238_s25  ;;  %p5247_p7 = scmp.lt.s32.totalorder %s5238_s25, %s5238_s25 }
  0xf2   : > { %p5241_p2 = pnand %p5239_p10, %p5573_p0  ;;  %p5248_p8 = por %p5247_p7, %p5246_p4 }
  0xf4   : > { %p5242_p3 = pneg %p5241_p2 }
  0xf6   : > { %p5249_p11 = pnand %p5248_p8, %p5242_p3 }
  0xf8   : > { %5252 = shalt.err (!%p5249_p11)
}
  0xf9   : > { %4898 = dma.hbm_to_vmem [thread:$0]  (!%p5557_p12), %s6227_s18, 8192, %s5717_s1, [#allocation15], %s5372_s0, %s5372_s0, %s5373_s5  }
  0xfa   : > { %s5383_s12 = smov [#allocation17]   ;;  %s5253_s24 = scalar_lea.hbm %s6228_s19, 64 }
  0xfb   : > { %s687_s14 = sshll.u32 %s5383_s12, 4  ;;  %p5254_p13 = scmp.ne.s32.totalorder %s6228_s19, %s5253_s24  ;;  %s688_s14 = int_to_ptr.vmem [resolvable:$true] %s687_s14 }
  0xfc   : > { %p5260_p5 = scmp.lt.u32.totalorder %s5253_s24, %s6228_s19 }
  0xfd   : > { %p5256_p1 = pnand %p5254_p13, %p5573_p0 }
  0xff   : > { %p5257_p6 = pneg %p5256_p1 }
 0x101   : > { %p5262_p9 = pnand %p5260_p5, %p5257_p6 }
 0x103   : > { %5265 = shalt.err (!%p5262_p9)
}
 0x104   : > { %s5266_s0 = scalar_lea.vmem %s688_s14, 64  ;;  %p5274_p4 = scmp.lt.s32.totalorder %s688_s14, %s688_s14 }
 0x105   : > { %p5267_p10 = scmp.ne.s32.totalorder %s688_s14, %s5266_s0  ;;  %p5275_p7 = scmp.lt.s32.totalorder %s5266_s0, %s5266_s0 }
 0x107   : > { %p5269_p2 = pnand %p5267_p10, %p5573_p0  ;;  %p5276_p8 = por %p5275_p7, %p5274_p4 }
 0x109   : > { %p5270_p3 = pneg %p5269_p2 }
 0x10b   : > { %p5277_p11 = pnand %p5276_p8, %p5270_p3 }
 0x10d   : > { %5280 = shalt.err (!%p5277_p11)
}
 0x10e   : > { %s6272_s5 = smov 1   ;;  %p6273_p13 = scmp.ne.s32.totalorder %s6267_s23, 0 }
 0x10f   : > { %4901 = dma.hbm_to_vmem [thread:$0]  (!%p5557_p12), %s6228_s19, 64, %s688_s14, [#allocation18], %s5376_s8, %s5376_s8, %s6272_s5  }
 0x110   : > { %754 = sbr.rel (%p6273_p13) target bundleno = 3725 (0xe8d), region = 100  ;;  %p6274_p0 = scmp.eq.s32.totalorder (!%p6273_p13), %s5521_s3, 0 }
 0x117   : > { %5326 = dma.done.wait (%p6274_p0), [#allocation3], 4096   ;;  %p6275_p1 = pmov %p6274_p0 }
 0x118   : > { %p6276_p6 = pmov %p6274_p0 }
 0x119   : > { %5328 = vsyncadd (%p6275_p1), [#allocation3], 4294963200 }
 0x11a   : > { %5330 = dma.done.wait (%p6276_p6), [#allocation6], 4224   ;;  %p6277_p5 = pmov %p6274_p0 }
 0x11b   : > { %p6278_p9 = pmov %p6274_p0 }
 0x11c   : > { %5332 = vsyncadd (%p6277_p5), [#allocation6], 4294963072 }
 0x11d   : > { %5334 = dma.done.wait (%p6278_p9), [#allocation9], 4112   ;;  %p6279_p12 = pmov %p6274_p0 }
 0x11e   : > { %p6280_p10 = pmov %p6274_p0 }
 0x11f   : > { %5336 = vsyncadd (%p6279_p12), [#allocation9], 4294963184 }
 0x120   : > { %5338 = dma.done.wait (%p6280_p10), [#allocation12], 24576   ;;  %p6281_p2 = pmov %p6274_p0 }
 0x121   : > { %p6282_p3 = pmov %p6274_p0 }
 0x122   : > { %5340 = vsyncadd (%p6281_p2), [#allocation12], 4294942720 }
 0x123   : > { %5342 = dma.done.wait (%p6282_p3), [#allocation15], 8256   ;;  %p6283_p4 = pmov %p6274_p0 }
 0x124   : > { %p6284_p7 = pmov %p6274_p0 }
 0x125   : > { %5344 = vsyncadd (%p6283_p4), [#allocation15], 4294959040 }
 0x126   : > { %5346 = dma.done.wait (%p6284_p7), [#allocation18], 64   ;;  %p6285_p8 = pmov %p6274_p0 }
 0x127   : > { %p878_p11 = scmp.lt.s32.totalorder %s5521_s3, 1  ;;  %v5384_v0 = vmov 0   ;;  %s6286_s21 = sld [smem:[#allocation35_spill]]  ;;  %v948_v3 = vld [vmem:[#allocation2 + $0x80] sm:$0xff]  ;;  %v949_v4 = vld [vmem:[#allocation2 + $0x88] sm:$0xff]  ;;  %v950_v9 = vld [vmem:[#allocation2 + $0x90] sm:$0xff]  ;;  %v912_v54 = vlaneseq }
 0x128   : > { %5348 = vsyncadd (%p6285_p8), [#allocation18], 4294967232  ;;  %4979 = vset.pattern.permute.xlu0 %v5384_v0  ;;  %4980 = vset.pattern.permute.xlu1 %v5384_v0  ;;  %s6287_s27 = sld [smem:[#allocation36_spill]]  ;;  %v932_v5 = vld [vmem:[#allocation2] sm:$0xff]  ;;  %v933_v6 = vld [vmem:[#allocation2 + $0x8] sm:$0xff]  ;;  %v4223_v7 = vpack.c.bf16 %v949_v4, %v948_v3  ;;  %v5385_v16 = vmov 0.0  }
 0x129   : > { %s5815_s23 = scalar_select %p878_p11, %s5521_s3, 1  ;;  %v4225_v8 = vpack.c.bf16 %v933_v6, %v932_v5  ;;  %v951_v10 = vld [vmem:[#allocation2 + $0x98] sm:$0xff]  ;;  %v934_v11 = vld [vmem:[#allocation2 + $0x10] sm:$0xff]  ;;  %v952_v14 = vld [vmem:[#allocation2 + $0xa0] sm:$0xff]  ;;  %3892 = vmatprep.subr.mxu0 %v5385_v16  ;;  %vm5386_vm0 = vmmov 0   ;;  %v5387_v31 = vmov 0.0|0.0  }
 0x12a   : > { %v4227_v12 = vpack.c.bf16 %v951_v10, %v950_v9  ;;  %v935_v13 = vld [vmem:[#allocation2 + $0x18] sm:$0xff]  ;;  %v953_v15 = vld [vmem:[#allocation2 + $0xa8] sm:$0xff]  ;;  %4224 = vmatprep.subr.bf16.mxu1 %v4223_v7  ;;  %v936_v19 = vld [vmem:[#allocation2 + $0x20] sm:$0xff]  ;;  %3894 = vmatprep.mubr.msk.f32.mxu0 %vm5386_vm0, %v5385_v16  ;;  %s3345_s24 = sshll.u32 %s5521_s3, 2  ;;  %v5835_v55 = vand.u32 127, %v912_v54  ;;  %s6288_s30 = sld [smem:[#allocation40_spill]] }
 0x12b   : > { %s5818_s4 = sshll.u32 %s5815_s23, 3  ;;  %4226 = vmatpush3.bf16.msra.mxu1 %v4225_v8  ;;  %v4229_v17 = vpack.c.bf16 %v935_v13, %v934_v11  ;;  %v4231_v18 = vpack.c.bf16 %v953_v15, %v952_v14  ;;  %v937_v20 = vld [vmem:[#allocation2 + $0x28] sm:$0xff]  ;;  %v954_v21 = vld [vmem:[#allocation2 + $0xb0] sm:$0xff]  ;;  %v955_v22 = vld [vmem:[#allocation2 + $0xb8] sm:$0xff]  ;;  %p899_p13 = scmp.lt.s32.totalorder %s3345_s24, 7  ;;  %vm965_vm3 = vcmask 64512  }
 0x12c   : > { %4228 = vmatprep.subr.bf16.mxu1 %v4227_v12  ;;  %v4233_v23 = vpack.c.bf16 %v937_v20, %v936_v19  ;;  %v4235_v24 = vpack.c.bf16 %v955_v22, %v954_v21  ;;  %v938_v25 = vld [vmem:[#allocation2 + $0x30] sm:$0xff]  ;;  %v939_v26 = vld [vmem:[#allocation2 + $0x38] sm:$0xff]  ;;  %v956_v27 = vld [vmem:[#allocation2 + $0xc0] sm:$0xff]  ;;  %v5841_v56 = vadd.s32 128, %v5835_v55  ;;  %s3347_s8 = sshll.u32 %s5815_s23, 2  ;;  %vm1208_vm5 = vcmask 261120  }
 0x12d   : > { %s881_s2 = scalar_lea.vmem %s6286_s21, %s5818_s4  ;;  %v957_v28 = vld [vmem:[#allocation2 + $0xc8] sm:$0xff]  ;;  %v964_v29 = vld [vmem:[#allocation5] sm:$0xff]  ;;  %v4237_v30 = vpack.c.bf16 %v939_v26, %v938_v25  ;;  %v958_v35 = vld [vmem:[#allocation2 + $0xd0] sm:$0xff]  ;;  %s6307_s24 = smov (!%p899_p13, %s3345_s24), 7  ;;  %vm1282_vm6 = vcmask 257024   ;;  %vm1289_vm7 = vcmask 1043456  }
 0x12e   : > { %s885_s29 = scalar_lea.vmem %s6287_s27, %s5818_s4  ;;  %v915_v1 = vld [vmem:[%s881_s2] sm:$0xff]  ;;  %3893 = vmatpush3.msra.mxu0 %v964_v29  ;;  %v4239_v32 = vpack.c.bf16 %v957_v28, %v956_v27  ;;  %v941_v34 = vld [vmem:[#allocation2 + $0x48] sm:$0xff]  ;;  %v959_v36 = vld [vmem:[#allocation2 + $0xd8] sm:$0xff]  ;;  %s3346_s20 = sshll.u32 %s6307_s24, 3 }
 0x12f   : > { %v925_v2 = vld [vmem:[%s885_s29] sm:$0xff]  ;;  %917 = vperm.xlu0 %4979, %v915_v1   ;;  %4230 = vmatpush3.bf16.msra.mxu1 %v4229_v17  ;;  %v4243_v38 = vpack.c.bf16 %v959_v36, %v958_v35  ;;  %v942_v39 = vld [vmem:[#allocation2 + $0x50] sm:$0xff]  ;;  %v943_v40 = vld [vmem:[#allocation2 + $0x58] sm:$0xff]  ;;  %v5388_v1 = vmov 1.0   ;;  %s907_s24 = scalar_lea.vmem %s6215_s6, %s3347_s8  ;;  %s6289_s2 = sld [smem:[#allocation28_spill]] }
 0x130   : > { %4232 = vmatprep.subr.bf16.mxu1 %v4231_v18  ;;  %4255 = vmatprep.subr.bf16.mxu0 %v5387_v31  ;;  %v940_v33 = vld [vmem:[#allocation2 + $0x40] sm:$0xff]  ;;  %v961_v42 = vld [vmem:[#allocation2 + $0xe8] sm:$0xff]  ;;  %v4245_v43 = vpack.c.bf16 %v943_v40, %v942_v39  ;;  %v962_v47 = vld [vmem:[#allocation2 + $0xf0] sm:$0xff]  ;;  %s902_s0 = scalar_lea.vmem %s6288_s30, %s3346_s20  ;;  %s6290_s29 = sld [smem:[#allocation43_spill]] }
 0x131   : > { %v4241_v37 = vpack.c.bf16 %v941_v34, %v940_v33  ;;  %v960_v41 = vld [vmem:[#allocation2 + $0xe0] sm:$0xff]  ;;  %v945_v46 = vld [vmem:[#allocation2 + $0x68] sm:$0xff]  ;;  %v963_v48 = vld [vmem:[#allocation2 + $0xf8] sm:$0xff]  ;;  %s6291_s30 = sld [smem:[#allocation37_spill]]  ;;  %s6292_s25 = sld [smem:[#allocation38_spill]] }
 0x132   : > { %v4247_v44 = vpack.c.bf16 %v961_v42, %v960_v41  ;;  %v944_v45 = vld [vmem:[#allocation2 + $0x60] sm:$0xff]  ;;  %v4251_v50 = vpack.c.bf16 %v963_v48, %v962_v47  ;;  %v946_v51 = vld [vmem:[#allocation2 + $0x70] sm:$0xff]  ;;  %v947_v52 = vld [vmem:[#allocation2 + $0x78] sm:$0xff]  ;;  %s6293_s27 = sld [smem:[#allocation39_spill]] }
 0x133   : > { %927 = vperm.xlu0 %4979, %v925_v2   ;;  %4234 = vmatpush3.bf16.msra.mxu1 %v4233_v23  ;;  %v4249_v49 = vpack.c.bf16 %v945_v46, %v944_v45  ;;  %v4253_v53 = vpack.c.bf16 %v947_v52, %v946_v51  ;;  %v1204_v57 = vld [vmem:[%s902_s0] sm:$0xff]  ;;  %v1205_v58 = vld [vmem:[%s902_s0 + $0x8] sm:$0xff]  ;;  %v1206_v63 = vld [vmem:[%s902_s0 + $0x10] sm:$0xff] }
 0x134   : > { %4236 = vmatprep.subr.bf16.mxu1 %v4235_v24  ;;  %v1109_v60 = vld [vmem:[%s6218_s9] sm:$0xff]  ;;  %v4280_v61 = vpack.c.bf16 %v1205_v58, %v1204_v57  ;;  %v1110_v62 = vld [vmem:[%s6218_s9 + $0x8] sm:$0xff]  ;;  %v1207_v0 = vld [vmem:[%s902_s0 + $0x18] sm:$0xff] }
 0x135   : > { %v4256_v3 = vpack.c.bf16 %v1110_v62, %v1109_v60  ;;  %v4283_v4 = vpack.c.bf16 %v1207_v0, %v1206_v63  ;;  %v1111_v5 = vld [vmem:[%s6218_s9 + $0x10] sm:$0xff]  ;;  %v1112_v6 = vld [vmem:[%s6218_s9 + $0x18] sm:$0xff]  ;;  %v1203_v9 = vld [vmem:[%s907_s24] sm:$0xf]  ;;  %s869_s12 = sand.u32 1, %s6289_s2  }
 0x136   : > { %v4259_v8 = vpack.c.bf16 %v1112_v6, %v1111_v5  ;;  %v1113_v10 = vld [vmem:[%s6218_s9 + $0x20] sm:$0xff]  ;;  %v1114_v11 = vld [vmem:[%s6218_s9 + $0x28] sm:$0xff]  ;;  %v1115_v13 = vld [vmem:[%s6218_s9 + $0x30] sm:$0xff]  ;;  %v1283_v29 = vsel %vm1282_vm6, %v1203_v9, 0.0  ;;  %s3339_s24 = sshll.u32 %s869_s12, 4  ;;  %s3041_s1 = scalar_lea.sflag [#allocation4], %s869_s12 }
 0x137   : > { %4238 = vmatpush3.bf16.msra.mxu1 %v4237_v30  ;;  %v4262_v12 = vpack.c.bf16 %v1114_v11, %v1113_v10  ;;  %v1116_v14 = vld [vmem:[%s6218_s9 + $0x38] sm:$0xff]  ;;  %v1117_v17 = vld [vmem:[%s6218_s9 + $0x40] sm:$0xff]  ;;  %v1118_v18 = vld [vmem:[%s6218_s9 + $0x48] sm:$0xff]  ;;  %1284 = vadd.xlane.f32.xlu1 %v1283_v29  ;;  %s5933_s20 = scalar_lea.vmem [#allocation19], %s3339_s24  ;;  %s889_s0 = scalar_lea.vmem %s6291_s30, %s5818_s4 }
 0x138   : > { %4240 = vmatprep.subr.bf16.mxu1 %v4239_v32  ;;  %v4265_v15 = vpack.c.bf16 %v1116_v14, %v1115_v13  ;;  %v4268_v19 = vpack.c.bf16 %v1118_v18, %v1117_v17  ;;  %v1119_v20 = vld [vmem:[%s6218_s9 + $0x50] sm:$0xff]  ;;  %v1120_v21 = vld [vmem:[%s6218_s9 + $0x58] sm:$0xff]  ;;  %v1121_v23 = vld [vmem:[%s6218_s9 + $0x60] sm:$0xff]  ;;  %s893_s28 = scalar_lea.vmem %s6292_s25, %s5818_s4  ;;  %s3377_s24 = sshll.u32 %s5521_s3, 8 }
 0x139   : > { %v4271_v22 = vpack.c.bf16 %v1120_v21, %v1119_v20  ;;  %v1122_v24 = vld [vmem:[%s6218_s9 + $0x68] sm:$0xff]  ;;  %v1123_v26 = vld [vmem:[%s6218_s9 + $0x70] sm:$0xff]  ;;  %v1124_v27 = vld [vmem:[%s6218_s9 + $0x78] sm:$0xff]  ;;  %s3059_s26 = sshll.u32 %s5933_s20, 4  ;;  %s3060_s26 = int_to_ptr.vmem [resolvable:$true] %s3059_s26 }
 0x13a   : > { %v4274_v25 = vpack.c.bf16 %v1122_v24, %v1121_v23  ;;  %v4277_v28 = vpack.c.bf16 %v1124_v27, %v1123_v26  ;;  %v1314_v30 = vld [vmem:[#allocation7 + $0x80] sm:$0xff]  ;;  %v1315_v32 = vld [vmem:[#allocation7 + $0x88] sm:$0xff]  ;;  %v1316_v39 = vld [vmem:[#allocation7 + $0x90] sm:$0xff]  ;;  %s5281_s25 = scalar_lea.vmem %s3060_s26, 256 }
 0x13b   : > { %4242 = vmatpush3.bf16.msra.mxu1 %v4241_v37  ;;  %v4285_v33 = vpack.c.bf16 %v1315_v32, %v1314_v30  ;;  %v1298_v36 = vld [vmem:[#allocation7] sm:$0xff]  ;;  %v1299_v37 = vld [vmem:[#allocation7 + $0x8] sm:$0xff]  ;;  %v1317_v40 = vld [vmem:[#allocation7 + $0x98] sm:$0xff]  ;;  %p5282_p0 = scmp.ne.s32.totalorder %s3060_s26, %s5281_s25 }
 0x13c   : > { %4244 = vmatprep.subr.bf16.mxu1 %v4243_v38  ;;  %v4287_v42 = vpack.c.bf16 %v1299_v37, %v1298_v36  ;;  %v4289_v45 = vpack.c.bf16 %v1317_v40, %v1316_v39  ;;  %v1300_v46 = vld [vmem:[#allocation7 + $0x10] sm:$0xff]  ;;  %v1301_v47 = vld [vmem:[#allocation7 + $0x18] sm:$0xff]  ;;  %v1318_v48 = vld [vmem:[#allocation7 + $0xa0] sm:$0xff] }
 0x13d   : > { %v1303_v57 = vld [vmem:[#allocation7 + $0x28] sm:$0xff]  ;;  %v1321_v60 = vld [vmem:[#allocation7 + $0xb8] sm:$0xff]  ;;  %v1304_v63 = vld [vmem:[#allocation7 + $0x30] sm:$0xff] }
 0x13e   : > { %v1305_v0 = vld [vmem:[#allocation7 + $0x38] sm:$0xff]  ;;  %v1306_v6 = vld [vmem:[#allocation7 + $0x40] sm:$0xff]  ;;  %v1327_v27 = vld [vmem:[#allocation7 + $0xe8] sm:$0xff] }
 0x13f   : > { %4246 = vmatpush3.bf16.msra.mxu1 %v4245_v43  ;;  %v1325_v20 = vld [vmem:[#allocation7 + $0xd8] sm:$0xff]  ;;  %v1326_v26 = vld [vmem:[#allocation7 + $0xe0] sm:$0xff]  ;;  %v1311_v32 = vld [vmem:[#allocation7 + $0x68] sm:$0xff] }
 0x140   : > { %4248 = vmatprep.subr.bf16.mxu1 %v4247_v44  ;;  %v1309_v23 = vld [vmem:[#allocation7 + $0x58] sm:$0xff]  ;;  %v4309_v30 = vpack.c.bf16 %v1327_v27, %v1326_v26 }
 0x141   : > { %v1313_v39 = vld [vmem:[#allocation7 + $0x78] sm:$0xff] }
 0x143   : > { %4250 = vmatpush3.bf16.msra.mxu1 %v4249_v49  ;;  %v1319_v49 = vld [vmem:[#allocation7 + $0xa8] sm:$0xff] }
 0x144   : > { %4252 = vmatprep.subr.bf16.mxu1 %v4251_v50  ;;  %v4291_v50 = vpack.c.bf16 %v1301_v47, %v1300_v46  ;;  %v4293_v52 = vpack.c.bf16 %v1319_v49, %v1318_v48  ;;  %v1412_v46 = vld [vmem:[#allocation10 + $0x28] sm:$0xff]  ;;  %v1414_v47 = vld [vmem:[#allocation10 + $0x38] sm:$0xff] }
 0x145   : > { %v4321_v49 = vpack.c.bf16 %v1414_v47, %v1412_v46  ;;  %v1571_v46 = vld [vmem:[#allocation11 + $0x90] sm:$0xff]  ;;  %v1572_v47 = vld [vmem:[#allocation11 + $0x98] sm:$0xff] }
 0x147   : > { %4254 = vmatpush3.bf16.msra.mxu1 %v4253_v53  ;;  %v1302_v53 = vld [vmem:[#allocation7 + $0x20] sm:$0xff] }
 0x148   : > { %4279 = vmatprep.subr.bf16.mxu1 %v5387_v31 }
 0x1ae   : > { %v918_v59 = vpop.permute.xlu0 %917 }
 0x1af   : > { %vm919_vm1 = vcmp.eq.s32.totalorder %v5835_v55, %v918_v59  ;;  %vm920_vm2 = vcmp.eq.s32.totalorder %v5841_v56, %v918_v59  ;;  %v1320_v59 = vld [vmem:[#allocation7 + $0xb0] sm:$0xff] }
 0x1b0   : > { %3353 = vmatprep.mubr.msk.f32.mxu1 %vm920_vm2, %v5388_v1  ;;  %v4297_v62 = vpack.c.bf16 %v1321_v60, %v1320_v59  ;;  %v1415_v59 = vld [vmem:[#allocation10 + $0x40] sm:$0xff]  ;;  %v1417_v60 = vld [vmem:[#allocation10 + $0x50] sm:$0xff] }
 0x1b1   : > { %3354 = vmatmul.mubr.msk.f32.vlgmr.msra.gmra.mrb[0].mxu1 %vm919_vm1, %v5388_v1 }
 0x1b2   : > { %v928_v2 = vpop.permute.xlu0 %927  ;;  %4281 = vmatpush3.bf16.msra.mxu1 %v4280_v61  ;;  %3940 = vmatprep.mubr.msk.f32.mxu1 %vm5386_vm0, %v5385_v16  ;;  %v4295_v61 = vpack.c.bf16 %v1303_v57, %v1302_v53  ;;  %v1418_v53 = vld [vmem:[#allocation10 + $0x58] sm:$0xff] }
 0x1b3   : > { %vm929_vm4 = vcmp.eq.s32.totalorder %v5835_v55, %v928_v2  ;;  %4282 = vmatprep.subr.bf16.mxu1 %v5387_v31  ;;  %v1322_v2 = vld [vmem:[#allocation7 + $0xc0] sm:$0xff] }
 0x1b4   : > { %v3351_v7 = vsel %vm929_vm4, 1.0, %v5385_v16 }
 0x1b5   : > { %3895 = vmatmul.mubr.msk.f32.vlgmr.msra.gmra.mrb[0].mxu0 %vm965_vm3, %v3351_v7  ;;  %v1307_v7 = vld [vmem:[#allocation7 + $0x48] sm:$0xff] }
 0x1b6   : > { %4257 = vmatpush3.bf16.msra.mxu0 %v4256_v3  ;;  %4284 = vmatpush3.bf16.msra.mxu1 %v4283_v4  ;;  %v1323_v3 = vld [vmem:[#allocation7 + $0xc8] sm:$0xff]  ;;  %v4299_v4 = vpack.c.bf16 %v1305_v0, %v1304_v63  ;;  %v4327_v63 = vpack.c.bf16 %v1417_v60, %v1415_v59 }
 0x1b7   : > { %4258 = vmatprep.subr.bf16.mxu0 %v5387_v31  ;;  %3929 = vmatprep.mubr.msk.f32.mxu0 %vm5386_vm0, %v5385_v16  ;;  %v4301_v5 = vpack.c.bf16 %v1323_v3, %v1322_v2  ;;  %v1419_v2 = vld [vmem:[#allocation10 + $0x60] sm:$0xff]  ;;  %v1421_v3 = vld [vmem:[#allocation10 + $0x70] sm:$0xff]  ;;  %v1558_v60 = vld [vmem:[#allocation11 + $0x28] sm:$0xff] }
 0x1b8   : > { %v1557_v59 = vld [vmem:[#allocation11 + $0x20] sm:$0xff] }
 0x1b9   : > { %3941 = vmatmul.mubr.msk.f32.vlgmr.msra.gmra.mrb[2].mxu1 %vm1208_vm5, %v1203_v9 }
 0x1ba   : > { %4260 = vmatpush3.bf16.msra.mxu0 %v4259_v8  ;;  %1515 = vmatprep.mubr.f32.mxu1 %v5385_v16  ;;  %v4303_v8 = vpack.c.bf16 %v1307_v7, %v1306_v6  ;;  %v4331_v6 = vpack.c.bf16 %v1421_v3, %v1419_v2  ;;  %v1559_v2 = vld [vmem:[#allocation11 + $0x30] sm:$0xff]  ;;  %v1560_v3 = vld [vmem:[#allocation11 + $0x38] sm:$0xff] }
 0x1bb   : > { %4261 = vmatprep.subr.bf16.mxu0 %v5387_v31 }
 0x1be   : > { %4263 = vmatpush3.bf16.msra.mxu0 %v4262_v12 }
 0x1bf   : > { %4264 = vmatprep.subr.bf16.mxu0 %v5387_v31 }
 0x1c2   : > { %4266 = vmatpush3.bf16.msra.mxu0 %v4265_v15 }
 0x1c3   : > { %4267 = vmatprep.subr.bf16.mxu0 %v5387_v31 }
 0x1c4   : > { %v1285_v9 = vpop.xlane.xlu1 %1284 }
 0x1c5   : > { %v1286_v10 = vmax.f32 %v1285_v9, 1.0  ;;  %v1425_v9 = vld [vmem:[#allocation10 + $0x90] sm:$0xff] }
 0x1c6   : > { %4269 = vmatpush3.bf16.msra.mxu0 %v4268_v19  ;;  %v1324_v19 = vld [vmem:[#allocation7 + $0xd0] sm:$0xff] }
 0x1c7   : > { %4270 = vmatprep.subr.bf16.mxu0 %v5387_v31  ;;  %4981 = vrcp.f32 %v1286_v10  ;;  %v4305_v21 = vpack.c.bf16 %v1325_v20, %v1324_v19  ;;  %v1428_v10 = vld [vmem:[#allocation10 + $0xa8] sm:$0xff] }
 0x1ca   : > { %4272 = vmatpush3.bf16.msra.mxu0 %v4271_v22  ;;  %v1308_v22 = vld [vmem:[#allocation7 + $0x50] sm:$0xff] }
 0x1cb   : > { %4273 = vmatprep.subr.bf16.mxu0 %v5387_v31  ;;  %v4307_v24 = vpack.c.bf16 %v1309_v23, %v1308_v22  ;;  %v1433_v22 = vld [vmem:[#allocation10 + $0xd0] sm:$0xff] }
 0x1ce   : > { %4275 = vmatpush3.bf16.msra.mxu0 %v4274_v25 }
 0x1cf   : > { %4276 = vmatprep.subr.bf16.mxu0 %v5387_v31 }
 0x1d1   : > { %v4982_v11 = vpop.eup %4981 }
 0x1d2   : > { %4278 = vmatpush3.bf16.msra.mxu0 %v4277_v28  ;;  %v1310_v28 = vld [vmem:[#allocation7 + $0x60] sm:$0xff] }
 0x1d3   : > { %4286 = vmatprep.subr.bf16.mxu0 %v4285_v33  ;;  %v1328_v33 = vld [vmem:[#allocation7 + $0xf0] sm:$0xff] }
 0x284   : > { %v3412_v34 = vpop.f32.mrb[0].mxu1 }
 0x285   : > { %v3413_v35 = vpop.f32.mrb[1].mxu1 }
 0x286   : > { %v3414_v38 = vadd.f32 %v3413_v35, %v3412_v34  ;;  %v1329_v34 = vld [vmem:[#allocation7 + $0xf8] sm:$0xff]  ;;  %v4311_v35 = vpack.c.bf16 %v1311_v32, %v1310_v28 }
 0x287   : > { %v4313_v37 = vpack.c.bf16 %v1329_v34, %v1328_v33  ;;  %v1435_v33 = vld [vmem:[#allocation10 + $0xe0] sm:$0xff]  ;;  %v1437_v34 = vld [vmem:[#allocation10 + $0xf0] sm:$0xff] }
 0x288   : > { %v1035_v41 = vpop.f32.mrb[0].mxu0 }
 0x289   : > { %v1106_v43 = vadd.f32 %v3414_v38, %v1035_v41  ;;  %v3896_v44 = vpop.f32.mrb[1].mxu0  ;;  %v1312_v38 = vld [vmem:[#allocation7 + $0x70] sm:$0xff] }
 0x28a   : > { %v4315_v40 = vpack.c.bf16 %v1313_v39, %v1312_v38  ;;  %v1408_v41 = vld [vmem:[#allocation10 + $0x8] sm:$0xff] }
 0x28b   : > { %3930 = vmatmul.mubr.f32.vlgmr.msra.gmra.mrb[2].mxu0 %v1106_v43  ;;  %v1407_v43 = vld [vmem:[#allocation10] sm:$0xff] }
 0x28c   : > { %4288 = vmatpush3.bf16.msra.mxu0 %v4287_v42  ;;  %v1278_v51 = vpop.f32.mrb[2].mxu1  ;;  %v1410_v42 = vld [vmem:[#allocation10 + $0x18] sm:$0xff] }
 0x28d   : > { %4290 = vmatprep.subr.bf16.mxu0 %v4289_v45  ;;  %v3942_v58 = vpop.f32.mrb[3].mxu1  ;;  %v1288_v12 = vmul.f32 %v4982_v11, %v1278_v51  ;;  %v4317_v44 = vpack.c.bf16 %v1410_v42, %v1408_v41  ;;  %v1409_v45 = vld [vmem:[#allocation10 + $0x10] sm:$0xff]  ;;  %v1430_v11 = vld [vmem:[#allocation10 + $0xb8] sm:$0xff]  ;;  %v1569_v41 = vld [vmem:[#allocation11 + $0x80] sm:$0xff] }
 0x28e   : > { %v4319_v48 = vpack.c.bf16 %v1409_v45, %v1407_v43  ;;  %v1413_v51 = vld [vmem:[#allocation10 + $0x30] sm:$0xff]  ;;  %v1570_v42 = vld [vmem:[#allocation11 + $0x88] sm:$0xff]  ;;  %v1553_v43 = vld [vmem:[#allocation11] sm:$0xff] }
 0x28f   : > { %v1290_v13 = vsel %vm1289_vm7, %v1288_v12, 0.0  ;;  %4318 = vmatprep.subr.bf16.mxu1 %v4317_v44  ;;  %v4349_v44 = vpack.c.bf16 %v1570_v42, %v1569_v41  ;;  %v1554_v45 = vld [vmem:[#allocation11 + $0x8] sm:$0xff]  ;;  %v1549_v42 = vld [vmem:[%s893_s28] sm:$0xff]  ;;  %s5389_s28 = smov [#allocation19]  }
 0x290   : > { %4292 = vmatpush3.bf16.msra.mxu0 %v4291_v50  ;;  %v1291_v14 = vrot.slane %v1290_v13, 4  ;;  %v1411_v50 = vld [vmem:[#allocation10 + $0x20] sm:$0xff]  ;;  %4320 = vmatpush1.bf16.msra.mxu1 %v4319_v48  ;;  %v4351_v48 = vpack.c.bf16 %v1554_v45, %v1553_v43  ;;  %s5285_s21 = sshll.u32 %s5389_s28, 4  ;;  %s5286_s21 = int_to_ptr.vmem [resolvable:$false] %s5285_s21 }
 0x291   : > { %4294 = vmatprep.subr.bf16.mxu0 %v4293_v52  ;;  %v1416_v52 = vld [vmem:[#allocation10 + $0x48] sm:$0xff]  ;;  %v4323_v57 = vpack.c.bf16 %v1413_v51, %v1411_v50  ;;  %4322 = vmatprep.subr.bf16.mxu1 %v4321_v49  ;;  %v4353_v49 = vpack.c.bf16 %v1572_v47, %v1571_v46  ;;  %v1555_v50 = vld [vmem:[#allocation11 + $0x10] sm:$0xff]  ;;  %v1556_v51 = vld [vmem:[#allocation11 + $0x18] sm:$0xff]  ;;  %s5287_s14 = scalar_lea.vmem %s5286_s21, 512  ;;  %p5288_p9 = scmp.lt.s32.totalorder %s3060_s26, %s5286_s21 }
 0x292   : > { %v1292_v15 = vadd.f32 %v1291_v14, %v1290_v13  ;;  %v4325_v58 = vpack.c.bf16 %v1418_v53, %v1416_v52  ;;  %v4337_v13 = vpack.c.bf16 %v1430_v11, %v1428_v10  ;;  %v1427_v14 = vld [vmem:[#allocation10 + $0xa0] sm:$0xff]  ;;  %v1574_v53 = vld [vmem:[#allocation11 + $0xa8] sm:$0xff]  ;;  %v1579_v10 = vld [vmem:[#allocation11 + $0xd0] sm:$0xff]  ;;  %p5289_p12 = scmp.lt.s32.totalorder %s5287_s14, %s5281_s25 }
 0x293   : > { %v1573_v52 = vld [vmem:[#allocation11 + $0xa0] sm:$0xff]  ;;  %v1580_v11 = vld [vmem:[#allocation11 + $0xd8] sm:$0xff] }
 0x294   : > { %4296 = vmatpush3.bf16.msra.mxu0 %v4295_v61  ;;  %v1293_v17 = vrot.slane %v1292_v15, 2  ;;  %v1420_v61 = vld [vmem:[#allocation10 + $0x68] sm:$0xff]  ;;  %4324 = vmatpush1.bf16.msra.mxu1 %v4323_v57  ;;  %v4355_v57 = vpack.c.bf16 %v1556_v51, %v1555_v50  ;;  %p5290_p10 = por %p5289_p12, %p5288_p9 }
 0x295   : > { %4298 = vmatprep.subr.bf16.mxu0 %v4297_v62  ;;  %v1422_v62 = vld [vmem:[#allocation10 + $0x78] sm:$0xff]  ;;  %4326 = vmatprep.subr.bf16.mxu1 %v4325_v58  ;;  %v4357_v58 = vpack.c.bf16 %v1574_v53, %v1573_v52  ;;  %v1737_v53 = vld [vmem:[#allocation13] sm:$0xff] }
 0x296   : > { %v1294_v18 = vadd.f32 %v1293_v17, %v1292_v15  ;;  %v4329_v0 = vpack.c.bf16 %v1422_v62, %v1420_v61  ;;  %v1429_v15 = vld [vmem:[#allocation10 + $0xb0] sm:$0xff]  ;;  %v1432_v17 = vld [vmem:[#allocation10 + $0xc8] sm:$0xff]  ;;  %v1576_v62 = vld [vmem:[#allocation11 + $0xb8] sm:$0xff] }
 0x297   : > { %v4339_v19 = vpack.c.bf16 %v1429_v15, %v1427_v14  ;;  %v1575_v61 = vld [vmem:[#allocation11 + $0xb0] sm:$0xff]  ;;  %v1564_v15 = vld [vmem:[#allocation11 + $0x58] sm:$0xff] }
 0x298   : > { %4300 = vmatpush3.bf16.msra.mxu0 %v4299_v4  ;;  %v1295_v25 = vrot.slane %v1294_v18, 1  ;;  %v1424_v4 = vld [vmem:[#allocation10 + $0x88] sm:$0xff]  ;;  %4328 = vmatpush1.bf16.msra.mxu1 %v4327_v63  ;;  %v4359_v63 = vpack.c.bf16 %v1558_v60, %v1557_v59  ;;  %v1563_v14 = vld [vmem:[#allocation11 + $0x50] sm:$0xff] }
 0x299   : > { %4302 = vmatprep.subr.bf16.mxu0 %v4301_v5  ;;  %v1426_v5 = vld [vmem:[#allocation10 + $0x98] sm:$0xff]  ;;  %4330 = vmatprep.subr.bf16.mxu1 %v4329_v0  ;;  %v4361_v0 = vpack.c.bf16 %v1576_v62, %v1575_v61  ;;  %v1739_v60 = vld [vmem:[#allocation13 + $0x10] sm:$0xff] }
 0x29a   : > { %v1296_v29 = vadd.f32 %v1295_v25, %v1294_v18  ;;  %v4333_v7 = vpack.c.bf16 %v1426_v5, %v1424_v4  ;;  %v1434_v18 = vld [vmem:[#allocation10 + $0xd8] sm:$0xff]  ;;  %v1577_v4 = vld [vmem:[#allocation11 + $0xc0] sm:$0xff]  ;;  %v1578_v5 = vld [vmem:[#allocation11 + $0xc8] sm:$0xff] }
 0x29b   : > { %v4341_v20 = vpack.c.bf16 %v1434_v18, %v1432_v17  ;;  %v1581_v17 = vld [vmem:[#allocation11 + $0xe0] sm:$0xff]  ;;  %v1582_v18 = vld [vmem:[#allocation11 + $0xe8] sm:$0xff]  ;;  %v1740_v61 = vld [vmem:[#allocation13 + $0x18] sm:$0xff] }
 0x29c   : > { %4304 = vmatpush3.bf16.msra.mxu0 %v4303_v8  ;;  %v1297_v36 = vmul.f32 0.25, %v1296_v29  ;;  %v1423_v8 = vld [vmem:[#allocation10 + $0x80] sm:$0xff]  ;;  %4332 = vmatpush1.bf16.msra.mxu1 %v4331_v6  ;;  %v1436_v29 = vld [vmem:[#allocation10 + $0xe8] sm:$0xff]  ;;  %v4363_v6 = vpack.c.bf16 %v1560_v3, %v1559_v2  ;;  %v4417_v2 = vpack.c.bf16 %v1740_v61, %v1739_v60 }
 0x29d   : > { %4306 = vmatprep.subr.bf16.mxu0 %v4305_v21  ;;  %v4335_v12 = vpack.c.bf16 %v1425_v9, %v1423_v8  ;;  %4334 = vmatprep.subr.bf16.mxu1 %v4333_v7  ;;  %v1431_v21 = vld [vmem:[#allocation10 + $0xc0] sm:$0xff]  ;;  %v4365_v7 = vpack.c.bf16 %v1578_v5, %v1577_v4  ;;  %v1562_v9 = vld [vmem:[#allocation11 + $0x48] sm:$0xff] }
 0x29e   : > { %1401 = vmatprep.mubr.f32.mxu0 %v1297_v36  ;;  %v4343_v23 = vpack.c.bf16 %v1433_v22, %v1431_v21  ;;  %v1561_v8 = vld [vmem:[#allocation11 + $0x40] sm:$0xff]  ;;  %v1566_v22 = vld [vmem:[#allocation11 + $0x68] sm:$0xff] }
 0x29f   : > { %v1565_v21 = vld [vmem:[#allocation11 + $0x60] sm:$0xff]  ;;  %v1742_v4 = vld [vmem:[#allocation13 + $0x28] sm:$0xff] }
 0x2a0   : > { %4308 = vmatpush3.bf16.msra.mxu0 %v4307_v24  ;;  %4336 = vmatpush1.bf16.msra.mxu1 %v4335_v12  ;;  %v3355_v24 = vld [vmem:[%s6219_s10] ss:$0 sm:$0xff]  ;;  %v4367_v12 = vpack.c.bf16 %v1562_v9, %v1561_v8  ;;  %v1741_v3 = vld [vmem:[#allocation13 + $0x20] sm:$0xff] }
 0x2a1   : > { %4310 = vmatprep.subr.bf16.mxu0 %v4309_v30  ;;  %4338 = vmatprep.subr.bf16.mxu1 %v4337_v13  ;;  %v1438_v30 = vld [vmem:[#allocation10 + $0xf8] sm:$0xff]  ;;  %v4369_v13 = vpack.c.bf16 %v1580_v11, %v1579_v10  ;;  %v4421_v5 = vpack.c.bf16 %v1742_v4, %v1741_v3  ;;  %v1745_v9 = vld [vmem:[#allocation13 + $0x40] sm:$0xff]  ;;  %v1746_v10 = vld [vmem:[#allocation13 + $0x48] sm:$0xff] }
 0x2a2   : > { %v4345_v32 = vpack.c.bf16 %v1438_v30, %v1436_v29  ;;  %v4429_v11 = vpack.c.bf16 %v1746_v10, %v1745_v9  ;;  %v1949_v3 = vld [vmem:[#allocation11 + $0x1a0] sm:$0xff]  ;;  %v1950_v4 = vld [vmem:[#allocation11 + $0x1a8] sm:$0xff]  ;;  %v1951_v9 = vld [vmem:[#allocation11 + $0x1b0] sm:$0xff] }
 0x2a3   : > { %v1952_v10 = vld [vmem:[#allocation11 + $0x1b8] sm:$0xff] }
 0x2a4   : > { %4312 = vmatpush3.bf16.msra.mxu0 %v4311_v35  ;;  %4340 = vmatpush1.bf16.msra.mxu1 %v4339_v19  ;;  %v4347_v35 = vpack.c.bf16 %v1437_v34, %v1435_v33  ;;  %v4371_v19 = vpack.c.bf16 %v1564_v15, %v1563_v14  ;;  %v1749_v15 = vld [vmem:[#allocation13 + $0x60] sm:$0xff] }
 0x2a5   : > { %4314 = vmatprep.subr.bf16.mxu0 %v4313_v37  ;;  %4342 = vmatprep.subr.bf16.mxu1 %v4341_v20  ;;  %v3357_v37 = vld [vmem:[#allocation8] ss:$0 sm:$0xff]  ;;  %v4373_v20 = vpack.c.bf16 %v1582_v18, %v1581_v17  ;;  %v1750_v17 = vld [vmem:[#allocation13 + $0x68] sm:$0xff] }
 0x2a6   : > { %v4437_v18 = vpack.c.bf16 %v1750_v17, %v1749_v15  ;;  %v1953_v15 = vld [vmem:[#allocation11 + $0x1c0] sm:$0xff]  ;;  %v1954_v17 = vld [vmem:[#allocation11 + $0x1c8] sm:$0xff] }
 0x2a8   : > { %4316 = vmatpush3.bf16.msra.mxu0 %v4315_v40  ;;  %4344 = vmatpush1.bf16.msra.mxu1 %v4343_v23  ;;  %v4375_v23 = vpack.c.bf16 %v1566_v22, %v1565_v21 }
 0x2a9   : > { %4346 = vmatprep.subr.bf16.mxu1 %v4345_v32  ;;  %4350 = vmatprep.subr.bf16.mxu0 %v4349_v44 }
 0x2ac   : > { %4348 = vmatpush1.bf16.msra.mxu1 %v4347_v35  ;;  %v1539_v35 = vld [vmem:[%s889_s0] sm:$0xff]  ;;  %s6295_s0 = sld [smem:[#allocation44_spill]] }
 0x2ad   : > { %4382 = vmatprep.subr.bf16.mxu1 %v4349_v44 }
 0x2b2   : > { %s6163_s5 = scalar_lea.hbm %s6295_s0, %s3377_s24 }
 0x35e   : > { %v1198_v25 = vpop.f32.mrb[2].mxu0 }
 0x35f   : > { %v1199_v26 = vadd.f32 %v3355_v24, %v1198_v25  ;;  %v3931_v27 = vpop.f32.mrb[3].mxu0  ;;  %v5920_v24 = vshrl.u32 %v912_v54, 7 }
 0x361   : > { %4983 = vtanh.f32 %v1199_v26  ;;  %v5923_v25 = vsub.s32 0, %v5920_v24  ;;  %v1439_v26 = vld [vmem:[%s6290_s29] sm:$0x3]  ;;  %v1447_v27 = vsub.s32 1, %v5920_v24  ;;  %s897_s29 = scalar_lea.vmem %s6293_s27, %s5818_s4  ;;  %vm1922_vm10 = vcmp.eq.s32.totalorder %v5920_v24, 0  ;;  %s6294_s4 = sld [smem:[#allocation33_spill]] }
 0x362   : > { %v1550_v43 = vld [vmem:[%s897_s29] sm:$0xff]  ;;  %vm2292_vm11 = vcmp.eq.s32.totalorder %v5920_v24, 1  ;;  %vm2662_vm12 = vcmp.eq.s32.totalorder %v5920_v24, 2 }
 0x363   : > { %v1448_v29 = vrot.slane %v1439_v26, %v1447_v27  ;;  %v1752_v27 = vld [vmem:[#allocation13 + $0x78] sm:$0xff] }
 0x367   : > { %p6296_p1 = scmp.ne.s32.totalorder %s6294_s4, 0 }
 0x369   : > { %p5283_p6 = pnand %p5282_p0, %p6296_p1 }
 0x36b   : > { %v4984_v28 = vpop.eup %4983  ;;  %p5284_p5 = pneg %p5283_p6 }
 0x36c   : > { %1402 = vmatmul.mubr.f32.vlgmr.msra.gmra.mrb[4].mxu0 %v4984_v28  ;;  %v1444_v28 = vrot.slane %v1439_v26, %v5923_v25  ;;  %v1751_v26 = vld [vmem:[#allocation13 + $0x70] sm:$0xff] }
 0x36d   : > { %4352 = vmatpush3.bf16.msra.mxu0 %v4351_v48  ;;  %p5291_p2 = pnand %p5290_p10, %p5284_p5 }
 0x36e   : > { %4354 = vmatprep.subr.bf16.mxu0 %v4353_v49 }
 0x371   : > { %4356 = vmatpush3.bf16.msra.mxu0 %v4355_v57 }
 0x372   : > { %4358 = vmatprep.subr.bf16.mxu0 %v4357_v58 }
 0x375   : > { %4360 = vmatpush3.bf16.msra.mxu0 %v4359_v63 }
 0x376   : > { %4362 = vmatprep.subr.bf16.mxu0 %v4361_v0 }
 0x379   : > { %4364 = vmatpush3.bf16.msra.mxu0 %v4363_v6 }
 0x37a   : > { %4366 = vmatprep.subr.bf16.mxu0 %v4365_v7 }
 0x37d   : > { %4368 = vmatpush3.bf16.msra.mxu0 %v4367_v12 }
 0x37e   : > { %4370 = vmatprep.subr.bf16.mxu0 %v4369_v13 }
 0x381   : > { %4372 = vmatpush3.bf16.msra.mxu0 %v4371_v19 }
 0x382   : > { %4374 = vmatprep.subr.bf16.mxu0 %v4373_v20 }
 0x385   : > { %4376 = vmatpush3.bf16.msra.mxu0 %v4375_v23 }
 0x43f   : > { %v3469_v36 = vpop.f32.mrb[4].mxu0 }
 0x440   : > { %v3470_v38 = vpop.f32.mrb[5].mxu0 }
 0x441   : > { %v3471_v39 = vadd.f32 %v3470_v38, %v3469_v36  ;;  %v1583_v36 = vld [vmem:[#allocation11 + $0xf0] sm:$0xff] }
 0x443   : > { %v1404_v40 = vadd.f32 %v3471_v39, %v3357_v37  ;;  %v1584_v37 = vld [vmem:[#allocation11 + $0xf8] sm:$0xff]  ;;  %v1567_v39 = vld [vmem:[#allocation11 + $0x70] sm:$0xff] }
 0x444   : > { %v4377_v38 = vpack.c.bf16 %v1584_v37, %v1583_v36  ;;  %v1838_v36 = vld [vmem:[#allocation16 + $0x18] sm:$0xff] }
 0x445   : > { %1516 = vmatmul.mubr.f32.vlgmr.msra.gmra.mrb[4].mxu1 %v1404_v40  ;;  %v1568_v40 = vld [vmem:[#allocation11 + $0x78] sm:$0xff] }
 0x446   : > { %4384 = vmatpush3.bf16.msra.mxu1 %v4351_v48  ;;  %v4379_v41 = vpack.c.bf16 %v1568_v40, %v1567_v39  ;;  %4378 = vmatprep.subr.bf16.mxu0 %v4377_v38  ;;  %v1840_v39 = vld [vmem:[#allocation16 + $0x28] sm:$0xff] }
 0x447   : > { %4386 = vmatprep.subr.bf16.mxu1 %v4353_v49 }
 0x448   : > { %4380 = vmatpush3.bf16.msra.mxu0 %v4379_v41 }
 0x44a   : > { %4388 = vmatpush3.bf16.msra.mxu1 %v4355_v57  ;;  %v1738_v57 = vld [vmem:[#allocation13 + $0x8] sm:$0xff] }
 0x44b   : > { %4390 = vmatprep.subr.bf16.mxu1 %v4357_v58  ;;  %v4413_v58 = vpack.c.bf16 %v1738_v57, %v1737_v53  ;;  %v1948_v53 = vld [vmem:[#allocation11 + $0x198] sm:$0xff] }
 0x44d   : > { %4414 = vmatprep.subr.bf16.mxu0 %v4413_v58 }
 0x44e   : > { %4392 = vmatpush3.bf16.msra.mxu1 %v4359_v63 }
 0x44f   : > { %4394 = vmatprep.subr.bf16.mxu1 %v4361_v0 }
 0x452   : > { %4396 = vmatpush3.bf16.msra.mxu1 %v4363_v6  ;;  %v1743_v6 = vld [vmem:[#allocation13 + $0x30] sm:$0xff] }
 0x453   : > { %4398 = vmatprep.subr.bf16.mxu1 %v4365_v7  ;;  %v1744_v7 = vld [vmem:[#allocation13 + $0x38] sm:$0xff] }
 0x454   : > { %v4425_v8 = vpack.c.bf16 %v1744_v7, %v1743_v6  ;;  %v5995_v6 = vpack.c.bf16 %v1950_v4, %v1949_v3  ;;  %v1933_v7 = vld [vmem:[#allocation11 + $0x120] sm:$0xff] }
 0x456   : > { %4400 = vmatpush3.bf16.msra.mxu1 %v4367_v12  ;;  %v1747_v12 = vld [vmem:[#allocation13 + $0x50] sm:$0xff] }
 0x457   : > { %4402 = vmatprep.subr.bf16.mxu1 %v4369_v13  ;;  %v1748_v13 = vld [vmem:[#allocation13 + $0x58] sm:$0xff] }
 0x458   : > { %v4433_v14 = vpack.c.bf16 %v1748_v13, %v1747_v12  ;;  %v6001_v12 = vpack.c.bf16 %v1952_v10, %v1951_v9  ;;  %v1935_v13 = vld [vmem:[#allocation11 + $0x130] sm:$0xff]  ;;  %v2107_v9 = vld [vmem:[#allocation13 + $0x98] sm:$0xff]  ;;  %v2108_v10 = vld [vmem:[#allocation13 + $0xa0] sm:$0xff] }
 0x45a   : > { %4404 = vmatpush3.bf16.msra.mxu1 %v4371_v19 }
 0x45b   : > { %4406 = vmatprep.subr.bf16.mxu1 %v4373_v20 }
 0x45e   : > { %4408 = vmatpush3.bf16.msra.mxu1 %v4375_v23 }
 0x45f   : > { %4410 = vmatprep.subr.bf16.mxu1 %v4377_v38  ;;  %v1839_v38 = vld [vmem:[#allocation16 + $0x20] sm:$0xff] }
 0x460   : > { %v4452_v40 = vpack.c.bf16 %v1840_v39, %v1839_v38  ;;  %v1959_v38 = vld [vmem:[#allocation11 + $0x1f0] sm:$0xff]  ;;  %v1960_v39 = vld [vmem:[#allocation11 + $0x1f8] sm:$0xff] }
 0x462   : > { %4412 = vmatpush3.bf16.msra.mxu1 %v4379_v41  ;;  %v1841_v41 = vld [vmem:[#allocation16 + $0x30] sm:$0xff] }
 0x463   : > { %4445 = vmatprep.subr.bf16.mxu1 %v5387_v31 }
 0x518   : > { %v1517_v30 = vpop.f32.mrb[4].mxu1 }
 0x519   : > { %v1518_v32 = vadd.f32 %v1517_v30, %v1444_v28  ;;  %v1519_v54 = vpop.f32.mrb[5].mxu1  ;;  %v4441_v28 = vpack.c.bf16 %v1752_v27, %v1751_v26  ;;  %v1946_v30 = vld [vmem:[#allocation11 + $0x188] sm:$0xff]  ;;  %v1956_v26 = vld [vmem:[#allocation11 + $0x1d8] sm:$0xff] }
 0x51a   : > { %v1520_v33 = vadd.f32 %v1519_v54, %v1448_v29  ;;  %v1945_v29 = vld [vmem:[#allocation11 + $0x180] sm:$0xff] }
 0x51b   : > { %1522 = vst [vmem:[%s5933_s20] sm:$0xff] %v1518_v32  ;;  %v1835_v54 = vld [vmem:[#allocation16] sm:$0xff] }
 0x51c   : > { %1523 = vst [vmem:[%s5933_s20 + $0x8] sm:$0xff] %v1520_v33  ;;  %v1524_v34 = vmax.f32 %v1518_v32, %v1520_v33 }
 0x51e   : > { %1525 = vmax.xlane.f32.xlu1 %v1524_v34  ;;  %v1837_v34 = vld [vmem:[#allocation16 + $0x10] sm:$0xff] }
 0x51f   : > { %v4449_v37 = vpack.c.bf16 %v1838_v36, %v1837_v34  ;;  %v1941_v36 = vld [vmem:[#allocation11 + $0x160] sm:$0xff] }
 0x52f   : > { %1541 = vperm.xlu1 %4980, %v1539_v35  }
 0x533   : > { %1733 = vperm.xlu1 %4980, %v1549_v42   ;;  %v1842_v42 = vld [vmem:[#allocation16 + $0x38] sm:$0xff] }
 0x537   : > { %1657 = vperm.xlu1 %4980, %v1550_v43   ;;  %v4455_v43 = vpack.c.bf16 %v1842_v42, %v1841_v41  ;;  %v4497_v41 = vpack.c.bf16 %v1960_v39, %v1959_v38  ;;  %v1943_v42 = vld [vmem:[#allocation11 + $0x170] sm:$0xff] }
 0x538   : > { %v2205_v38 = vld [vmem:[#allocation16 + $0x88] sm:$0xff]  ;;  %v2206_v39 = vld [vmem:[#allocation16 + $0x90] sm:$0xff] }
 0x5ab   : > { %v1526_v44 = vpop.xlane.xlu1 %1525 }
 0x5ac   : > { %v1527_v45 = vsub.f32 %v1518_v32, %v1526_v44  ;;  %v1528_v46 = vsub.f32 %v1520_v33, %v1526_v44  ;;  %v5975_v32 = vpack.c.bf16 %v1946_v30, %v1945_v29  ;;  %v1836_v33 = vld [vmem:[#allocation16 + $0x8] sm:$0xff]  ;;  %v1843_v44 = vld [vmem:[#allocation16 + $0x40] sm:$0xff]  ;;  %v1940_v30 = vld [vmem:[#allocation11 + $0x158] sm:$0xff] }
 0x5ad   : > { %v4446_v35 = vpack.c.bf16 %v1836_v33, %v1835_v54  ;;  %v1939_v29 = vld [vmem:[#allocation11 + $0x150] sm:$0xff]  ;;  %v1957_v54 = vld [vmem:[#allocation11 + $0x1e0] sm:$0xff]  ;;  %v1958_v33 = vld [vmem:[#allocation11 + $0x1e8] sm:$0xff] }
 0x5ae   : > { %v1529_v47 = vmul.f32 1.442695, %v1527_v45  ;;  %v1531_v48 = vmul.f32 1.442695, %v1528_v46  ;;  %v1844_v45 = vld [vmem:[#allocation16 + $0x48] sm:$0xff]  ;;  %v4491_v34 = vpack.c.bf16 %v1940_v30, %v1939_v29 }
 0x5af   : > { %v5950_v49 = vpop.permute.xlu1 %1541  ;;  %v4458_v46 = vpack.c.bf16 %v1844_v45, %v1843_v44  ;;  %v1845_v45 = vld [vmem:[#allocation16 + $0x50] sm:$0xff] }
 0x5b0   : > { %4985 = vpow2.f32 %v1529_v47  ;;  %vm1543_vm8 = vcmp.eq.s32.totalorder %v5835_v55, %v5950_v49  ;;  %vm1544_vm9 = vcmp.eq.s32.totalorder %v5841_v56, %v5950_v49  ;;  %v2118_v30 = vld [vmem:[#allocation13 + $0xf0] sm:$0xff]  ;;  %v2844_v56 = vld [vmem:[#allocation13 + $0x180] sm:$0xff]  ;;  %v2853_v49 = vld [vmem:[#allocation13 + $0x1c8] sm:$0xff] }
 0x5b1   : > { %4987 = vpow2.f32 %v1531_v48  ;;  %3360 = vmatprep.mubr.msk.f32.mxu1 %vm1544_vm9, %v5388_v1  ;;  %v1929_v48 = vld [vmem:[#allocation11 + $0x100] sm:$0xff] }
 0x5b2   : > { %3361 = vmatmul.mubr.msk.f32.vlgmr.msra.gmra.mrb[6].mxu1 %vm1543_vm8, %v5388_v1 }
 0x5b3   : > { %4010 = vmatprep.mubr.msk.f32.mxu1 %vm5386_vm0, %v5385_v16  ;;  %v5972_v22 = vpop.permute.xlu1 %1733  ;;  %4447 = vmatpush3.bf16.msra.mxu1 %v4446_v35  ;;  %v4493_v35 = vpack.c.bf16 %v1958_v33, %v1957_v54  ;;  %v2119_v54 = vld [vmem:[#allocation13 + $0xf8] sm:$0xff] }
 0x5b4   : > { %4448 = vmatprep.subr.bf16.mxu1 %v5387_v31  ;;  %v4561_v33 = vpack.c.bf16 %v2119_v54, %v2118_v30  ;;  %v2307_v30 = vld [vmem:[#allocation11 + $0x240] sm:$0xff]  ;;  %v2308_v54 = vld [vmem:[#allocation11 + $0x248] sm:$0xff] }
 0x5b7   : > { %4450 = vmatpush3.bf16.msra.mxu1 %v4449_v37  ;;  %v1942_v37 = vld [vmem:[#allocation11 + $0x168] sm:$0xff] }
 0x5b8   : > { %4451 = vmatprep.subr.bf16.mxu1 %v5387_v31 }
 0x5ba   : > { %v4986_v50 = vpop.eup %4985 }
 0x5bb   : > { %v4988_v51 = vpop.eup %4987  ;;  %4453 = vmatpush3.bf16.msra.mxu1 %v4452_v40  ;;  %v4495_v40 = vpack.c.bf16 %v1942_v37, %v1941_v36  ;;  %v2204_v37 = vld [vmem:[#allocation16 + $0x80] sm:$0xff] }
 0x5bc   : > { %v1533_v52 = vadd.f32 %v4988_v51, %v4986_v50  ;;  %4454 = vmatprep.subr.bf16.mxu1 %v5387_v31 }
 0x5be   : > { %1534 = vadd.xlane.f32.xlu0 %v1533_v52  ;;  %v1947_v52 = vld [vmem:[#allocation11 + $0x190] sm:$0xff] }
 0x5bf   : > { %4456 = vmatpush3.bf16.msra.mxu1 %v4455_v43  ;;  %v5988_v61 = vpack.c.bf16 %v1948_v53, %v1947_v52  ;;  %v1944_v43 = vld [vmem:[#allocation11 + $0x178] sm:$0xff] }
 0x5c0   : > { %4457 = vmatprep.subr.bf16.mxu1 %v5387_v31  ;;  %v4499_v44 = vpack.c.bf16 %v1944_v43, %v1943_v42  ;;  %v1849_v52 = vld [vmem:[#allocation16 + $0x70] sm:$0xff]  ;;  %v1850_v53 = vld [vmem:[#allocation16 + $0x78] sm:$0xff]  ;;  %v2208_v43 = vld [vmem:[#allocation16 + $0xa0] sm:$0xff] }
 0x5c3   : > { %4459 = vmatpush3.bf16.msra.mxu1 %v4458_v46  ;;  %v1846_v46 = vld [vmem:[#allocation16 + $0x58] sm:$0xff] }
 0x5c4   : > { %4460 = vmatprep.subr.bf16.mxu1 %v5387_v31 }
 0x64b   : > { %v1535_v59 = vpop.xlane.xlu0 %1534 }
 0x64c   : > { %4989 = vrcp.f32 %v1535_v59 }
 0x656   : > { %v4990_v62 = vpop.eup %4989 }
 0x657   : > { %v5966_v63 = vmul.f32 %v4990_v62, %v4988_v51  ;;  %v5968_v0 = vmul.f32 %v4990_v62, %v4986_v50  ;;  %v1930_v50 = vld [vmem:[#allocation11 + $0x108] sm:$0xff]  ;;  %v1931_v62 = vld [vmem:[#allocation11 + $0x110] sm:$0xff] }
 0x658   : > { %v5985_v59 = vpack.c.bf16 %v1930_v50, %v1929_v48  ;;  %v1847_v48 = vld [vmem:[#allocation16 + $0x60] sm:$0xff]  ;;  %v1848_v50 = vld [vmem:[#allocation16 + $0x68] sm:$0xff] }
 0x659   : > { %1649 = vmatprep.mubr.f32.mxu0 %v5966_v63 }
 0x65a   : > { %1650 = vmatmul.mubr.f32.vlgmr.msra.gmra.mrb[6].mxu0 %v5968_v0 }
 0x65b   : > { %4416 = vmatpush3.bf16.msra.mxu0 %v4413_v58  ;;  %v5983_v58 = vpop.permute.xlu1 %1657 }
 0x65c   : > { %4418 = vmatprep.subr.bf16.mxu0 %v4417_v2 }
 0x65f   : > { %4420 = vmatpush3.bf16.msra.mxu0 %v4417_v2  ;;  %v1932_v2 = vld [vmem:[#allocation11 + $0x118] sm:$0xff] }
 0x660   : > { %4422 = vmatprep.subr.bf16.mxu0 %v4421_v5 }
 0x663   : > { %4424 = vmatpush3.bf16.msra.mxu0 %v4421_v5  ;;  %v5992_v5 = vpack.c.bf16 %v1932_v2, %v1931_v62 }
 0x664   : > { %4426 = vmatprep.subr.bf16.mxu0 %v4425_v8 }
 0x667   : > { %4428 = vmatpush3.bf16.msra.mxu0 %v4425_v8  ;;  %v1934_v8 = vld [vmem:[#allocation11 + $0x128] sm:$0xff] }
 0x668   : > { %4430 = vmatprep.subr.bf16.mxu0 %v4429_v11 }
 0x66b   : > { %4432 = vmatpush3.bf16.msra.mxu0 %v4429_v11  ;;  %v5998_v11 = vpack.c.bf16 %v1934_v8, %v1933_v7  ;;  %v2106_v8 = vld [vmem:[#allocation13 + $0x90] sm:$0xff] }
 0x66c   : > { %4434 = vmatprep.subr.bf16.mxu0 %v4433_v14 }
 0x66f   : > { %4436 = vmatpush3.bf16.msra.mxu0 %v4433_v14  ;;  %v1936_v14 = vld [vmem:[#allocation11 + $0x138] sm:$0xff] }
 0x670   : > { %4438 = vmatprep.subr.bf16.mxu0 %v4437_v18 }
 0x673   : > { %4440 = vmatpush3.bf16.msra.mxu0 %v4437_v18  ;;  %v4483_v18 = vpack.c.bf16 %v1936_v14, %v1935_v13  ;;  %v2110_v14 = vld [vmem:[#allocation13 + $0xb0] sm:$0xff] }
 0x674   : > { %4442 = vmatprep.subr.bf16.mxu0 %v4441_v28 }
 0x677   : > { %4444 = vmatpush3.bf16.msra.mxu0 %v4441_v28 }
 0x678   : > { %4470 = vmatprep.subr.bf16.mxu0 %v5975_v32 }
 0x685   : > { %v3539_v19 = vpop.f32.mrb[6].mxu1 }
 0x686   : > { %v3540_v20 = vpop.f32.mrb[7].mxu1 }
 0x687   : > { %v3541_v21 = vadd.f32 %v3540_v20, %v3539_v19  ;;  %v4485_v19 = vpack.c.bf16 %v1954_v17, %v1953_v15  ;;  %v1937_v20 = vld [vmem:[#allocation11 + $0x140] sm:$0xff]  ;;  %v2111_v15 = vld [vmem:[#allocation13 + $0xb8] sm:$0xff] }
 0x688   : > { %v4545_v17 = vpack.c.bf16 %v2111_v15, %v2110_v14  ;;  %v2303_v15 = vld [vmem:[#allocation11 + $0x220] sm:$0xff] }
 0x689   : > { %v1736_v23 = vmul.f32 %v3541_v21, %v5972_v22  ;;  %v1938_v21 = vld [vmem:[#allocation11 + $0x148] sm:$0xff] }
 0x68a   : > { %v4487_v27 = vpack.c.bf16 %v1938_v21, %v1937_v20  ;;  %v2114_v21 = vld [vmem:[#allocation13 + $0xd0] sm:$0xff] }
 0x68b   : > { %3975 = vmatprep.mubr.f32.mxu0 %v1736_v23  ;;  %v1955_v23 = vld [vmem:[#allocation11 + $0x1d0] sm:$0xff] }
 0x68c   : > { %v4489_v28 = vpack.c.bf16 %v1956_v26, %v1955_v23  ;;  %v2115_v23 = vld [vmem:[#allocation13 + $0xd8] sm:$0xff] }
 0x68d   : > { %v4553_v26 = vpack.c.bf16 %v2115_v23, %v2114_v21  ;;  %v2305_v21 = vld [vmem:[#allocation11 + $0x230] sm:$0xff]  ;;  %v2306_v23 = vld [vmem:[#allocation11 + $0x238] sm:$0xff] }
 0x72d   : > { %v3504_v47 = vpop.f32.mrb[6].mxu0 }
 0x72e   : > { %v3505_v51 = vpop.f32.mrb[7].mxu0 }
 0x72f   : > { %v3506_v57 = vadd.f32 %v3505_v51, %v3504_v47  ;;  %v4461_v47 = vpack.c.bf16 %v1846_v46, %v1845_v45  ;;  %v4464_v51 = vpack.c.bf16 %v1848_v50, %v1847_v48  ;;  %v2210_v46 = vld [vmem:[#allocation16 + $0xb0] sm:$0xff]  ;;  %v2212_v50 = vld [vmem:[#allocation16 + $0xc0] sm:$0xff] }
 0x731   : > { %v1660_v60 = vmul.f32 %v3506_v57, %v5983_v58  ;;  %4462 = vmatpush3.bf16.msra.mxu1 %v4461_v47  ;;  %v4467_v57 = vpack.c.bf16 %v1850_v53, %v1849_v52  ;;  %v2211_v47 = vld [vmem:[#allocation16 + $0xb8] sm:$0xff] }
 0x732   : > { %4463 = vmatprep.subr.bf16.mxu1 %v5387_v31  ;;  %v4575_v48 = vpack.c.bf16 %v2211_v47, %v2210_v46  ;;  %v2329_v46 = vld [vmem:[#allocation11 + $0x2f0] sm:$0xff]  ;;  %v2330_v47 = vld [vmem:[#allocation11 + $0x2f8] sm:$0xff] }
 0x733   : > { %3976 = vmatmul.mubr.f32.vlgmr.msra.gmra.mrb[8].mxu0 %v1660_v60  ;;  %v3362_v60 = vld [vmem:[#allocation14] ss:$0 sm:$0xff] }
 0x734   : > { %4472 = vmatpush3.bf16.msra.mxu0 %v5985_v59  ;;  %2025 = vmatprep.mubr.f32.mxu0 %v5966_v63 }
 0x735   : > { %4474 = vmatprep.subr.bf16.mxu0 %v5988_v61  ;;  %4465 = vmatpush3.bf16.msra.mxu1 %v4464_v51  ;;  %v2213_v51 = vld [vmem:[#allocation16 + $0xc8] sm:$0xff] }
 0x736   : > { %4466 = vmatprep.subr.bf16.mxu1 %v5387_v31  ;;  %v4578_v52 = vpack.c.bf16 %v2213_v51, %v2212_v50  ;;  %v4617_v50 = vpack.c.bf16 %v2330_v47, %v2329_v46  ;;  %v2313_v51 = vld [vmem:[#allocation11 + $0x270] sm:$0xff]  ;;  %v2574_v46 = vld [vmem:[#allocation16 + $0x100] sm:$0xff] }
 0x737   : > { %v2575_v47 = vld [vmem:[#allocation16 + $0x108] sm:$0xff] }
 0x738   : > { %4476 = vmatpush3.bf16.msra.mxu0 %v5992_v5 }
 0x739   : > { %4478 = vmatprep.subr.bf16.mxu0 %v5995_v6  ;;  %4468 = vmatpush3.bf16.msra.mxu1 %v4467_v57 }
 0x73a   : > { %4502 = vmatprep.subr.bf16.mxu1 %v5975_v32 }
 0x73c   : > { %4480 = vmatpush3.bf16.msra.mxu0 %v5998_v11 }
 0x73d   : > { %4482 = vmatprep.subr.bf16.mxu0 %v6001_v12 }
 0x740   : > { %4484 = vmatpush3.bf16.msra.mxu0 %v4483_v18 }
 0x741   : > { %4486 = vmatprep.subr.bf16.mxu0 %v4485_v19 }
 0x744   : > { %4488 = vmatpush3.bf16.msra.mxu0 %v4487_v27 }
 0x745   : > { %4490 = vmatprep.subr.bf16.mxu0 %v4489_v28 }
 0x748   : > { %4492 = vmatpush3.bf16.msra.mxu0 %v4491_v34 }
 0x749   : > { %4494 = vmatprep.subr.bf16.mxu0 %v4493_v35 }
 0x74c   : > { %4496 = vmatpush3.bf16.msra.mxu0 %v4495_v40 }
 0x74d   : > { %4498 = vmatprep.subr.bf16.mxu0 %v4497_v41 }
 0x750   : > { %4500 = vmatpush3.bf16.msra.mxu0 %v4499_v44 }
 0x753   : > { %2026 = vmatmul.mubr.f32.vlgmr.msra.gmra.mrb[10].mxu0 %v5968_v0 }
 0x806   : > { %v3977_v62 = vpop.f32.mrb[8].mxu0 }
 0x807   : > { %v1826_v2 = vpop.f32.mrb[9].mxu0 }
 0x808   : > { %v1827_v3 = vadd.f32 %v3362_v60, %v1826_v2  ;;  %v2299_v2 = vld [vmem:[#allocation11 + $0x200] sm:$0xff] }
 0x80a   : > { %4991 = vtanh.f32 %v1827_v3  ;;  %v2300_v3 = vld [vmem:[#allocation11 + $0x208] sm:$0xff] }
 0x814   : > { %v4992_v4 = vpop.eup %4991 }
 0x815   : > { %4011 = vmatmul.mubr.f32.vlgmr.msra.gmra.mrb[8].mxu1 %v4992_v4 }
 0x816   : > { %4504 = vmatpush3.bf16.msra.mxu1 %v5985_v59  ;;  %3363 = vmatprep.mubr.msk.f32.mxu1 %vm1544_vm9, %v5388_v1 }
 0x817   : > { %4506 = vmatprep.subr.bf16.mxu1 %v5988_v61  ;;  %v2104_v61 = vld [vmem:[#allocation13 + $0x80] sm:$0xff] }
 0x81a   : > { %4508 = vmatpush3.bf16.msra.mxu1 %v5992_v5  ;;  %v2105_v5 = vld [vmem:[#allocation13 + $0x88] sm:$0xff] }
 0x81b   : > { %4510 = vmatprep.subr.bf16.mxu1 %v5995_v6  ;;  %v4533_v6 = vpack.c.bf16 %v2105_v5, %v2104_v61  ;;  %v6039_v5 = vpack.c.bf16 %v2300_v3, %v2299_v2  ;;  %v2216_v3 = vld [vmem:[#allocation16 + $0xe0] sm:$0xff] }
 0x81d   : > { %4534 = vmatprep.subr.bf16.mxu0 %v4533_v6 }
 0x81e   : > { %4512 = vmatpush3.bf16.msra.mxu1 %v5998_v11  ;;  %v4537_v11 = vpack.c.bf16 %v2107_v9, %v2106_v8  ;;  %4536 = vmatpush3.bf16.msra.mxu0 %v4533_v6  ;;  %v2301_v9 = vld [vmem:[#allocation11 + $0x210] sm:$0xff] }
 0x81f   : > { %4514 = vmatprep.subr.bf16.mxu1 %v6001_v12  ;;  %v2109_v12 = vld [vmem:[#allocation13 + $0xa8] sm:$0xff] }
 0x820   : > { %4538 = vmatprep.subr.bf16.mxu0 %v4537_v11  ;;  %v4541_v13 = vpack.c.bf16 %v2109_v12, %v2108_v10  ;;  %v2302_v10 = vld [vmem:[#allocation11 + $0x218] sm:$0xff]  ;;  %v2320_v12 = vld [vmem:[#allocation11 + $0x2a8] sm:$0xff] }
 0x822   : > { %4516 = vmatpush3.bf16.msra.mxu1 %v4483_v18  ;;  %4540 = vmatpush3.bf16.msra.mxu0 %v4537_v11  ;;  %v2112_v18 = vld [vmem:[#allocation13 + $0xc0] sm:$0xff] }
 0x823   : > { %4518 = vmatprep.subr.bf16.mxu1 %v4485_v19  ;;  %4542 = vmatprep.subr.bf16.mxu0 %v4541_v13  ;;  %v2113_v19 = vld [vmem:[#allocation13 + $0xc8] sm:$0xff]  ;;  %v2319_v11 = vld [vmem:[#allocation11 + $0x2a0] sm:$0xff] }
 0x824   : > { %v4549_v20 = vpack.c.bf16 %v2113_v19, %v2112_v18  ;;  %v6050_v14 = vpack.c.bf16 %v2320_v12, %v2319_v11  ;;  %v2322_v18 = vld [vmem:[#allocation11 + $0x2b8] sm:$0xff] }
 0x826   : > { %v3609_v32 = vpop.f32.mrb[10].mxu0  ;;  %4520 = vmatpush3.bf16.msra.mxu1 %v4487_v27  ;;  %4544 = vmatpush3.bf16.msra.mxu0 %v4541_v13  ;;  %v2116_v27 = vld [vmem:[#allocation13 + $0xe0] sm:$0xff]  ;;  %v6047_v13 = vpack.c.bf16 %v2302_v10, %v2301_v9 }
 0x827   : > { %v3610_v59 = vpop.f32.mrb[11].mxu0  ;;  %4522 = vmatprep.subr.bf16.mxu1 %v4489_v28  ;;  %4546 = vmatprep.subr.bf16.mxu0 %v4545_v17  ;;  %v2117_v28 = vld [vmem:[#allocation13 + $0xe8] sm:$0xff]  ;;  %v3365_v9 = vld [vmem:[#allocation14 + $0x1] ss:$0 sm:$0xff] }
 0x828   : > { %v6019_v7 = vadd.f32 %v3610_v59, %v3609_v32  ;;  %v4557_v29 = vpack.c.bf16 %v2117_v28, %v2116_v27  ;;  %v2317_v32 = vld [vmem:[#allocation11 + $0x290] sm:$0xff]  ;;  %v2318_v59 = vld [vmem:[#allocation11 + $0x298] sm:$0xff]  ;;  %v2324_v27 = vld [vmem:[#allocation11 + $0x2c8] sm:$0xff]  ;;  %v4603_v28 = vpack.c.bf16 %v2306_v23, %v2305_v21 }
 0x829   : > { %v6043_v8 = vpack.c.bf16 %v2318_v59, %v2317_v32  ;;  %v2218_v59 = vld [vmem:[#allocation16 + $0xf0] sm:$0xff]  ;;  %v2479_v21 = vld [vmem:[#allocation13 + $0x128] sm:$0xff] }
 0x82a   : > { %4524 = vmatpush3.bf16.msra.mxu1 %v4491_v34  ;;  %4548 = vmatpush3.bf16.msra.mxu0 %v4545_v17  ;;  %v2315_v34 = vld [vmem:[#allocation11 + $0x280] sm:$0xff]  ;;  %v2031_v6 = vmul.f32 %v6019_v7, %v5983_v58  ;;  %v2304_v7 = vld [vmem:[#allocation11 + $0x228] sm:$0xff]  ;;  %v2321_v17 = vld [vmem:[#allocation11 + $0x2b0] sm:$0xff] }
 0x82b   : > { %4526 = vmatprep.subr.bf16.mxu1 %v4493_v35  ;;  %4550 = vmatprep.subr.bf16.mxu0 %v4549_v20  ;;  %v2316_v35 = vld [vmem:[#allocation11 + $0x288] sm:$0xff]  ;;  %v6053_v19 = vpack.c.bf16 %v2304_v7, %v2303_v15 }
 0x82c   : > { %v6028_v36 = vpack.c.bf16 %v2316_v35, %v2315_v34  ;;  %v2326_v34 = vld [vmem:[#allocation11 + $0x2d8] sm:$0xff]  ;;  %v4607_v35 = vpack.c.bf16 %v2308_v54, %v2307_v30  ;;  %v2483_v30 = vld [vmem:[#allocation13 + $0x148] sm:$0xff] }
 0x82e   : > { %4528 = vmatpush3.bf16.msra.mxu1 %v4495_v40  ;;  %4552 = vmatpush3.bf16.msra.mxu0 %v4549_v20  ;;  %v4566_v40 = vpack.c.bf16 %v2205_v38, %v2204_v37  ;;  %v6056_v20 = vpack.c.bf16 %v2322_v18, %v2321_v17  ;;  %v2309_v38 = vld [vmem:[#allocation11 + $0x250] sm:$0xff]  ;;  %v2477_v18 = vld [vmem:[#allocation13 + $0x118] sm:$0xff] }
 0x82f   : > { %4530 = vmatprep.subr.bf16.mxu1 %v4497_v41  ;;  %4554 = vmatprep.subr.bf16.mxu0 %v4553_v26  ;;  %v2207_v41 = vld [vmem:[#allocation16 + $0x98] sm:$0xff]  ;;  %v2476_v17 = vld [vmem:[#allocation13 + $0x110] sm:$0xff] }
 0x830   : > { %v4569_v42 = vpack.c.bf16 %v2207_v41, %v2206_v39  ;;  %v2310_v39 = vld [vmem:[#allocation11 + $0x258] sm:$0xff]  ;;  %v2328_v41 = vld [vmem:[#allocation11 + $0x2e8] sm:$0xff] }
 0x832   : > { %4532 = vmatpush3.bf16.msra.mxu1 %v4499_v44  ;;  %4556 = vmatpush3.bf16.msra.mxu0 %v4553_v26  ;;  %v2209_v44 = vld [vmem:[#allocation16 + $0xa8] sm:$0xff]  ;;  %v2323_v26 = vld [vmem:[#allocation11 + $0x2c0] sm:$0xff] }
 0x833   : > { %4565 = vmatprep.subr.bf16.mxu1 %v5387_v31  ;;  %4558 = vmatprep.subr.bf16.mxu0 %v4557_v29  ;;  %v4572_v45 = vpack.c.bf16 %v2209_v44, %v2208_v43  ;;  %v2311_v44 = vld [vmem:[#allocation11 + $0x260] sm:$0xff] }
 0x835   : > { %3364 = vmatmul.mubr.msk.f32.vlgmr.msra.gmra.mrb[10].mxu1 %vm1543_vm8, %v5388_v1 }
 0x836   : > { %4080 = vmatprep.mubr.msk.f32.mxu1 %vm5386_vm0, %v5385_v16  ;;  %4560 = vmatpush3.bf16.msra.mxu0 %v4557_v29  ;;  %v4605_v29 = vpack.c.bf16 %v2324_v27, %v2323_v26  ;;  %v2480_v26 = vld [vmem:[#allocation13 + $0x130] sm:$0xff]  ;;  %v2481_v27 = vld [vmem:[#allocation13 + $0x138] sm:$0xff] }
 0x837   : > { %4562 = vmatprep.subr.bf16.mxu0 %v4561_v33  ;;  %4567 = vmatpush3.bf16.msra.mxu1 %v4566_v40  ;;  %v2327_v40 = vld [vmem:[#allocation11 + $0x2e0] sm:$0xff] }
 0x838   : > { %4568 = vmatprep.subr.bf16.mxu1 %v5387_v31  ;;  %v4613_v43 = vpack.c.bf16 %v2328_v41, %v2327_v40  ;;  %v2488_v40 = vld [vmem:[#allocation13 + $0x170] sm:$0xff]  ;;  %v2489_v41 = vld [vmem:[#allocation13 + $0x178] sm:$0xff] }
 0x83a   : > { %4564 = vmatpush3.bf16.msra.mxu0 %v4561_v33  ;;  %v2325_v33 = vld [vmem:[#allocation11 + $0x2d0] sm:$0xff] }
 0x83b   : > { %4590 = vmatprep.subr.bf16.mxu0 %v6028_v36  ;;  %4570 = vmatpush3.bf16.msra.mxu1 %v4569_v42  ;;  %v4609_v37 = vpack.c.bf16 %v2326_v34, %v2325_v33  ;;  %v4611_v42 = vpack.c.bf16 %v2310_v39, %v2309_v38  ;;  %v2484_v33 = vld [vmem:[#allocation13 + $0x150] sm:$0xff]  ;;  %v2485_v34 = vld [vmem:[#allocation13 + $0x158] sm:$0xff]  ;;  %v2487_v38 = vld [vmem:[#allocation13 + $0x168] sm:$0xff] }
 0x83c   : > { %4571 = vmatprep.subr.bf16.mxu1 %v5387_v31 }
 0x83f   : > { %4573 = vmatpush3.bf16.msra.mxu1 %v4572_v45  ;;  %v2312_v45 = vld [vmem:[#allocation11 + $0x268] sm:$0xff] }
 0x840   : > { %4574 = vmatprep.subr.bf16.mxu1 %v5387_v31 }
 0x843   : > { %4576 = vmatpush3.bf16.msra.mxu1 %v4575_v48  ;;  %v4615_v48 = vpack.c.bf16 %v2312_v45, %v2311_v44  ;;  %v2686_v44 = vld [vmem:[#allocation11 + $0x388] sm:$0xff] }
 0x844   : > { %4577 = vmatprep.subr.bf16.mxu1 %v5387_v31 }
 0x847   : > { %4579 = vmatpush3.bf16.msra.mxu1 %v4578_v52  ;;  %v2314_v52 = vld [vmem:[#allocation11 + $0x278] sm:$0xff] }
 0x848   : > { %4580 = vmatprep.subr.bf16.mxu1 %v5387_v31 }
 0x8e8   : > { %v6036_v53 = vpop.f32.mrb[8].mxu1 }
 0x8e9   : > { %v4012_v57 = vpop.f32.mrb[9].mxu1 }
 0x8ea   : > { %v4619_v57 = vpack.c.bf16 %v2314_v52, %v2313_v51  ;;  %v2577_v51 = vld [vmem:[#allocation16 + $0x118] sm:$0xff] }
 0x908   : > { %v3644_v60 = vpop.f32.mrb[10].mxu1 }
 0x909   : > { %v3645_v62 = vpop.f32.mrb[11].mxu1 }
 0x90a   : > { %v3646_v4 = vadd.f32 %v3645_v62, %v3644_v60  ;;  %v2214_v60 = vld [vmem:[#allocation16 + $0xd0] sm:$0xff]  ;;  %v2215_v62 = vld [vmem:[#allocation16 + $0xd8] sm:$0xff] }
 0x90b   : > { %v4581_v2 = vpack.c.bf16 %v2215_v62, %v2214_v60  ;;  %v2579_v60 = vld [vmem:[#allocation16 + $0x128] sm:$0xff] }
 0x90c   : > { %v2102_v61 = vmul.f32 %v3646_v4, %v5972_v22  ;;  %v2217_v4 = vld [vmem:[#allocation16 + $0xe8] sm:$0xff] }
 0x90d   : > { %4582 = vmatpush3.bf16.msra.mxu1 %v4581_v2  ;;  %v4584_v32 = vpack.c.bf16 %v2217_v4, %v2216_v3  ;;  %v2580_v2 = vld [vmem:[#allocation16 + $0x130] sm:$0xff]  ;;  %v2581_v3 = vld [vmem:[#allocation16 + $0x138] sm:$0xff] }
 0x90e   : > { %4045 = vmatprep.mubr.f32.mxu0 %v2102_v61  ;;  %4583 = vmatprep.subr.bf16.mxu1 %v5387_v31  ;;  %v2219_v61 = vld [vmem:[#allocation16 + $0xf8] sm:$0xff]  ;;  %v4695_v4 = vpack.c.bf16 %v2581_v3, %v2580_v2 }
 0x90f   : > { %4046 = vmatmul.mubr.f32.vlgmr.msra.gmra.mrb[12].mxu0 %v2031_v6  ;;  %v4587_v6 = vpack.c.bf16 %v2219_v61, %v2218_v59  ;;  %v2583_v59 = vld [vmem:[#allocation16 + $0x148] sm:$0xff]  ;;  %v2680_v2 = vld [vmem:[#allocation11 + $0x358] sm:$0xff]  ;;  %v2697_v3 = vld [vmem:[#allocation11 + $0x3e0] sm:$0xff] }
 0x910   : > { %4592 = vmatpush3.bf16.msra.mxu0 %v6039_v5  ;;  %2395 = vmatprep.mubr.f32.mxu0 %v5966_v63 }
 0x911   : > { %4594 = vmatprep.subr.bf16.mxu0 %v6043_v8  ;;  %4585 = vmatpush3.bf16.msra.mxu1 %v4584_v32  ;;  %v2582_v32 = vld [vmem:[#allocation16 + $0x140] sm:$0xff] }
 0x912   : > { %4586 = vmatprep.subr.bf16.mxu1 %v5387_v31  ;;  %v4698_v61 = vpack.c.bf16 %v2583_v59, %v2582_v32 }
 0x914   : > { %4596 = vmatpush3.bf16.msra.mxu0 %v6047_v13 }
 0x915   : > { %4598 = vmatprep.subr.bf16.mxu0 %v6050_v14  ;;  %4588 = vmatpush3.bf16.msra.mxu1 %v4587_v6  ;;  %v1851_v6 = vld [vmem:[#allocation17] sm:$0x1] }
 0x916   : > { %4622 = vmatprep.subr.bf16.mxu1 %v6028_v36 }
 0x918   : > { %4600 = vmatpush3.bf16.msra.mxu0 %v6053_v19 }
 0x919   : > { %4602 = vmatprep.subr.bf16.mxu0 %v6056_v20 }
 0x91c   : > { %4604 = vmatpush3.bf16.msra.mxu0 %v4603_v28 }
 0x91d   : > { %4606 = vmatprep.subr.bf16.mxu0 %v4605_v29 }
 0x920   : > { %4608 = vmatpush3.bf16.msra.mxu0 %v4607_v35 }
 0x921   : > { %4610 = vmatprep.subr.bf16.mxu0 %v4609_v37 }
 0x924   : > { %4612 = vmatpush3.bf16.msra.mxu0 %v4611_v42 }
 0x925   : > { %4614 = vmatprep.subr.bf16.mxu0 %v4613_v43 }
 0x928   : > { %4616 = vmatpush3.bf16.msra.mxu0 %v4615_v48 }
 0x929   : > { %4618 = vmatprep.subr.bf16.mxu0 %v4617_v50 }
 0x92c   : > { %4620 = vmatpush3.bf16.msra.mxu0 %v4619_v57 }
 0x92f   : > { %2396 = vmatmul.mubr.f32.vlgmr.msra.gmra.mrb[14].mxu0 %v5968_v0 }
 0x9e2   : > { %v4047_v10 = vpop.f32.mrb[12].mxu0 }
 0x9e3   : > { %v2194_v11 = vpop.f32.mrb[13].mxu0  ;;  %v2221_v10 = vld [vmem:[#allocation17 + $0x1] sm:$0x1] }
 0x9e4   : > { %v2195_v12 = vadd.f32 %v3365_v9, %v2194_v11  ;;  %v1919_v9 = vadd.f32 %v6036_v53, %v1851_v6  ;;  %v2682_v6 = vld [vmem:[#allocation11 + $0x368] sm:$0xff] }
 0x9e6   : > { %4993 = vtanh.f32 %v2195_v12  ;;  %v1926_v11 = vrot.slane %v1919_v9, %v5923_v25  ;;  %v2699_v9 = vld [vmem:[#allocation11 + $0x3f0] sm:$0xff] }
 0x9f0   : > { %v4994_v15 = vpop.eup %4993 }
 0x9f1   : > { %4081 = vmatmul.mubr.f32.vlgmr.msra.gmra.mrb[12].mxu1 %v4994_v15 }
 0x9f2   : > { %4624 = vmatpush3.bf16.msra.mxu1 %v6039_v5  ;;  %3366 = vmatprep.mubr.msk.f32.mxu1 %vm1544_vm9, %v5388_v1 }
 0x9f3   : > { %4626 = vmatprep.subr.bf16.mxu1 %v6043_v8  ;;  %v2474_v8 = vld [vmem:[#allocation13 + $0x100] sm:$0xff] }
 0x9f6   : > { %4628 = vmatpush3.bf16.msra.mxu1 %v6047_v13  ;;  %v2475_v13 = vld [vmem:[#allocation13 + $0x108] sm:$0xff] }
 0x9f7   : > { %4630 = vmatprep.subr.bf16.mxu1 %v6050_v14  ;;  %v4653_v14 = vpack.c.bf16 %v2475_v13, %v2474_v8  ;;  %v1927_v8 = vsel %vm1922_vm10, %v1926_v11, 0.0 }
 0x9f9   : > { %4654 = vmatprep.subr.bf16.mxu0 %v4653_v14 }
 0x9fa   : > { %4632 = vmatpush3.bf16.msra.mxu1 %v6053_v19  ;;  %v2478_v19 = vld [vmem:[#allocation13 + $0x120] sm:$0xff]  ;;  %4656 = vmatpush3.bf16.msra.mxu0 %v4653_v14 }
 0x9fb   : > { %4634 = vmatprep.subr.bf16.mxu1 %v6056_v20  ;;  %v4657_v20 = vpack.c.bf16 %v2477_v18, %v2476_v17  ;;  %v4661_v23 = vpack.c.bf16 %v2479_v21, %v2478_v19  ;;  %v2669_v18 = vld [vmem:[#allocation11 + $0x300] sm:$0xff]  ;;  %v2670_v19 = vld [vmem:[#allocation11 + $0x308] sm:$0xff]  ;;  %v2688_v21 = vld [vmem:[#allocation11 + $0x398] sm:$0xff] }
 0x9fd   : > { %4658 = vmatprep.subr.bf16.mxu0 %v4657_v20 }
 0x9fe   : > { %4636 = vmatpush3.bf16.msra.mxu1 %v4603_v28  ;;  %4660 = vmatpush3.bf16.msra.mxu0 %v4657_v20  ;;  %v4665_v28 = vpack.c.bf16 %v2481_v27, %v2480_v26  ;;  %v2687_v20 = vld [vmem:[#allocation11 + $0x390] sm:$0xff]  ;;  %v6099_v26 = vpack.c.bf16 %v2670_v19, %v2669_v18  ;;  %v2586_v18 = vld [vmem:[#allocation16 + $0x160] sm:$0xff] }
 0x9ff   : > { %4638 = vmatprep.subr.bf16.mxu1 %v4605_v29  ;;  %4662 = vmatprep.subr.bf16.mxu0 %v4661_v23  ;;  %v2482_v29 = vld [vmem:[#allocation13 + $0x140] sm:$0xff]  ;;  %v2587_v19 = vld [vmem:[#allocation16 + $0x168] sm:$0xff] }
 0xa00   : > { %v4669_v54 = vpack.c.bf16 %v2483_v30, %v2482_v29  ;;  %v2671_v29 = vld [vmem:[#allocation11 + $0x310] sm:$0xff]  ;;  %v2672_v30 = vld [vmem:[#allocation11 + $0x318] sm:$0xff] }
 0xa02   : > { %v3714_v36 = vpop.f32.mrb[14].mxu0  ;;  %4640 = vmatpush3.bf16.msra.mxu1 %v4607_v35  ;;  %4664 = vmatpush3.bf16.msra.mxu0 %v4661_v23  ;;  %v4673_v35 = vpack.c.bf16 %v2485_v34, %v2484_v33  ;;  %v2690_v33 = vld [vmem:[#allocation11 + $0x3a8] sm:$0xff]  ;;  %v6107_v34 = vpack.c.bf16 %v2672_v30, %v2671_v29 }
 0xa03   : > { %v3715_v5 = vpop.f32.mrb[15].mxu0  ;;  %4642 = vmatprep.subr.bf16.mxu1 %v4609_v37  ;;  %4666 = vmatprep.subr.bf16.mxu0 %v4665_v28  ;;  %v2486_v37 = vld [vmem:[#allocation13 + $0x160] sm:$0xff] }
 0xa04   : > { %v6074_v7 = vadd.f32 %v3715_v5, %v3714_v36  ;;  %v4677_v39 = vpack.c.bf16 %v2487_v38, %v2486_v37  ;;  %v2673_v37 = vld [vmem:[#allocation11 + $0x320] sm:$0xff]  ;;  %v2691_v38 = vld [vmem:[#allocation11 + $0x3b0] sm:$0xff] }
 0xa06   : > { %4644 = vmatpush3.bf16.msra.mxu1 %v4611_v42  ;;  %4668 = vmatpush3.bf16.msra.mxu0 %v4665_v28  ;;  %v4681_v42 = vpack.c.bf16 %v2489_v41, %v2488_v40  ;;  %v2401_v27 = vmul.f32 %v6074_v7, %v5983_v58  ;;  %v6103_v28 = vpack.c.bf16 %v2688_v21, %v2687_v20  ;;  %v2674_v7 = vld [vmem:[#allocation11 + $0x328] sm:$0xff]  ;;  %v2588_v20 = vld [vmem:[#allocation16 + $0x170] sm:$0xff]  ;;  %v2589_v21 = vld [vmem:[#allocation16 + $0x178] sm:$0xff] }
 0xa07   : > { %4646 = vmatprep.subr.bf16.mxu1 %v4613_v43  ;;  %4670 = vmatprep.subr.bf16.mxu0 %v4669_v54  ;;  %v2685_v43 = vld [vmem:[#allocation11 + $0x380] sm:$0xff]  ;;  %v6113_v40 = vpack.c.bf16 %v2674_v7, %v2673_v37  ;;  %v2847_v37 = vld [vmem:[#allocation13 + $0x198] sm:$0xff] }
 0xa08   : > { %v6083_v45 = vpack.c.bf16 %v2686_v44, %v2685_v43  ;;  %v2693_v43 = vld [vmem:[#allocation11 + $0x3c0] sm:$0xff]  ;;  %v2694_v44 = vld [vmem:[#allocation11 + $0x3c8] sm:$0xff] }
 0xa0a   : > { %4648 = vmatpush3.bf16.msra.mxu1 %v4615_v48  ;;  %4672 = vmatpush3.bf16.msra.mxu0 %v4669_v54  ;;  %v2576_v48 = vld [vmem:[#allocation16 + $0x110] sm:$0xff]  ;;  %v2689_v54 = vld [vmem:[#allocation11 + $0x3a0] sm:$0xff] }
 0xa0b   : > { %4650 = vmatprep.subr.bf16.mxu1 %v4617_v50  ;;  %4674 = vmatprep.subr.bf16.mxu0 %v4673_v35  ;;  %v4686_v50 = vpack.c.bf16 %v2575_v47, %v2574_v46  ;;  %v4689_v52 = vpack.c.bf16 %v2577_v51, %v2576_v48  ;;  %v4725_v47 = vpack.c.bf16 %v2694_v44, %v2693_v43  ;;  %v2677_v48 = vld [vmem:[#allocation11 + $0x340] sm:$0xff]  ;;  %v2695_v51 = vld [vmem:[#allocation11 + $0x3d0] sm:$0xff]  ;;  %v2855_v43 = vld [vmem:[#allocation13 + $0x1d8] sm:$0xff] }
 0xa0e   : > { %4652 = vmatpush3.bf16.msra.mxu1 %v4619_v57  ;;  %4676 = vmatpush3.bf16.msra.mxu0 %v4673_v35  ;;  %v2578_v57 = vld [vmem:[#allocation16 + $0x120] sm:$0xff]  ;;  %v6110_v35 = vpack.c.bf16 %v2690_v33, %v2689_v54 }
 0xa0f   : > { %4685 = vmatprep.subr.bf16.mxu1 %v5387_v31  ;;  %4678 = vmatprep.subr.bf16.mxu0 %v4677_v39  ;;  %v4692_v62 = vpack.c.bf16 %v2579_v60, %v2578_v57 }
 0xa11   : > { %3367 = vmatmul.mubr.msk.f32.vlgmr.msra.gmra.mrb[14].mxu1 %vm1543_vm8, %v5388_v1 }
 0xa12   : > { %4150 = vmatprep.mubr.msk.f32.mxu1 %vm5386_vm0, %v5385_v16  ;;  %4680 = vmatpush3.bf16.msra.mxu0 %v4677_v39  ;;  %v2692_v39 = vld [vmem:[#allocation11 + $0x3b8] sm:$0xff] }
 0xa13   : > { %4682 = vmatprep.subr.bf16.mxu0 %v4681_v42  ;;  %4687 = vmatpush3.bf16.msra.mxu1 %v4686_v50  ;;  %v6116_v41 = vpack.c.bf16 %v2692_v39, %v2691_v38  ;;  %v2678_v50 = vld [vmem:[#allocation11 + $0x348] sm:$0xff]  ;;  %v2848_v38 = vld [vmem:[#allocation13 + $0x1a0] sm:$0xff] }
 0xa14   : > { %4688 = vmatprep.subr.bf16.mxu1 %v5387_v31  ;;  %v4727_v57 = vpack.c.bf16 %v2678_v50, %v2677_v48  ;;  %v2849_v39 = vld [vmem:[#allocation13 + $0x1a8] sm:$0xff]  ;;  %v2858_v50 = vld [vmem:[#allocation13 + $0x1f0] sm:$0xff] }
 0xa16   : > { %4684 = vmatpush3.bf16.msra.mxu0 %v4681_v42  ;;  %v2675_v42 = vld [vmem:[#allocation11 + $0x330] sm:$0xff] }
 0xa17   : > { %4710 = vmatprep.subr.bf16.mxu0 %v6083_v45  ;;  %4690 = vmatpush3.bf16.msra.mxu1 %v4689_v52  ;;  %v2696_v52 = vld [vmem:[#allocation11 + $0x3d8] sm:$0xff] }
 0xa18   : > { %4691 = vmatprep.subr.bf16.mxu1 %v5387_v31  ;;  %v4729_v60 = vpack.c.bf16 %v2696_v52, %v2695_v51  ;;  %v2859_v51 = vld [vmem:[#allocation13 + $0x1f8] sm:$0xff] }
 0xa19   : > { %v4801_v52 = vpack.c.bf16 %v2859_v51, %v2858_v50 }
 0xa1b   : > { %4693 = vmatpush3.bf16.msra.mxu1 %v4692_v62  ;;  %v2679_v62 = vld [vmem:[#allocation11 + $0x350] sm:$0xff] }
 0xa1c   : > { %4694 = vmatprep.subr.bf16.mxu1 %v5387_v31  ;;  %v4731_v32 = vpack.c.bf16 %v2680_v2, %v2679_v62  ;;  %v2946_v62 = vld [vmem:[#allocation16 + $0x190] sm:$0xff] }
 0xa1f   : > { %4696 = vmatpush3.bf16.msra.mxu1 %v4695_v4  ;;  %v2698_v4 = vld [vmem:[#allocation11 + $0x3e8] sm:$0xff] }
 0xa20   : > { %4697 = vmatprep.subr.bf16.mxu1 %v5387_v31  ;;  %v4733_v59 = vpack.c.bf16 %v2698_v4, %v2697_v3  ;;  %v2947_v3 = vld [vmem:[#allocation16 + $0x198] sm:$0xff] }
 0xa21   : > { %v4809_v4 = vpack.c.bf16 %v2947_v3, %v2946_v62 }
 0xa23   : > { %4699 = vmatpush3.bf16.msra.mxu1 %v4698_v61  ;;  %v2681_v61 = vld [vmem:[#allocation11 + $0x360] sm:$0xff] }
 0xa24   : > { %4700 = vmatprep.subr.bf16.mxu1 %v5387_v31  ;;  %v4735_v11 = vpack.c.bf16 %v2682_v6, %v2681_v61  ;;  %v2950_v6 = vld [vmem:[#allocation16 + $0x1b0] sm:$0xff] }
 0xac4   : > { %v2288_v12 = vpop.f32.mrb[12].mxu1 }
 0xac5   : > { %v2289_v15 = vadd.f32 %v2288_v12, %v2221_v10  ;;  %v4082_v36 = vpop.f32.mrb[13].mxu1  ;;  %v2700_v10 = vld [vmem:[#allocation11 + $0x3f8] sm:$0xff] }
 0xac6   : > { %v4737_v12 = vpack.c.bf16 %v2700_v10, %v2699_v9  ;;  %v2684_v36 = vld [vmem:[#allocation11 + $0x378] sm:$0xff] }
 0xac7   : > { %v2296_v5 = vrot.slane %v2289_v15, %v5923_v25  ;;  %v2683_v15 = vld [vmem:[#allocation11 + $0x370] sm:$0xff]  ;;  %v2951_v9 = vld [vmem:[#allocation16 + $0x1b8] sm:$0xff] }
 0xac8   : > { %v4815_v10 = vpack.c.bf16 %v2951_v9, %v2950_v6 }
 0xac9   : > { %v6096_v13 = vsel %vm2292_vm11, %v2296_v5, %v1927_v8  ;;  %v4739_v5 = vpack.c.bf16 %v2684_v36, %v2683_v15  ;;  %v2584_v8 = vld [vmem:[#allocation16 + $0x150] sm:$0xff]  ;;  %v2591_v36 = vld [vmem:[#allocation17 + $0x2] sm:$0x1] }
 0xae4   : > { %v3749_v14 = vpop.f32.mrb[14].mxu1 }
 0xae5   : > { %v3750_v17 = vpop.f32.mrb[15].mxu1 }
 0xae6   : > { %v3751_v53 = vadd.f32 %v3750_v17, %v3749_v14  ;;  %v2585_v14 = vld [vmem:[#allocation16 + $0x158] sm:$0xff] }
 0xae7   : > { %v4701_v17 = vpack.c.bf16 %v2585_v14, %v2584_v8 }
 0xae8   : > { %v2472_v23 = vmul.f32 %v3751_v53, %v5972_v22  ;;  %v4704_v53 = vpack.c.bf16 %v2587_v19, %v2586_v18 }
 0xae9   : > { %4702 = vmatpush3.bf16.msra.mxu1 %v4701_v17 }
 0xaea   : > { %4115 = vmatprep.mubr.f32.mxu0 %v2472_v23  ;;  %4703 = vmatprep.subr.bf16.mxu1 %v5387_v31  ;;  %v4707_v23 = vpack.c.bf16 %v2589_v21, %v2588_v20 }
 0xaeb   : > { %4116 = vmatmul.mubr.f32.vlgmr.msra.gmra.mrb[16].mxu0 %v2401_v27  ;;  %v3368_v27 = vld [vmem:[#allocation14 + $0x2] ss:$0 sm:$0xff] }
 0xaec   : > { %4712 = vmatpush3.bf16.msra.mxu0 %v6099_v26  ;;  %2765 = vmatprep.mubr.f32.mxu0 %v5966_v63  ;;  %v2676_v63 = vld [vmem:[#allocation11 + $0x338] sm:$0xff] }
 0xaed   : > { %4714 = vmatprep.subr.bf16.mxu0 %v6103_v28  ;;  %v4723_v46 = vpack.c.bf16 %v2676_v63, %v2675_v42  ;;  %4705 = vmatpush3.bf16.msra.mxu1 %v4704_v53  ;;  %v2851_v42 = vld [vmem:[#allocation13 + $0x1b8] sm:$0xff]  ;;  %v2854_v63 = vld [vmem:[#allocation13 + $0x1d0] sm:$0xff] }
 0xaee   : > { %4706 = vmatprep.subr.bf16.mxu1 %v5387_v31  ;;  %v4793_v44 = vpack.c.bf16 %v2855_v43, %v2854_v63 }
 0xaf0   : > { %4716 = vmatpush3.bf16.msra.mxu0 %v6107_v34 }
 0xaf1   : > { %4718 = vmatprep.subr.bf16.mxu0 %v6110_v35  ;;  %4708 = vmatpush3.bf16.msra.mxu1 %v4707_v23 }
 0xaf2   : > { %4742 = vmatprep.subr.bf16.mxu1 %v6083_v45 }
 0xaf4   : > { %4720 = vmatpush3.bf16.msra.mxu0 %v6113_v40 }
 0xaf5   : > { %4722 = vmatprep.subr.bf16.mxu0 %v6116_v41 }
 0xaf8   : > { %4724 = vmatpush3.bf16.msra.mxu0 %v4723_v46 }
 0xaf9   : > { %4726 = vmatprep.subr.bf16.mxu0 %v4725_v47 }
 0xafc   : > { %4728 = vmatpush3.bf16.msra.mxu0 %v4727_v57 }
 0xafd   : > { %4730 = vmatprep.subr.bf16.mxu0 %v4729_v60 }
 0xb00   : > { %4732 = vmatpush3.bf16.msra.mxu0 %v4731_v32 }
 0xb01   : > { %4734 = vmatprep.subr.bf16.mxu0 %v4733_v59 }
 0xb04   : > { %4736 = vmatpush3.bf16.msra.mxu0 %v4735_v11 }
 0xb05   : > { %4738 = vmatprep.subr.bf16.mxu0 %v4737_v12 }
 0xb08   : > { %4740 = vmatpush3.bf16.msra.mxu0 %v4739_v5 }
 0xb0b   : > { %2766 = vmatmul.mubr.f32.vlgmr.msra.gmra.mrb[18].mxu0 %v5968_v0 }
 0xbbe   : > { %v4117_v0 = vpop.f32.mrb[16].mxu0 }
 0xbbf   : > { %v2564_v29 = vpop.f32.mrb[17].mxu0  ;;  %v2955_v0 = vld [vmem:[#allocation16 + $0x1d8] sm:$0xff] }
 0xbc0   : > { %v2565_v30 = vadd.f32 %v3368_v27, %v2564_v29  ;;  %v2954_v27 = vld [vmem:[#allocation16 + $0x1d0] sm:$0xff] }
 0xbc1   : > { %v4821_v29 = vpack.c.bf16 %v2955_v0, %v2954_v27 }
 0xbc2   : > { %4995 = vtanh.f32 %v2565_v30  ;;  %v2956_v30 = vld [vmem:[#allocation16 + $0x1e0] sm:$0xff] }
 0xbcc   : > { %v4996_v54 = vpop.eup %4995 }
 0xbcd   : > { %4151 = vmatmul.mubr.f32.vlgmr.msra.gmra.mrb[16].mxu1 %v4996_v54  ;;  %v2957_v54 = vld [vmem:[#allocation16 + $0x1e8] sm:$0xff] }
 0xbce   : > { %4744 = vmatpush3.bf16.msra.mxu1 %v6099_v26  ;;  %3369 = vmatprep.mubr.msk.f32.mxu1 %vm1544_vm9, %v5388_v1 }
 0xbcf   : > { %4746 = vmatprep.subr.bf16.mxu1 %v6103_v28  ;;  %v2845_v28 = vld [vmem:[#allocation13 + $0x188] sm:$0xff] }
 0xbd2   : > { %4748 = vmatpush3.bf16.msra.mxu1 %v6107_v34  ;;  %v4773_v34 = vpack.c.bf16 %v2845_v28, %v2844_v56 }
 0xbd3   : > { %4750 = vmatprep.subr.bf16.mxu1 %v6110_v35  ;;  %v2846_v35 = vld [vmem:[#allocation13 + $0x190] sm:$0xff] }
 0xbd4   : > { %v4777_v7 = vpack.c.bf16 %v2847_v37, %v2846_v35  ;;  %4774 = vmatprep.subr.bf16.mxu0 %v4773_v34 }
 0xbd5   : > { %4776 = vmatpush3.bf16.msra.mxu0 %v4773_v34 }
 0xbd6   : > { %4752 = vmatpush3.bf16.msra.mxu1 %v6113_v40  ;;  %4778 = vmatprep.subr.bf16.mxu0 %v4777_v7  ;;  %v4781_v40 = vpack.c.bf16 %v2849_v39, %v2848_v38 }
 0xbd7   : > { %4754 = vmatprep.subr.bf16.mxu1 %v6116_v41  ;;  %v2850_v41 = vld [vmem:[#allocation13 + $0x1b0] sm:$0xff] }
 0xbd8   : > { %v4785_v55 = vpack.c.bf16 %v2851_v42, %v2850_v41 }
 0xbd9   : > { %4780 = vmatpush3.bf16.msra.mxu0 %v4777_v7 }
 0xbda   : > { %4756 = vmatpush3.bf16.msra.mxu1 %v4723_v46  ;;  %4782 = vmatprep.subr.bf16.mxu0 %v4781_v40  ;;  %v2856_v46 = vld [vmem:[#allocation13 + $0x1e0] sm:$0xff] }
 0xbdb   : > { %4758 = vmatprep.subr.bf16.mxu1 %v4725_v47  ;;  %v2857_v47 = vld [vmem:[#allocation13 + $0x1e8] sm:$0xff] }
 0xbdc   : > { %v4797_v48 = vpack.c.bf16 %v2857_v47, %v2856_v46 }
 0xbdd   : > { %4784 = vmatpush3.bf16.msra.mxu0 %v4781_v40 }
 0xbde   : > { %v3819_v45 = vpop.f32.mrb[18].mxu0  ;;  %4760 = vmatpush3.bf16.msra.mxu1 %v4727_v57  ;;  %4786 = vmatprep.subr.bf16.mxu0 %v4785_v55  ;;  %v2944_v57 = vld [vmem:[#allocation16 + $0x180] sm:$0xff] }
 0xbdf   : > { %v3820_v26 = vpop.f32.mrb[19].mxu0  ;;  %4762 = vmatprep.subr.bf16.mxu1 %v4729_v60  ;;  %v2945_v60 = vld [vmem:[#allocation16 + $0x188] sm:$0xff] }
 0xbe0   : > { %v6134_v33 = vadd.f32 %v3820_v26, %v3819_v45  ;;  %v4806_v2 = vpack.c.bf16 %v2945_v60, %v2944_v57  ;;  %v2958_v45 = vld [vmem:[#allocation16 + $0x1f0] sm:$0xff]  ;;  %v2959_v26 = vld [vmem:[#allocation16 + $0x1f8] sm:$0xff] }
 0xbe1   : > { %4788 = vmatpush3.bf16.msra.mxu0 %v4785_v55 }
 0xbe2   : > { %4764 = vmatpush3.bf16.msra.mxu1 %v4731_v32  ;;  %v2948_v32 = vld [vmem:[#allocation16 + $0x1a0] sm:$0xff]  ;;  %v2771_v23 = vmul.f32 %v6134_v33, %v5983_v58  ;;  %v3371_v58 = vld [vmem:[#allocation14 + $0x3] ss:$0 sm:$0xff] }
 0xbe3   : > { %4766 = vmatprep.subr.bf16.mxu1 %v4733_v59  ;;  %v2949_v59 = vld [vmem:[#allocation16 + $0x1a8] sm:$0xff] }
 0xbe4   : > { %v4812_v61 = vpack.c.bf16 %v2949_v59, %v2948_v32 }
 0xbe6   : > { %4768 = vmatpush3.bf16.msra.mxu1 %v4735_v11  ;;  %v2952_v11 = vld [vmem:[#allocation16 + $0x1c0] sm:$0xff] }
 0xbe7   : > { %4770 = vmatprep.subr.bf16.mxu1 %v4737_v12  ;;  %v2953_v12 = vld [vmem:[#allocation16 + $0x1c8] sm:$0xff] }
 0xbe8   : > { %v4818_v15 = vpack.c.bf16 %v2953_v12, %v2952_v11 }
 0xbea   : > { %4772 = vmatpush3.bf16.msra.mxu1 %v4739_v5 }
 0xbeb   : > { %4805 = vmatprep.subr.bf16.mxu1 %v5387_v31 }
 0xbed   : > { %3370 = vmatmul.mubr.msk.f32.vlgmr.msra.gmra.mrb[18].mxu1 %vm1543_vm8, %v5388_v1  ;;  %v2852_v1 = vld [vmem:[#allocation13 + $0x1c0] sm:$0xff] }
 0xbee   : > { %4220 = vmatprep.mubr.msk.f32.mxu1 %vm5386_vm0, %v5385_v16  ;;  %v4789_v16 = vpack.c.bf16 %v2853_v49, %v2852_v1  ;;  %4807 = vmatpush3.bf16.msra.mxu1 %v4806_v2 }
 0xbef   : > { %4808 = vmatprep.subr.bf16.mxu1 %v5387_v31 }
 0xbf0   : > { %4790 = vmatprep.subr.bf16.mxu0 %v4789_v16 }
 0xbf1   : > { %4792 = vmatpush3.bf16.msra.mxu0 %v4789_v16 }
 0xbf2   : > { %4794 = vmatprep.subr.bf16.mxu0 %v4793_v44  ;;  %4810 = vmatpush3.bf16.msra.mxu1 %v4809_v4 }
 0xbf3   : > { %4811 = vmatprep.subr.bf16.mxu1 %v5387_v31 }
 0xbf5   : > { %4796 = vmatpush3.bf16.msra.mxu0 %v4793_v44 }
 0xbf6   : > { %4798 = vmatprep.subr.bf16.mxu0 %v4797_v48  ;;  %4813 = vmatpush3.bf16.msra.mxu1 %v4812_v61 }
 0xbf7   : > { %4814 = vmatprep.subr.bf16.mxu1 %v5387_v31 }
 0xbf9   : > { %4800 = vmatpush3.bf16.msra.mxu0 %v4797_v48 }
 0xbfa   : > { %4802 = vmatprep.subr.bf16.mxu0 %v4801_v52  ;;  %4816 = vmatpush3.bf16.msra.mxu1 %v4815_v10 }
 0xbfb   : > { %4817 = vmatprep.subr.bf16.mxu1 %v5387_v31 }
 0xbfd   : > { %4804 = vmatpush3.bf16.msra.mxu0 %v4801_v52 }
 0xbfe   : > { %4819 = vmatpush3.bf16.msra.mxu1 %v4818_v15 }
 0xbff   : > { %4820 = vmatprep.subr.bf16.mxu1 %v5387_v31 }
 0xc02   : > { %4822 = vmatpush3.bf16.msra.mxu1 %v4821_v29 }
 0xc03   : > { %4823 = vmatprep.subr.bf16.mxu1 %v5387_v31 }
 0xca0   : > { %v2658_v5 = vpop.f32.mrb[16].mxu1 }
 0xca1   : > { %v2659_v8 = vadd.f32 %v2658_v5, %v2591_v36  ;;  %v4152_v14 = vpop.f32.mrb[17].mxu1 }
 0xca3   : > { %v2666_v17 = vrot.slane %v2659_v8, %v5923_v25 }
 0xca5   : > { %v6151_v18 = vsel %vm2662_vm12, %v2666_v17, %v6096_v13  ;;  %v4824_v13 = vpack.c.bf16 %v2957_v54, %v2956_v30 }
 0xca7   : > { %4825 = vmatpush3.bf16.msra.mxu1 %v4824_v13 }
 0xca8   : > { %4826 = vmatprep.subr.bf16.mxu1 %v5387_v31 }
 0xcc0   : > { %v3854_v19 = vpop.f32.mrb[18].mxu1 }
 0xcc1   : > { %v3855_v53 = vpop.f32.mrb[19].mxu1 }
 0xcc2   : > { %v3856_v20 = vadd.f32 %v3855_v53, %v3854_v19 }
 0xcc4   : > { %v2842_v21 = vmul.f32 %v3856_v20, %v5972_v22  ;;  %v4827_v22 = vpack.c.bf16 %v2959_v26, %v2958_v45 }
 0xcc6   : > { %4185 = vmatprep.mubr.f32.mxu0 %v2842_v21  ;;  %4828 = vmatpush3.bf16.msra.mxu1 %v4827_v22 }
 0xcc7   : > { %4186 = vmatmul.mubr.f32.vlgmr.msra.gmra.mrb[20].mxu0 %v2771_v23 }
 0xd9a   : > { %v4187_v33 = vpop.f32.mrb[20].mxu0 }
 0xd9b   : > { %v2939_v56 = vadd.f32 %v4187_v33, %v3371_v58  ;;  %v2934_v28 = vpop.f32.mrb[21].mxu0 }
 0xd9d   : > { %4997 = vtanh.f32 %v2939_v56 }
 0xda7   : > { %v4998_v34 = vpop.eup %4997 }
 0xda8   : > { %4221 = vmatmul.mubr.f32.vlgmr.msra.gmra.mrb[20].mxu1 %v4998_v34 }
 0xda9   : > { %5294 = shalt.err (!%p5291_p2)
}
 0xdaa   : > { %s5295_s3 = scalar_lea.hbm %s6163_s5, 256  ;;  %s5299_s20 = scalar_lea.hbm %s6295_s0, 512 }
 0xdab   : > { %p5296_p3 = scmp.ne.s32.totalorder %s6163_s5, %s5295_s3  ;;  %p5300_p8 = scmp.lt.u32.totalorder %s6163_s5, %s6295_s0 }
 0xdac   : > { %p5301_p11 = scmp.lt.u32.totalorder %s5299_s20, %s5295_s3  ;;  %p5303_p0 = scmp.lt.u32.totalorder %s5295_s3, %s6163_s5 }
 0xdad   : > { %p5297_p4 = pnand %p5296_p3, %p6296_p1 }
 0xdae   : > { %p5302_p13 = por %p5301_p11, %p5300_p8 }
 0xdaf   : > { %p5298_p7 = pneg %p5297_p4 }
 0xdb0   : > { %p5304_p6 = por %p5303_p0, %p5302_p13 }
 0xdb2   : > { %p5305_p5 = pnand %p5304_p6, %p5298_p7 }
 0xdb4   : > { %5308 = shalt.err (!%p5305_p5)
}
 0xdb5   : > { %4869 = dma.vmem_to_hbm [thread:$0]  (%p6296_p1), %s3060_s26, 256, %s6163_s5, %s3041_s1   ;;  %v2961_v31 = vld [vmem:[#allocation17 + $0x3] sm:$0x1]  ;;  %vm3033_vm13 = vcmp.eq.s32.totalorder %v5920_v24, 3 }
 0xdb6   : > { %s6297_s30 = sld [smem:[#allocation45_spill]] }
 0xdbc   : > { %s911_s25 = scalar_lea.vmem %s6297_s30, %s3347_s8 }
 0xe7b   : > { %v3028_v35 = vpop.f32.mrb[20].mxu1 }
 0xe7c   : > { %v3029_v37 = vadd.f32 %v3028_v35, %v2961_v31  ;;  %v4222_v7 = vpop.f32.mrb[21].mxu1 }
 0xe7e   : > { %4999 = vtanh.f32 %v3029_v37 }
 0xe88   : > { %v5000_v38 = vpop.eup %4999 }
 0xe89   : > { %v3037_v39 = vrot.slane %v5000_v38, %v5923_v25 }
 0xe8b   : > { %v3038_v40 = vsel %vm3033_vm13, %v3037_v39, %v6151_v18 }
 0xe8c   : > { %3039 = vst [vmem:[%s911_s25] sm:$0xf] %v3038_v40 }
 0xe8d PF: > { %s6298_s4 = sld [smem:[#allocation30_spill]]  ;;  %s6299_s26 = sld [smem:[#allocation27_spill]] }
 0xe8e   : > { %s6300_s5 = sld [smem:[#allocation34_spill]] }
 0xe93   : > { %p4926_p1 = scmp.ge.s32.totalorder %s6298_s4, 2  ;;  %s3074_s1 = sand.u32 1, %s6299_s26  }
 0xe94   : > { %p6301_p9 = scmp.ne.s32.totalorder %s6300_s5, 0  ;;  %s3075_s28 = scalar_lea.sflag [#allocation4], %s3074_s1 }
 0xe96   : > { %p4903_p12 = pnand %p4926_p1, %p6301_p9 }
 0xe98   : > { %5350 = dma.done.wait (!%p4903_p12), %s3075_s28, 256  }
 0xe99   : > { %5352 = vsyncadd (!%p4903_p12), %s3075_s28, 4294967040  ;;  %s6302_s27 = sld [smem:[#allocation31_spill]]  ;;  %s6303_s2 = sld [smem:[#allocation28_spill]] }
 0xe9a   : > { %s6304_s25 = sld [smem:[#allocation29_spill]]  ;;  %s6305_s26 = sld [smem:[#allocation32_spill]] }
 0xe9f   : > { %p38_p10 = scmp.ge.s32.totalorder %s6302_s27, 4  }
 0xea1   :  { %40 = sbr.rel (!%p38_p10) target bundleno = 21 (0x15), region = 221 }
 0xea8   :  { %3087 = vsyncpa [#allocation3], 1 }
 0xea9   :  { %3089 = vsyncpa [#allocation3 + $0x1], 1 }
 0xeaa   :  { %3090 = vsyncpa [#allocation6], 1 }
 0xeab   :  { %3091 = vsyncpa [#allocation9], 1 }
 0xeac   :  { %3092 = vsyncpa [#allocation12], 1 }
 0xead   :  { %3093 = vsyncpa [#allocation15], 1 }
 0xeae   :  { %3094 = vsyncpa [#allocation18], 1 }
 0xeaf   :  { %3095 = vsyncpa [#allocation4], 1 }
 0xeb0   :  { %3097 = vsyncpa [#allocation4 + $0x1], 1 }

</bundles_post_ra>
